<compile_context>
chip_gen: v7x
topology: tpu7x:2x2x1
jax: 0.10.0
libtpu: 0.0.40
codegen_flags: <defaults>
</compile_context>

<pallas_src>
import functools

import jax
import jax.numpy as jnp
from jax.experimental import pallas as pl
from jax.experimental.pallas import tpu as pltpu

NEG_INF = -1e9
# Scoped-VMEM budget: safe on v7x (64 MiB physical per TC), generous on
# v5e/v6e (128 MiB physical).
_VMEM_LIMIT = 48 * 1024 * 1024
# pl.reciprocal(approx=True) in the attention softmax uses the EUP (fast) but
# introduces ~2^-12 relative error; flip to False for bit-faithful softmax.
APPROX_SOFTMAX_RECIP = True


def _round_up(x, m):
    return ((x + m - 1) // m) * m


# ----------------------------- in-kernel helpers -----------------------------

def _layernorm(x, g, b, eps=1e-12):
    x = x.astype(jnp.float32)
    mu = jnp.mean(x, axis=-1, keepdims=True)
    var = jnp.mean(jnp.square(x - mu), axis=-1, keepdims=True)
    return (x - mu) * jax.lax.rsqrt(var + eps) * g + b


def _bf16_dot(a, b):
    """[M,K] @ [K,N] on the MXU in bf16, f32 accumulation."""
    return jnp.dot(a.astype(jnp.bfloat16), b.astype(jnp.bfloat16),
                   preferred_element_type=jnp.float32)


# ----------------------- fused attention sublayer kernel ----------------------
# Per (batch, q-tile): [input LN] -> wide QKV GEMMs -> per-head softmax-attn
#                       -> wide out-proj GEMM -> residual -> LN.

def _attn_sublayer_kernel(xq_ref, xkv_ref, kvmask_ref,
                          wqkv_ref, bqkv_ref, wo_ref, bo_ref,
                          gin_ref, bin_ref, gout_ref, bout_ref,
                          o_ref, *, causal, fuse_input_ln, is_self, scale,
                          num_heads):
    tq = xq_ref.shape[1]
    Lk = xkv_ref.shape[1]
    D = xq_ref.shape[2]
    H = num_heads
    Dh = D // H
    qt = pl.program_id(1)

    xq = xq_ref[0].astype(jnp.float32)                      # [tq, D]
    if fuse_input_ln:
        xq = _layernorm(xq, gin_ref[...], bin_ref[...])
    xkv = xkv_ref[0].astype(jnp.float32)                    # [Lk, D]
    if is_self and fuse_input_ln:
        xkv = _layernorm(xkv, gin_ref[...], bin_ref[...])

    # Hoisted bf16 casts + full-width projection GEMMs (one per Q/K/V).
    xq_b = xq.astype(jnp.bfloat16)
    xkv_b = xkv.astype(jnp.bfloat16)
    q = (_bf16_dot(xq_b, wqkv_ref[0]) + bqkv_ref[0]).astype(jnp.bfloat16)
    k = (_bf16_dot(xkv_b, wqkv_ref[1]) + bqkv_ref[1]).astype(jnp.bfloat16)
    v = (_bf16_dot(xkv_b, wqkv_ref[2]) + bqkv_ref[2]).astype(jnp.bfloat16)

    # Additive attention bias built in-kernel (no [B*H,Lq,Lk] HBM traffic).
    # Fully-padded key rows give a uniform softmax over padding; downstream
    # loss masking must cover those query rows (it does: tgt_mask / x pad).
    bias = (kvmask_ref[0] - 1.0) * 1e9                      # [1, Lk]
    bias = jnp.broadcast_to(bias, (tq, Lk))
    if causal:
        rows = jax.lax.broadcasted_iota(jnp.int32, (tq, Lk), 0) + qt * tq
        cols = jax.lax.broadcasted_iota(jnp.int32, (tq, Lk), 1)
        bias = bias + jnp.where(cols <= rows, 0.0, NEG_INF)

    # Per-head score/softmax/context.  Projections are hoisted, so only the
    # [tq,Lk] scores and a [tq,Dh] context slice are live per head.
    # TODO(synk): for very large H, move heads onto a grid axis / fori_loop.
    ctx_parts = []
    for h in range(H):
        sl = slice(h * Dh, (h + 1) * Dh)
        s = jax.lax.dot_general(
            q[:, sl], k[:, sl], (((1,), (1,)), ((), ())),
            preferred_element_type=jnp.float32) * scale + bias
        s = s - jnp.max(s, axis=-1, keepdims=True)
        p = jnp.exp(s)
        p = p * pl.reciprocal(jnp.sum(p, axis=-1, keepdims=True),
                              approx=APPROX_SOFTMAX_RECIP)
        ctx_parts.append(jnp.dot(p.astype(jnp.bfloat16), v[:, sl],
                                 preferred_element_type=jnp.float32))
    ctx = jnp.concatenate(ctx_parts, axis=-1)               # [tq, H*Dh]

    attn = _bf16_dot(ctx, wo_ref[...]) + bo_ref[...]        # wide out-proj
    o_ref[0] = _layernorm(xq + attn, gout_ref[...], bout_ref[...]).astype(
        o_ref.dtype)


def attention_sublayer(x_q, x_kv, kv_mask, p, ln_in, ln_out, *, causal,
                       fuse_input_ln, is_self, num_heads, tq=256):
    B, Lq, D = x_q.shape
    Lk = x_kv.shape[1]
    Dh = D // num_heads
    tq = min(tq, Lq)
    if Lq % tq != 0:
        tq = Lq   # TODO(synk): pad Lq instead for non-divisible long sequences.
    kern = functools.partial(
        _attn_sublayer_kernel, causal=causal, fuse_input_ln=fuse_input_ln,
        is_self=is_self, scale=1.0 / (Dh ** 0.5), num_heads=num_heads)

    # TODO(synk): on v7x mark these grid-invariant weight specs
    # pipeline_mode=pl.Buffered(1) to avoid double-buffering them.
    def full(a):
        return pl.BlockSpec(a.shape, lambda b, i, _nd=a.ndim: (0,) * _nd)

    kv_mask3 = kv_mask.reshape(B, 1, Lk).astype(jnp.float32)
    return pl.pallas_call(
        kern,
        out_shape=jax.ShapeDtypeStruct((B, Lq, D), jnp.float32),
        grid=(B, Lq // tq),
        in_specs=[
            pl.BlockSpec((1, tq, D), lambda b, i: (b, i, 0)),
            pl.BlockSpec((1, Lk, D), lambda b, i: (b, 0, 0)),
            pl.BlockSpec((1, 1, Lk), lambda b, i: (b, 0, 0)),
            full(p["wqkv"]), full(p["bqkv"]), full(p["wo"]), full(p["bo"]),
            full(ln_in[0]), full(ln_in[1]), full(ln_out[0]), full(ln_out[1]),
        ],
        out_specs=pl.BlockSpec((1, tq, D), lambda b, i: (b, i, 0)),
        compiler_params=pltpu.CompilerParams(
            dimension_semantics=("parallel", "parallel"),
            vmem_limit_bytes=_VMEM_LIMIT),
    )(x_q, x_kv, kv_mask3, p["wqkv"], p["bqkv"], p["wo"], p["bo"],
      ln_in[0], ln_in[1], ln_out[0], ln_out[1])


# --------------------------- fused FFN sublayer kernel ------------------------

def _ffn_sublayer_kernel(x_ref, w1_ref, b1_ref, w2_ref, b2_ref,
                         g_ref, be_ref, o_ref):
    x = x_ref[...].astype(jnp.float32)                      # [tm, D]
    h = _bf16_dot(x, w1_ref[...]) + b1_ref[...]             # [tm, F]
    h = jax.nn.gelu(h, approximate=True)
    y = _bf16_dot(h, w2_ref[...]) + b2_ref[...]             # [tm, D]
    o_ref[...] = _layernorm(x + y, g_ref[...], be_ref[...]).astype(o_ref.dtype)


def ffn_sublayer(x2d, w1, b1, w2, b2, g, be, *, tm=256):
    M, D = x2d.shape
    tm = min(tm, _round_up(M, 8))
    Mp = _round_up(M, tm)
    xp = jnp.pad(x2d, ((0, Mp - M), (0, 0))) if Mp != M else x2d

    # TODO(synk): on v7x with very large F, add a K/F grid axis with a VMEM
    # accumulator instead of keeping w1/w2 fully resident (64 MiB VMEM).
    def full(a):
        return pl.BlockSpec(a.shape, lambda i, _nd=a.ndim: (0,) * _nd)

    out = pl.pallas_call(
        _ffn_sublayer_kernel,
        out_shape=jax.ShapeDtypeStruct((Mp, D), jnp.float32),
        grid=(Mp // tm,),
        in_specs=[pl.BlockSpec((tm, D), lambda i: (i, 0)),
                  full(w1), full(b1), full(w2), full(b2), full(g), full(be)],
        out_specs=pl.BlockSpec((tm, D), lambda i: (i, 0)),
        compiler_params=pltpu.CompilerParams(
            dimension_semantics=("parallel",),
            vmem_limit_bytes=_VMEM_LIMIT),
    )(xp, w1, b1, w2, b2, g, be)
    return out[:M]


# --------------------- fused LM head + cross-entropy kernel -------------------
# grid = (row_tiles, vocab_tiles); online logsumexp over the vocab axis,
# target-logit gather via iota == target, optional raw-logit HBM output so
# lm_scores never needs a second LM-head GEMM.

def _lmhead_ce_kernel(h_ref, tgt_ref, w_ref, b_ref, nll_ref, lse_ref, *rest,
                      emit_logits, valid_vocab, vocab_padded):
    if emit_logits:
        logits_ref, m_s, s_s, t_s = rest
    else:
        m_s, s_s, t_s = rest
    j = pl.program_id(1)
    tm = h_ref.shape[0]
    tv = w_ref.shape[1]

    @pl.when(j == 0)
    def _():
        m_s[...] = jnp.full((tm, 1), -jnp.inf, jnp.float32)
        s_s[...] = jnp.zeros((tm, 1), jnp.float32)
        t_s[...] = jnp.zeros((tm, 1), jnp.float32)

    logits = _bf16_dot(h_ref[...], w_ref[...]) + b_ref[...]      # [tm, tv]
    cols = jax.lax.broadcasted_iota(jnp.int32, (tm, tv), 1) + j * tv
    if vocab_padded:
        logits = jnp.where(cols < valid_vocab, logits, NEG_INF)
    if emit_logits:
        logits_ref[...] = logits

    m_new = jnp.maximum(m_s[...], jnp.max(logits, axis=-1, keepdims=True))
    s_s[...] = (s_s[...] * jnp.exp(m_s[...] - m_new)
                + jnp.sum(jnp.exp(logits - m_new), axis=-1, keepdims=True))
    m_s[...] = m_new

    hit = cols == tgt_ref[...]                                   # [tm, tv]
    t_s[...] += jnp.sum(jnp.where(hit, logits, 0.0), axis=-1, keepdims=True)

    @pl.when(j == pl.num_programs(1) - 1)
    def _():
        lse = m_s[...] + jnp.log(s_s[...])
        lse_ref[...] = lse
        nll_ref[...] = lse - t_s[...]


def lmhead_ce(h2d, targets, lm_w, lm_b, *, tm=256, tv=512, emit_logits=False):
    M, D = h2d.shape
    V = lm_w.shape[1]
    tm = min(tm, _round_up(M, 8))
    Mp = _round_up(M, tm)
    if V <= tv:
        tv, Vp = V, V
    else:
        Vp = _round_up(V, tv)
    vocab_padded = Vp != V

    hp = jnp.pad(h2d, ((0, Mp - M), (0, 0))) if Mp != M else h2d
    tgt = targets.reshape(-1).astype(jnp.int32)
    tp = jnp.pad(tgt, (0, Mp - M)) if Mp != M else tgt
    wp = jnp.pad(lm_w, ((0, 0), (0, Vp - V))) if vocab_padded else lm_w
    bp = jnp.pad(lm_b, ((0, 0), (0, Vp - V))) if vocab_padded else lm_b

    kern = functools.partial(_lmhead_ce_kernel, emit_logits=emit_logits,
                             valid_vocab=V, vocab_padded=vocab_padded)
    vec_spec = pl.BlockSpec((tm, 1), lambda i, j: (i, 0))
    out_shape = [jax.ShapeDtypeStruct((Mp, 1), jnp.float32),
                 jax.ShapeDtypeStruct((Mp, 1), jnp.float32)]
    out_specs = [vec_spec, vec_spec]
    if emit_logits:
        out_shape.append(jax.ShapeDtypeStruct((Mp, Vp), jnp.float32))
        out_specs.append(pl.BlockSpec((tm, tv), lambda i, j: (i, j)))

    outs = pl.pallas_call(
        kern,
        out_shape=tuple(out_shape),
        grid=(Mp // tm, Vp // tv),
        in_specs=[pl.BlockSpec((tm, D), lambda i, j: (i, 0)),
                  pl.BlockSpec((tm, 1), lambda i, j: (i, 0)),
                  pl.BlockSpec((D, tv), lambda i, j: (0, j)),
                  pl.BlockSpec((1, tv), lambda i, j: (0, j))],
        out_specs=tuple(out_specs),
        scratch_shapes=[pltpu.VMEM((tm, 1), jnp.float32)] * 3,
        compiler_params=pltpu.CompilerParams(
            dimension_semantics=("parallel", "arbitrary"),
            vmem_limit_bytes=_VMEM_LIMIT),
    )(hp, tp.reshape(Mp, 1), wp, bp)

    nll, lse = outs[0][:M, 0], outs[1][:M]
    if emit_logits:
        return nll, lse, outs[2][:M, :V]
    return nll, lse


# --------------------------------- model glue ---------------------------------

def encoder_forward(p, x, x_mask, H):
    """BERT-like 1-layer encoder; returns x_reps [B, Lx, D]."""
    B, Lx = x.shape
    D = p["word_emb"].shape[1]
    # TODO(synk): fuse the token-embedding row gather into the attention
    # kernel via scalar-prefetched ids for large vocabularies; XLA gather here.
    emb = p["word_emb"][x] + p["pos_emb"][:Lx][None, :, :]
    # Embedding LN is fused into the attention sublayer kernel.
    h1 = attention_sublayer(
        emb, emb, x_mask, p["attn"],
        ln_in=(p["ln_emb_g"], p["ln_emb_b"]),
        ln_out=(p["ln1_g"], p["ln1_b"]),
        causal=False, fuse_input_ln=True, is_self=True, num_heads=H)
    h2 = ffn_sublayer(h1.reshape(B * Lx, D), p["ffn_w1"], p["ffn_b1"],
                      p["ffn_w2"], p["ffn_b2"], p["ln2_g"], p["ln2_b"])
    return h2.reshape(B, Lx, D)


def decoder_forward(p, y, y_mask, x_reps, x_mask, H, is_eval=False,
                    compute_lm_scores=True):
    """Transformer decoder + LM cross-entropy loss (DecoderWithLoss style)."""
    # TODO(synk): `is_eval` greedy-decode branch of DecoderWithLoss not implemented.
    B, Ly = y.shape
    D = p["word_emb"].shape[1]
    V = p["lm_w"].shape[1]

    emb = p["word_emb"][y] + p["pos_emb"][:Ly][None, :, :]

    h1 = attention_sublayer(                       # emb-LN + causal self-attn
        emb, emb, y_mask, p["self_attn"],
        ln_in=(p["ln_emb_g"], p["ln_emb_b"]),
        ln_out=(p["ln1_g"], p["ln1_b"]),
        causal=True, fuse_input_ln=True, is_self=True, num_heads=H)

    h2 = attention_sublayer(                       # cross-attention
        h1, x_reps, x_mask, p["cross_attn"],
        ln_in=(p["ln1_g"], p["ln1_b"]),            # unused (fuse_input_ln=False)
        ln_out=(p["ln2_g"], p["ln2_b"]),
        causal=False, fuse_input_ln=False, is_self=False, num_heads=H)

    h3 = ffn_sublayer(h2.reshape(B * Ly, D), p["ffn_w1"], p["ffn_b1"],
                      p["ffn_w2"], p["ffn_b2"], p["ln3_g"], p["ln3_b"])

    # Shifted LM loss: position t predicts y[t+1]; last position masked out.
    tgt = jnp.concatenate([y[:, 1:], jnp.zeros((B, 1), y.dtype)], axis=1)
    tgt_mask = jnp.concatenate(
        [y_mask[:, 1:], jnp.zeros((B, 1), y_mask.dtype)], axis=1)

    if compute_lm_scores:
        nll, lse, logits = lmhead_ce(h3, tgt.reshape(-1), p["lm_w"], p["lm_b"],
                                     emit_logits=True)
    else:
        nll, lse = lmhead_ce(h3, tgt.reshape(-1), p["lm_w"], p["lm_b"],
                             emit_logits=False)
    w = tgt_mask.reshape(-1)
    loss = jnp.sum(nll * w) / jnp.maximum(jnp.sum(w), 1.0)

    out = {"loss": loss}
    if compute_lm_scores:
        # log_softmax from the logits the CE kernel already wrote (no 2nd GEMM).
        out["lm_scores"] = (logits - lse).reshape(B, Ly, V)
    return out


class EncoderDecoderWithLoss:
    """JAX/Pallas port of the PyTorch EncoderDecoderWithLoss glue module."""

    def __init__(self, encoder_params, decoder_params, num_heads,
                 train_encoder=False):
        self.encoder_params = encoder_params
        self.decoder_params = decoder_params
        self.H = num_heads
        self.train_encoder = train_encoder

    def forward(self, x, x_mask, y, y_mask, x_reps=None, is_eval=False,
                compute_lm_scores=True):
        if x_reps is None:
            x_reps = encoder_forward(self.encoder_params, x, x_mask, self.H)
        if not self.train_encoder:
            x_reps = jax.lax.stop_gradient(x_reps)   # torch .detach()
        return decoder_forward(self.decoder_params, y, y_mask, x_reps, x_mask,
                               self.H, is_eval, compute_lm_scores)


# --------------------------------- param init ---------------------------------

def _dense(key, shape, dtype=jnp.float32, scale=0.02):
    return (scale * jax.random.normal(key, shape, dtype=jnp.float32)).astype(dtype)


def _attn_params(keys, D, H):
    bf = jnp.bfloat16   # MXU weights stored in bf16
    return {"wqkv": _dense(keys[0], (3, D, D), bf),     # stacked Q,K,V [D, H*Dh]
            "bqkv": jnp.zeros((3, 1, D), jnp.float32),
            "wo": _dense(keys[1], (D, D), bf),          # [H*Dh, D]
            "bo": jnp.zeros((1, D), jnp.float32)}


def init_encoder_params(key, V, D, F, Lmax, H):
    ks = jax.random.split(key, 8)
    return {"word_emb": _dense(ks[0], (V, D)),
            "pos_emb": _dense(ks[1], (Lmax, D)),
            "ln_emb_g": jnp.ones((1, D), jnp.float32),
            "ln_emb_b": jnp.zeros((1, D), jnp.float32),
            "attn": _attn_params(ks[2:6], D, H),
            "ln1_g": jnp.ones((1, D), jnp.float32),
            "ln1_b": jnp.zeros((1, D), jnp.float32),
            "ffn_w1": _dense(ks[6], (D, F), jnp.bfloat16),
            "ffn_b1": jnp.zeros((1, F), jnp.float32),
            "ffn_w2": _dense(ks[7], (F, D), jnp.bfloat16),
            "ffn_b2": jnp.zeros((1, D), jnp.float32),
            "ln2_g": jnp.ones((1, D), jnp.float32),
            "ln2_b": jnp.zeros((1, D), jnp.float32)}


def init_decoder_params(key, V, D, F, Lmax, H):
    ks = jax.random.split(key, 13)
    return {"word_emb": _dense(ks[0], (V, D)),
            "pos_emb": _dense(ks[1], (Lmax, D)),
            "ln_emb_g": jnp.ones((1, D), jnp.float32),
            "ln_emb_b": jnp.zeros((1, D), jnp.float32),
            "self_attn": _attn_params(ks[2:6], D, H),
            "ln1_g": jnp.ones((1, D), jnp.float32),
            "ln1_b": jnp.zeros((1, D), jnp.float32),
            "cross_attn": _attn_params(ks[6:10], D, H),
            "ln2_g": jnp.ones((1, D), jnp.float32),
            "ln2_b": jnp.zeros((1, D), jnp.float32),
            "ffn_w1": _dense(ks[10], (D, F), jnp.bfloat16),
            "ffn_b1": jnp.zeros((1, F), jnp.float32),
            "ffn_w2": _dense(ks[11], (F, D), jnp.bfloat16),
            "ffn_b2": jnp.zeros((1, D), jnp.float32),
            "ln3_g": jnp.ones((1, D), jnp.float32),
            "ln3_b": jnp.zeros((1, D), jnp.float32),
            "lm_w": _dense(ks[12], (D, V), jnp.bfloat16),
            "lm_b": jnp.zeros((1, V), jnp.float32)}


# ------------------------------------ main ------------------------------------

if __name__ == "__main__":
    B, Lx, Ly = 2, 8, 8
    D, H, F, V = 32, 4, 64, 64

    key = jax.random.PRNGKey(0)
    k_enc, k_dec, k_x, k_y = jax.random.split(key, 4)

    enc_params = init_encoder_params(k_enc, V, D, F, Lx, H)
    dec_params = init_decoder_params(k_dec, V, D, F, Ly, H)

    x = jax.random.randint(k_x, (B, Lx), 0, V, dtype=jnp.int32)
    y = jax.random.randint(k_y, (B, Ly), 0, V, dtype=jnp.int32)
    # padding masks: last 2 source tokens and last tgt token of batch 1 padded
    x_mask = jnp.ones((B, Lx), jnp.float32).at[1, Lx - 2:].set(0.0)
    y_mask = jnp.ones((B, Ly), jnp.float32).at[1, Ly - 1:].set(0.0)

    model = EncoderDecoderWithLoss(enc_params, dec_params, H,
                                   train_encoder=False)

    outputs = jax.jit(model.forward)(x, x_mask, y, y_mask)
    loss = jax.block_until_ready(outputs["loss"])
    scores = jax.block_until_ready(outputs["lm_scores"])

    assert scores.shape == (B, Ly, V)
    assert bool(jnp.isfinite(loss))
    print("KERNEL_OK")
</pallas_src>

<mosaic_0001>
module attributes {stable_mosaic.version = 11 : i64} {
  func.func @_attn_sublayer_kernel(%arg0: i32, %arg1: i32, %arg2: memref<1x8x32xf32, #tpu.memory_space<vmem>>, %arg3: memref<1x8x32xf32, #tpu.memory_space<vmem>>, %arg4: memref<1x1x8xf32, #tpu.memory_space<vmem>>, %arg5: memref<3x32x32xbf16, #tpu.memory_space<vmem>>, %arg6: memref<3x1x32xf32, #tpu.memory_space<vmem>>, %arg7: memref<32x32xbf16, #tpu.memory_space<vmem>>, %arg8: memref<1x32xf32, #tpu.memory_space<vmem>>, %arg9: memref<1x32xf32, #tpu.memory_space<vmem>>, %arg10: memref<1x32xf32, #tpu.memory_space<vmem>>, %arg11: memref<1x32xf32, #tpu.memory_space<vmem>>, %arg12: memref<1x32xf32, #tpu.memory_space<vmem>>, %arg13: memref<1x8x32xf32, #tpu.memory_space<vmem>>) attributes {dimension_semantics = [#tpu.dimension_semantics<parallel>, #tpu.dimension_semantics<parallel>], iteration_bounds = array<i64: 2, 1>, scalar_prefetch = 0 : i64, scratch_operands = 0 : i64, tpu.core_type = #tpu.core_type<tc>, window_params = [{transform_indices = @transform_0, window_bounds = array<i64: 1, 8, 32>}, {transform_indices = @transform_1, window_bounds = array<i64: 1, 8, 32>}, {transform_indices = @transform_2, window_bounds = array<i64: 1, 1, 8>}, {pipeline_mode = #tpu.pipeline_mode<synchronous>, transform_indices = @transform_3, window_bounds = array<i64: 3, 32, 32>}, {pipeline_mode = #tpu.pipeline_mode<synchronous>, transform_indices = @transform_4, window_bounds = array<i64: 3, 1, 32>}, {pipeline_mode = #tpu.pipeline_mode<synchronous>, transform_indices = @transform_5, window_bounds = array<i64: 32, 32>}, {pipeline_mode = #tpu.pipeline_mode<synchronous>, transform_indices = @transform_6, window_bounds = array<i64: 1, 32>}, {pipeline_mode = #tpu.pipeline_mode<synchronous>, transform_indices = @transform_7, window_bounds = array<i64: 1, 32>}, {pipeline_mode = #tpu.pipeline_mode<synchronous>, transform_indices = @transform_8, window_bounds = array<i64: 1, 32>}, {pipeline_mode = #tpu.pipeline_mode<synchronous>, transform_indices = @transform_9, window_bounds = array<i64: 1, 32>}, {pipeline_mode = #tpu.pipeline_mode<synchronous>, transform_indices = @transform_10, window_bounds = array<i64: 1, 32>}, {transform_indices = @transform_11, window_bounds = array<i64: 1, 8, 32>}]} {
    %c0 = arith.constant 0 : index
    %c0_0 = arith.constant 0 : index
    %c0_1 = arith.constant 0 : index
    %0 = vector.load %arg2[%c0, %c0_0, %c0_1] : memref<1x8x32xf32, #tpu.memory_space<vmem>>, vector<1x8x32xf32>
    %1 = vector.shape_cast %0 : vector<1x8x32xf32> to vector<8x32xf32>
    %c0_2 = arith.constant 0 : index
    %c0_3 = arith.constant 0 : index
    %2 = vector.load %arg9[%c0_2, %c0_3] : memref<1x32xf32, #tpu.memory_space<vmem>>, vector<1x32xf32>
    %c0_4 = arith.constant 0 : index
    %c0_5 = arith.constant 0 : index
    %3 = vector.load %arg10[%c0_4, %c0_5] : memref<1x32xf32, #tpu.memory_space<vmem>>, vector<1x32xf32>
    %cst = arith.constant dense<0.000000e+00> : vector<8xf32>
    %4 = vector.multi_reduction <add>, %1, %cst [1] : vector<8x32xf32> to vector<8xf32>
    %5 = vector.shape_cast %4 : vector<8xf32> to vector<8x1xf32>
    %cst_6 = arith.constant 3.200000e+01 : f32
    %6 = vector.broadcast %cst_6 : f32 to vector<8x1xf32>
    %7 = arith.divf %5, %6 : vector<8x1xf32>
    %8 = vector.broadcast %7 : vector<8x1xf32> to vector<8x32xf32>
    %9 = arith.subf %1, %8 : vector<8x32xf32>
    %10 = arith.mulf %9, %9 : vector<8x32xf32>
    %cst_7 = arith.constant dense<0.000000e+00> : vector<8xf32>
    %11 = vector.multi_reduction <add>, %10, %cst_7 [1] : vector<8x32xf32> to vector<8xf32>
    %12 = vector.shape_cast %11 : vector<8xf32> to vector<8x1xf32>
    %cst_8 = arith.constant 3.200000e+01 : f32
    %13 = vector.broadcast %cst_8 : f32 to vector<8x1xf32>
    %14 = arith.divf %12, %13 : vector<8x1xf32>
    %15 = vector.broadcast %7 : vector<8x1xf32> to vector<8x32xf32>
    %16 = arith.subf %1, %15 : vector<8x32xf32>
    %cst_9 = arith.constant 9.99999996E-13 : f32
    %17 = vector.broadcast %cst_9 : f32 to vector<8x1xf32>
    %18 = arith.addf %14, %17 : vector<8x1xf32>
    %19 = math.rsqrt %18 : vector<8x1xf32>
    %20 = vector.broadcast %19 : vector<8x1xf32> to vector<8x32xf32>
    %21 = arith.mulf %16, %20 : vector<8x32xf32>
    %22 = vector.broadcast %2 : vector<1x32xf32> to vector<8x32xf32>
    %23 = arith.mulf %21, %22 : vector<8x32xf32>
    %24 = vector.broadcast %3 : vector<1x32xf32> to vector<8x32xf32>
    %25 = arith.addf %23, %24 : vector<8x32xf32>
    %c0_10 = arith.constant 0 : index
    %c0_11 = arith.constant 0 : index
    %c0_12 = arith.constant 0 : index
    %26 = vector.load %arg3[%c0_10, %c0_11, %c0_12] : memref<1x8x32xf32, #tpu.memory_space<vmem>>, vector<1x8x32xf32>
    %27 = vector.shape_cast %26 : vector<1x8x32xf32> to vector<8x32xf32>
    %c0_13 = arith.constant 0 : index
    %c0_14 = arith.constant 0 : index
    %28 = vector.load %arg9[%c0_13, %c0_14] : memref<1x32xf32, #tpu.memory_space<vmem>>, vector<1x32xf32>
    %c0_15 = arith.constant 0 : index
    %c0_16 = arith.constant 0 : index
    %29 = vector.load %arg10[%c0_15, %c0_16] : memref<1x32xf32, #tpu.memory_space<vmem>>, vector<1x32xf32>
    %cst_17 = arith.constant dense<0.000000e+00> : vector<8xf32>
    %30 = vector.multi_reduction <add>, %27, %cst_17 [1] : vector<8x32xf32> to vector<8xf32>
    %31 = vector.shape_cast %30 : vector<8xf32> to vector<8x1xf32>
    %cst_18 = arith.constant 3.200000e+01 : f32
    %32 = vector.broadcast %cst_18 : f32 to vector<8x1xf32>
    %33 = arith.divf %31, %32 : vector<8x1xf32>
    %34 = vector.broadcast %33 : vector<8x1xf32> to vector<8x32xf32>
    %35 = arith.subf %27, %34 : vector<8x32xf32>
    %36 = arith.mulf %35, %35 : vector<8x32xf32>
    %cst_19 = arith.constant dense<0.000000e+00> : vector<8xf32>
    %37 = vector.multi_reduction <add>, %36, %cst_19 [1] : vector<8x32xf32> to vector<8xf32>
    %38 = vector.shape_cast %37 : vector<8xf32> to vector<8x1xf32>
    %cst_20 = arith.constant 3.200000e+01 : f32
    %39 = vector.broadcast %cst_20 : f32 to vector<8x1xf32>
    %40 = arith.divf %38, %39 : vector<8x1xf32>
    %41 = vector.broadcast %33 : vector<8x1xf32> to vector<8x32xf32>
    %42 = arith.subf %27, %41 : vector<8x32xf32>
    %cst_21 = arith.constant 9.99999996E-13 : f32
    %43 = vector.broadcast %cst_21 : f32 to vector<8x1xf32>
    %44 = arith.addf %40, %43 : vector<8x1xf32>
    %45 = math.rsqrt %44 : vector<8x1xf32>
    %46 = vector.broadcast %45 : vector<8x1xf32> to vector<8x32xf32>
    %47 = arith.mulf %42, %46 : vector<8x32xf32>
    %48 = vector.broadcast %28 : vector<1x32xf32> to vector<8x32xf32>
    %49 = arith.mulf %47, %48 : vector<8x32xf32>
    %50 = vector.broadcast %29 : vector<1x32xf32> to vector<8x32xf32>
    %51 = arith.addf %49, %50 : vector<8x32xf32>
    %52 = arith.truncf %25 : vector<8x32xf32> to vector<8x32xbf16>
    %53 = arith.truncf %51 : vector<8x32xf32> to vector<8x32xbf16>
    %c0_22 = arith.constant 0 : index
    %c0_23 = arith.constant 0 : index
    %c0_24 = arith.constant 0 : index
    %54 = vector.load %arg5[%c0_22, %c0_23, %c0_24] : memref<3x32x32xbf16, #tpu.memory_space<vmem>>, vector<1x32x32xbf16>
    %55 = vector.shape_cast %54 : vector<1x32x32xbf16> to vector<32x32xbf16>
    %cst_25 = arith.constant dense<0.000000e+00> : vector<8x32xf32>
    %56 = tpu.matmul %52, %55, %cst_25 {dimension_numbers = #tpu.dot_dimension_numbers<[1], [0], [0], [1], [0, 0, 1, 1], [], []>} : vector<8x32xbf16>, vector<32x32xbf16>, vector<8x32xf32> -> vector<8x32xf32>
    %c0_26 = arith.constant 0 : index
    %c0_27 = arith.constant 0 : index
    %c0_28 = arith.constant 0 : index
    %57 = vector.load %arg6[%c0_26, %c0_27, %c0_28] : memref<3x1x32xf32, #tpu.memory_space<vmem>>, vector<1x1x32xf32>
    %58 = vector.shape_cast %57 : vector<1x1x32xf32> to vector<1x32xf32>
    %59 = vector.broadcast %58 : vector<1x32xf32> to vector<8x32xf32>
    %60 = arith.addf %56, %59 : vector<8x32xf32>
    %61 = arith.truncf %60 : vector<8x32xf32> to vector<8x32xbf16>
    %c1 = arith.constant 1 : index
    %c0_29 = arith.constant 0 : index
    %c0_30 = arith.constant 0 : index
    %62 = vector.load %arg5[%c1, %c0_29, %c0_30] : memref<3x32x32xbf16, #tpu.memory_space<vmem>>, vector<1x32x32xbf16>
    %63 = vector.shape_cast %62 : vector<1x32x32xbf16> to vector<32x32xbf16>
    %cst_31 = arith.constant dense<0.000000e+00> : vector<8x32xf32>
    %64 = tpu.matmul %53, %63, %cst_31 {dimension_numbers = #tpu.dot_dimension_numbers<[1], [0], [0], [1], [0, 0, 1, 1], [], []>} : vector<8x32xbf16>, vector<32x32xbf16>, vector<8x32xf32> -> vector<8x32xf32>
    %c1_32 = arith.constant 1 : index
    %c0_33 = arith.constant 0 : index
    %c0_34 = arith.constant 0 : index
    %65 = vector.load %arg6[%c1_32, %c0_33, %c0_34] : memref<3x1x32xf32, #tpu.memory_space<vmem>>, vector<1x1x32xf32>
    %66 = vector.shape_cast %65 : vector<1x1x32xf32> to vector<1x32xf32>
    %67 = vector.broadcast %66 : vector<1x32xf32> to vector<8x32xf32>
    %68 = arith.addf %64, %67 : vector<8x32xf32>
    %69 = arith.truncf %68 : vector<8x32xf32> to vector<8x32xbf16>
    %c2 = arith.constant 2 : index
    %c0_35 = arith.constant 0 : index
    %c0_36 = arith.constant 0 : index
    %70 = vector.load %arg5[%c2, %c0_35, %c0_36] : memref<3x32x32xbf16, #tpu.memory_space<vmem>>, vector<1x32x32xbf16>
    %71 = vector.shape_cast %70 : vector<1x32x32xbf16> to vector<32x32xbf16>
    %cst_37 = arith.constant dense<0.000000e+00> : vector<8x32xf32>
    %72 = tpu.matmul %53, %71, %cst_37 {dimension_numbers = #tpu.dot_dimension_numbers<[1], [0], [0], [1], [0, 0, 1, 1], [], []>} : vector<8x32xbf16>, vector<32x32xbf16>, vector<8x32xf32> -> vector<8x32xf32>
    %c2_38 = arith.constant 2 : index
    %c0_39 = arith.constant 0 : index
    %c0_40 = arith.constant 0 : index
    %73 = vector.load %arg6[%c2_38, %c0_39, %c0_40] : memref<3x1x32xf32, #tpu.memory_space<vmem>>, vector<1x1x32xf32>
    %74 = vector.shape_cast %73 : vector<1x1x32xf32> to vector<1x32xf32>
    %75 = vector.broadcast %74 : vector<1x32xf32> to vector<8x32xf32>
    %76 = arith.addf %72, %75 : vector<8x32xf32>
    %77 = arith.truncf %76 : vector<8x32xf32> to vector<8x32xbf16>
    %c0_41 = arith.constant 0 : index
    %c0_42 = arith.constant 0 : index
    %c0_43 = arith.constant 0 : index
    %78 = vector.load %arg4[%c0_41, %c0_42, %c0_43] : memref<1x1x8xf32, #tpu.memory_space<vmem>>, vector<1x1x8xf32>
    %79 = vector.shape_cast %78 : vector<1x1x8xf32> to vector<1x8xf32>
    %cst_44 = arith.constant 1.000000e+00 : f32
    %80 = vector.broadcast %cst_44 : f32 to vector<1x8xf32>
    %81 = arith.subf %79, %80 : vector<1x8xf32>
    %cst_45 = arith.constant 1.000000e+09 : f32
    %82 = vector.broadcast %cst_45 : f32 to vector<1x8xf32>
    %83 = arith.mulf %81, %82 : vector<1x8xf32>
    %84 = vector.shape_cast %83 : vector<1x8xf32> to vector<1x8xf32>
    %85 = vector.broadcast %84 : vector<1x8xf32> to vector<8x8xf32>
    %86 = vector.extract_strided_slice %61 {offsets = [0, 0], sizes = [8, 8], strides = [1, 1]} : vector<8x32xbf16> to vector<8x8xbf16>
    %87 = vector.extract_strided_slice %69 {offsets = [0, 0], sizes = [8, 8], strides = [1, 1]} : vector<8x32xbf16> to vector<8x8xbf16>
    %cst_46 = arith.constant dense<0.000000e+00> : vector<8x8xf32>
    %88 = tpu.matmul %86, %87, %cst_46 {dimension_numbers = #tpu.dot_dimension_numbers<[1], [1], [0], [0], [0, 0, 1, 0], [], []>} : vector<8x8xbf16>, vector<8x8xbf16>, vector<8x8xf32> -> vector<8x8xf32>
    %cst_47 = arith.constant 0.353553385 : f32
    %89 = vector.broadcast %cst_47 : f32 to vector<8x8xf32>
    %90 = arith.mulf %88, %89 : vector<8x8xf32>
    %91 = arith.addf %90, %85 : vector<8x8xf32>
    %cst_48 = arith.constant dense<0xFF800000> : vector<8xf32>
    %92 = vector.multi_reduction <maximumf>, %91, %cst_48 [1] : vector<8x8xf32> to vector<8xf32>
    %93 = vector.shape_cast %92 : vector<8xf32> to vector<8x1xf32>
    %94 = vector.broadcast %93 : vector<8x1xf32> to vector<8x8xf32>
    %95 = arith.subf %91, %94 : vector<8x8xf32>
    %96 = math.exp %95 : vector<8x8xf32>
    %cst_49 = arith.constant dense<0.000000e+00> : vector<8xf32>
    %97 = vector.multi_reduction <add>, %96, %cst_49 [1] : vector<8x8xf32> to vector<8xf32>
    %98 = vector.shape_cast %97 : vector<8xf32> to vector<8x1xf32>
    %99 = tpu.reciprocal %98 {approx = true} : vector<8x1xf32> -> vector<8x1xf32>
    %100 = vector.broadcast %99 : vector<8x1xf32> to vector<8x8xf32>
    %101 = arith.mulf %96, %100 : vector<8x8xf32>
    %102 = arith.truncf %101 : vector<8x8xf32> to vector<8x8xbf16>
    %103 = vector.extract_strided_slice %77 {offsets = [0, 0], sizes = [8, 8], strides = [1, 1]} : vector<8x32xbf16> to vector<8x8xbf16>
    %cst_50 = arith.constant dense<0.000000e+00> : vector<8x8xf32>
    %104 = tpu.matmul %102, %103, %cst_50 {dimension_numbers = #tpu.dot_dimension_numbers<[1], [0], [0], [1], [0, 0, 1, 1], [], []>} : vector<8x8xbf16>, vector<8x8xbf16>, vector<8x8xf32> -> vector<8x8xf32>
    %105 = vector.extract_strided_slice %61 {offsets = [0, 8], sizes = [8, 8], strides = [1, 1]} : vector<8x32xbf16> to vector<8x8xbf16>
    %106 = vector.extract_strided_slice %69 {offsets = [0, 8], sizes = [8, 8], strides = [1, 1]} : vector<8x32xbf16> to vector<8x8xbf16>
    %cst_51 = arith.constant dense<0.000000e+00> : vector<8x8xf32>
    %107 = tpu.matmul %105, %106, %cst_51 {dimension_numbers = #tpu.dot_dimension_numbers<[1], [1], [0], [0], [0, 0, 1, 0], [], []>} : vector<8x8xbf16>, vector<8x8xbf16>, vector<8x8xf32> -> vector<8x8xf32>
    %cst_52 = arith.constant 0.353553385 : f32
    %108 = vector.broadcast %cst_52 : f32 to vector<8x8xf32>
    %109 = arith.mulf %107, %108 : vector<8x8xf32>
    %110 = arith.addf %109, %85 : vector<8x8xf32>
    %cst_53 = arith.constant dense<0xFF800000> : vector<8xf32>
    %111 = vector.multi_reduction <maximumf>, %110, %cst_53 [1] : vector<8x8xf32> to vector<8xf32>
    %112 = vector.shape_cast %111 : vector<8xf32> to vector<8x1xf32>
    %113 = vector.broadcast %112 : vector<8x1xf32> to vector<8x8xf32>
    %114 = arith.subf %110, %113 : vector<8x8xf32>
    %115 = math.exp %114 : vector<8x8xf32>
    %cst_54 = arith.constant dense<0.000000e+00> : vector<8xf32>
    %116 = vector.multi_reduction <add>, %115, %cst_54 [1] : vector<8x8xf32> to vector<8xf32>
    %117 = vector.shape_cast %116 : vector<8xf32> to vector<8x1xf32>
    %118 = tpu.reciprocal %117 {approx = true} : vector<8x1xf32> -> vector<8x1xf32>
    %119 = vector.broadcast %118 : vector<8x1xf32> to vector<8x8xf32>
    %120 = arith.mulf %115, %119 : vector<8x8xf32>
    %121 = arith.truncf %120 : vector<8x8xf32> to vector<8x8xbf16>
    %122 = vector.extract_strided_slice %77 {offsets = [0, 8], sizes = [8, 8], strides = [1, 1]} : vector<8x32xbf16> to vector<8x8xbf16>
    %cst_55 = arith.constant dense<0.000000e+00> : vector<8x8xf32>
    %123 = tpu.matmul %121, %122, %cst_55 {dimension_numbers = #tpu.dot_dimension_numbers<[1], [0], [0], [1], [0, 0, 1, 1], [], []>} : vector<8x8xbf16>, vector<8x8xbf16>, vector<8x8xf32> -> vector<8x8xf32>
    %124 = vector.extract_strided_slice %61 {offsets = [0, 16], sizes = [8, 8], strides = [1, 1]} : vector<8x32xbf16> to vector<8x8xbf16>
    %125 = vector.extract_strided_slice %69 {offsets = [0, 16], sizes = [8, 8], strides = [1, 1]} : vector<8x32xbf16> to vector<8x8xbf16>
    %cst_56 = arith.constant dense<0.000000e+00> : vector<8x8xf32>
    %126 = tpu.matmul %124, %125, %cst_56 {dimension_numbers = #tpu.dot_dimension_numbers<[1], [1], [0], [0], [0, 0, 1, 0], [], []>} : vector<8x8xbf16>, vector<8x8xbf16>, vector<8x8xf32> -> vector<8x8xf32>
    %cst_57 = arith.constant 0.353553385 : f32
    %127 = vector.broadcast %cst_57 : f32 to vector<8x8xf32>
    %128 = arith.mulf %126, %127 : vector<8x8xf32>
    %129 = arith.addf %128, %85 : vector<8x8xf32>
    %cst_58 = arith.constant dense<0xFF800000> : vector<8xf32>
    %130 = vector.multi_reduction <maximumf>, %129, %cst_58 [1] : vector<8x8xf32> to vector<8xf32>
    %131 = vector.shape_cast %130 : vector<8xf32> to vector<8x1xf32>
    %132 = vector.broadcast %131 : vector<8x1xf32> to vector<8x8xf32>
    %133 = arith.subf %129, %132 : vector<8x8xf32>
    %134 = math.exp %133 : vector<8x8xf32>
    %cst_59 = arith.constant dense<0.000000e+00> : vector<8xf32>
    %135 = vector.multi_reduction <add>, %134, %cst_59 [1] : vector<8x8xf32> to vector<8xf32>
    %136 = vector.shape_cast %135 : vector<8xf32> to vector<8x1xf32>
    %137 = tpu.reciprocal %136 {approx = true} : vector<8x1xf32> -> vector<8x1xf32>
    %138 = vector.broadcast %137 : vector<8x1xf32> to vector<8x8xf32>
    %139 = arith.mulf %134, %138 : vector<8x8xf32>
    %140 = arith.truncf %139 : vector<8x8xf32> to vector<8x8xbf16>
    %141 = vector.extract_strided_slice %77 {offsets = [0, 16], sizes = [8, 8], strides = [1, 1]} : vector<8x32xbf16> to vector<8x8xbf16>
    %cst_60 = arith.constant dense<0.000000e+00> : vector<8x8xf32>
    %142 = tpu.matmul %140, %141, %cst_60 {dimension_numbers = #tpu.dot_dimension_numbers<[1], [0], [0], [1], [0, 0, 1, 1], [], []>} : vector<8x8xbf16>, vector<8x8xbf16>, vector<8x8xf32> -> vector<8x8xf32>
    %143 = vector.extract_strided_slice %61 {offsets = [0, 24], sizes = [8, 8], strides = [1, 1]} : vector<8x32xbf16> to vector<8x8xbf16>
    %144 = vector.extract_strided_slice %69 {offsets = [0, 24], sizes = [8, 8], strides = [1, 1]} : vector<8x32xbf16> to vector<8x8xbf16>
    %cst_61 = arith.constant dense<0.000000e+00> : vector<8x8xf32>
    %145 = tpu.matmul %143, %144, %cst_61 {dimension_numbers = #tpu.dot_dimension_numbers<[1], [1], [0], [0], [0, 0, 1, 0], [], []>} : vector<8x8xbf16>, vector<8x8xbf16>, vector<8x8xf32> -> vector<8x8xf32>
    %cst_62 = arith.constant 0.353553385 : f32
    %146 = vector.broadcast %cst_62 : f32 to vector<8x8xf32>
    %147 = arith.mulf %145, %146 : vector<8x8xf32>
    %148 = arith.addf %147, %85 : vector<8x8xf32>
    %cst_63 = arith.constant dense<0xFF800000> : vector<8xf32>
    %149 = vector.multi_reduction <maximumf>, %148, %cst_63 [1] : vector<8x8xf32> to vector<8xf32>
    %150 = vector.shape_cast %149 : vector<8xf32> to vector<8x1xf32>
    %151 = vector.broadcast %150 : vector<8x1xf32> to vector<8x8xf32>
    %152 = arith.subf %148, %151 : vector<8x8xf32>
    %153 = math.exp %152 : vector<8x8xf32>
    %cst_64 = arith.constant dense<0.000000e+00> : vector<8xf32>
    %154 = vector.multi_reduction <add>, %153, %cst_64 [1] : vector<8x8xf32> to vector<8xf32>
    %155 = vector.shape_cast %154 : vector<8xf32> to vector<8x1xf32>
    %156 = tpu.reciprocal %155 {approx = true} : vector<8x1xf32> -> vector<8x1xf32>
    %157 = vector.broadcast %156 : vector<8x1xf32> to vector<8x8xf32>
    %158 = arith.mulf %153, %157 : vector<8x8xf32>
    %159 = arith.truncf %158 : vector<8x8xf32> to vector<8x8xbf16>
    %160 = vector.extract_strided_slice %77 {offsets = [0, 24], sizes = [8, 8], strides = [1, 1]} : vector<8x32xbf16> to vector<8x8xbf16>
    %cst_65 = arith.constant dense<0.000000e+00> : vector<8x8xf32>
    %161 = tpu.matmul %159, %160, %cst_65 {dimension_numbers = #tpu.dot_dimension_numbers<[1], [0], [0], [1], [0, 0, 1, 1], [], []>} : vector<8x8xbf16>, vector<8x8xbf16>, vector<8x8xf32> -> vector<8x8xf32>
    %162 = tpu.concatenate %104, %123, %142, %161 in 1 : vector<8x8xf32>, vector<8x8xf32>, vector<8x8xf32>, vector<8x8xf32> -> vector<8x32xf32>
    %c0_66 = arith.constant 0 : index
    %c0_67 = arith.constant 0 : index
    %163 = vector.load %arg7[%c0_66, %c0_67] : memref<32x32xbf16, #tpu.memory_space<vmem>>, vector<32x32xbf16>
    %164 = arith.truncf %162 : vector<8x32xf32> to vector<8x32xbf16>
    %cst_68 = arith.constant dense<0.000000e+00> : vector<8x32xf32>
    %165 = tpu.matmul %164, %163, %cst_68 {dimension_numbers = #tpu.dot_dimension_numbers<[1], [0], [0], [1], [0, 0, 1, 1], [], []>} : vector<8x32xbf16>, vector<32x32xbf16>, vector<8x32xf32> -> vector<8x32xf32>
    %c0_69 = arith.constant 0 : index
    %c0_70 = arith.constant 0 : index
    %166 = vector.load %arg8[%c0_69, %c0_70] : memref<1x32xf32, #tpu.memory_space<vmem>>, vector<1x32xf32>
    %167 = vector.broadcast %166 : vector<1x32xf32> to vector<8x32xf32>
    %168 = arith.addf %165, %167 : vector<8x32xf32>
    %169 = arith.addf %25, %168 : vector<8x32xf32>
    %c0_71 = arith.constant 0 : index
    %c0_72 = arith.constant 0 : index
    %170 = vector.load %arg11[%c0_71, %c0_72] : memref<1x32xf32, #tpu.memory_space<vmem>>, vector<1x32xf32>
    %c0_73 = arith.constant 0 : index
    %c0_74 = arith.constant 0 : index
    %171 = vector.load %arg12[%c0_73, %c0_74] : memref<1x32xf32, #tpu.memory_space<vmem>>, vector<1x32xf32>
    %cst_75 = arith.constant dense<0.000000e+00> : vector<8xf32>
    %172 = vector.multi_reduction <add>, %169, %cst_75 [1] : vector<8x32xf32> to vector<8xf32>
    %173 = vector.shape_cast %172 : vector<8xf32> to vector<8x1xf32>
    %cst_76 = arith.constant 3.200000e+01 : f32
    %174 = vector.broadcast %cst_76 : f32 to vector<8x1xf32>
    %175 = arith.divf %173, %174 : vector<8x1xf32>
    %176 = vector.broadcast %175 : vector<8x1xf32> to vector<8x32xf32>
    %177 = arith.subf %169, %176 : vector<8x32xf32>
    %178 = arith.mulf %177, %177 : vector<8x32xf32>
    %cst_77 = arith.constant dense<0.000000e+00> : vector<8xf32>
    %179 = vector.multi_reduction <add>, %178, %cst_77 [1] : vector<8x32xf32> to vector<8xf32>
    %180 = vector.shape_cast %179 : vector<8xf32> to vector<8x1xf32>
    %cst_78 = arith.constant 3.200000e+01 : f32
    %181 = vector.broadcast %cst_78 : f32 to vector<8x1xf32>
    %182 = arith.divf %180, %181 : vector<8x1xf32>
    %183 = vector.broadcast %175 : vector<8x1xf32> to vector<8x32xf32>
    %184 = arith.subf %169, %183 : vector<8x32xf32>
    %cst_79 = arith.constant 9.99999996E-13 : f32
    %185 = vector.broadcast %cst_79 : f32 to vector<8x1xf32>
    %186 = arith.addf %182, %185 : vector<8x1xf32>
    %187 = math.rsqrt %186 : vector<8x1xf32>
    %188 = vector.broadcast %187 : vector<8x1xf32> to vector<8x32xf32>
    %189 = arith.mulf %184, %188 : vector<8x32xf32>
    %190 = vector.broadcast %170 : vector<1x32xf32> to vector<8x32xf32>
    %191 = arith.mulf %189, %190 : vector<8x32xf32>
    %192 = vector.broadcast %171 : vector<1x32xf32> to vector<8x32xf32>
    %193 = arith.addf %191, %192 : vector<8x32xf32>
    %c0_80 = arith.constant 0 : index
    %c0_81 = arith.constant 0 : index
    %c0_82 = arith.constant 0 : index
    %194 = vector.load %arg13[%c0_80, %c0_81, %c0_82] : memref<1x8x32xf32, #tpu.memory_space<vmem>>, vector<1x8x32xf32>
    %195 = vector.shape_cast %194 : vector<1x8x32xf32> to vector<8x32xf32>
    %196 = vector.shape_cast %193 : vector<8x32xf32> to vector<1x8x32xf32>
    tpu.vector_store %arg13[%c0_80, %c0_81, %c0_82], %196 {strides = array<i32>} : memref<1x8x32xf32, #tpu.memory_space<vmem>>, vector<1x8x32xf32>,
    return
  }
  func.func @transform_0(%arg0: i32, %arg1: i32) -> (i32, i32, i32) {
    %c0_i32 = arith.constant 0 : i32
    %c0_i32_0 = arith.constant 0 : i32
    return %arg0, %arg1, %c0_i32 : i32, i32, i32
  }
  func.func @transform_1(%arg0: i32, %arg1: i32) -> (i32, i32, i32) {
    %c0_i32 = arith.constant 0 : i32
    %c0_i32_0 = arith.constant 0 : i32
    %c0_i32_1 = arith.constant 0 : i32
    return %arg0, %c0_i32, %c0_i32_0 : i32, i32, i32
  }
  func.func @transform_2(%arg0: i32, %arg1: i32) -> (i32, i32, i32) {
    %c0_i32 = arith.constant 0 : i32
    %c0_i32_0 = arith.constant 0 : i32
    %c0_i32_1 = arith.constant 0 : i32
    return %arg0, %c0_i32, %c0_i32_0 : i32, i32, i32
  }
  func.func @transform_3(%arg0: i32, %arg1: i32) -> (i32, i32, i32) {
    %c0_i32 = arith.constant 0 : i32
    %c0_i32_0 = arith.constant 0 : i32
    %c0_i32_1 = arith.constant 0 : i32
    %c0_i32_2 = arith.constant 0 : i32
    return %c0_i32, %c0_i32_0, %c0_i32_1 : i32, i32, i32
  }
  func.func @transform_4(%arg0: i32, %arg1: i32) -> (i32, i32, i32) {
    %c0_i32 = arith.constant 0 : i32
    %c0_i32_0 = arith.constant 0 : i32
    %c0_i32_1 = arith.constant 0 : i32
    %c0_i32_2 = arith.constant 0 : i32
    return %c0_i32, %c0_i32_0, %c0_i32_1 : i32, i32, i32
  }
  func.func @transform_5(%arg0: i32, %arg1: i32) -> (i32, i32) {
    %c0_i32 = arith.constant 0 : i32
    %c0_i32_0 = arith.constant 0 : i32
    %c0_i32_1 = arith.constant 0 : i32
    return %c0_i32, %c0_i32_0 : i32, i32
  }
  func.func @transform_6(%arg0: i32, %arg1: i32) -> (i32, i32) {
    %c0_i32 = arith.constant 0 : i32
    %c0_i32_0 = arith.constant 0 : i32
    %c0_i32_1 = arith.constant 0 : i32
    return %c0_i32, %c0_i32_0 : i32, i32
  }
  func.func @transform_7(%arg0: i32, %arg1: i32) -> (i32, i32) {
    %c0_i32 = arith.constant 0 : i32
    %c0_i32_0 = arith.constant 0 : i32
    %c0_i32_1 = arith.constant 0 : i32
    return %c0_i32, %c0_i32_0 : i32, i32
  }
  func.func @transform_8(%arg0: i32, %arg1: i32) -> (i32, i32) {
    %c0_i32 = arith.constant 0 : i32
    %c0_i32_0 = arith.constant 0 : i32
    %c0_i32_1 = arith.constant 0 : i32
    return %c0_i32, %c0_i32_0 : i32, i32
  }
  func.func @transform_9(%arg0: i32, %arg1: i32) -> (i32, i32) {
    %c0_i32 = arith.constant 0 : i32
    %c0_i32_0 = arith.constant 0 : i32
    %c0_i32_1 = arith.constant 0 : i32
    return %c0_i32, %c0_i32_0 : i32, i32
  }
  func.func @transform_10(%arg0: i32, %arg1: i32) -> (i32, i32) {
    %c0_i32 = arith.constant 0 : i32
    %c0_i32_0 = arith.constant 0 : i32
    %c0_i32_1 = arith.constant 0 : i32
    return %c0_i32, %c0_i32_0 : i32, i32
  }
  func.func @transform_11(%arg0: i32, %arg1: i32) -> (i32, i32, i32) {
    %c0_i32 = arith.constant 0 : i32
    %c0_i32_0 = arith.constant 0 : i32
    return %arg0, %arg1, %c0_i32 : i32, i32, i32
  }
}

module attributes {stable_mosaic.version = 11 : i64} {
  func.func @_ffn_sublayer_kernel(%arg0: i32, %arg1: memref<16x32xf32, #tpu.memory_space<vmem>>, %arg2: memref<32x64xbf16, #tpu.memory_space<vmem>>, %arg3: memref<1x64xf32, #tpu.memory_space<vmem>>, %arg4: memref<64x32xbf16, #tpu.memory_space<vmem>>, %arg5: memref<1x32xf32, #tpu.memory_space<vmem>>, %arg6: memref<1x32xf32, #tpu.memory_space<vmem>>, %arg7: memref<1x32xf32, #tpu.memory_space<vmem>>, %arg8: memref<16x32xf32, #tpu.memory_space<vmem>>) attributes {dimension_semantics = [#tpu.dimension_semantics<parallel>], iteration_bounds = array<i64: 1>, scalar_prefetch = 0 : i64, scratch_operands = 0 : i64, tpu.core_type = #tpu.core_type<tc>, window_params = [{transform_indices = @transform_0, window_bounds = array<i64: 16, 32>}, {pipeline_mode = #tpu.pipeline_mode<synchronous>, transform_indices = @transform_1, window_bounds = array<i64: 32, 64>}, {pipeline_mode = #tpu.pipeline_mode<synchronous>, transform_indices = @transform_2, window_bounds = array<i64: 1, 64>}, {pipeline_mode = #tpu.pipeline_mode<synchronous>, transform_indices = @transform_3, window_bounds = array<i64: 64, 32>}, {pipeline_mode = #tpu.pipeline_mode<synchronous>, transform_indices = @transform_4, window_bounds = array<i64: 1, 32>}, {pipeline_mode = #tpu.pipeline_mode<synchronous>, transform_indices = @transform_5, window_bounds = array<i64: 1, 32>}, {pipeline_mode = #tpu.pipeline_mode<synchronous>, transform_indices = @transform_6, window_bounds = array<i64: 1, 32>}, {transform_indices = @transform_7, window_bounds = array<i64: 16, 32>}]} {
    %c0 = arith.constant 0 : index
    %c0_0 = arith.constant 0 : index
    %0 = vector.load %arg1[%c0, %c0_0] : memref<16x32xf32, #tpu.memory_space<vmem>>, vector<16x32xf32>
    %c0_1 = arith.constant 0 : index
    %c0_2 = arith.constant 0 : index
    %1 = vector.load %arg2[%c0_1, %c0_2] : memref<32x64xbf16, #tpu.memory_space<vmem>>, vector<32x64xbf16>
    %2 = arith.truncf %0 : vector<16x32xf32> to vector<16x32xbf16>
    %cst = arith.constant dense<0.000000e+00> : vector<16x64xf32>
    %3 = tpu.matmul %2, %1, %cst {dimension_numbers = #tpu.dot_dimension_numbers<[1], [0], [0], [1], [0, 0, 1, 1], [], []>} : vector<16x32xbf16>, vector<32x64xbf16>, vector<16x64xf32> -> vector<16x64xf32>
    %c0_3 = arith.constant 0 : index
    %c0_4 = arith.constant 0 : index
    %4 = vector.load %arg3[%c0_3, %c0_4] : memref<1x64xf32, #tpu.memory_space<vmem>>, vector<1x64xf32>
    %5 = vector.broadcast %4 : vector<1x64xf32> to vector<16x64xf32>
    %6 = arith.addf %3, %5 : vector<16x64xf32>
    %7 = arith.mulf %6, %6 : vector<16x64xf32>
    %8 = arith.mulf %6, %7 : vector<16x64xf32>
    %cst_5 = arith.constant 4.471500e-02 : f32
    %9 = vector.broadcast %cst_5 : f32 to vector<16x64xf32>
    %10 = arith.mulf %9, %8 : vector<16x64xf32>
    %11 = arith.addf %6, %10 : vector<16x64xf32>
    %cst_6 = arith.constant 0.797884583 : f32
    %12 = vector.broadcast %cst_6 : f32 to vector<16x64xf32>
    %13 = arith.mulf %12, %11 : vector<16x64xf32>
    %14 = math.tanh %13 : vector<16x64xf32>
    %cst_7 = arith.constant 1.000000e+00 : f32
    %15 = vector.broadcast %cst_7 : f32 to vector<16x64xf32>
    %16 = arith.addf %15, %14 : vector<16x64xf32>
    %cst_8 = arith.constant 5.000000e-01 : f32
    %17 = vector.broadcast %cst_8 : f32 to vector<16x64xf32>
    %18 = arith.mulf %17, %16 : vector<16x64xf32>
    %19 = arith.mulf %6, %18 : vector<16x64xf32>
    %c0_9 = arith.constant 0 : index
    %c0_10 = arith.constant 0 : index
    %20 = vector.load %arg4[%c0_9, %c0_10] : memref<64x32xbf16, #tpu.memory_space<vmem>>, vector<64x32xbf16>
    %21 = arith.truncf %19 : vector<16x64xf32> to vector<16x64xbf16>
    %cst_11 = arith.constant dense<0.000000e+00> : vector<16x32xf32>
    %22 = tpu.matmul %21, %20, %cst_11 {dimension_numbers = #tpu.dot_dimension_numbers<[1], [0], [0], [1], [0, 0, 1, 1], [], []>} : vector<16x64xbf16>, vector<64x32xbf16>, vector<16x32xf32> -> vector<16x32xf32>
    %c0_12 = arith.constant 0 : index
    %c0_13 = arith.constant 0 : index
    %23 = vector.load %arg5[%c0_12, %c0_13] : memref<1x32xf32, #tpu.memory_space<vmem>>, vector<1x32xf32>
    %24 = vector.broadcast %23 : vector<1x32xf32> to vector<16x32xf32>
    %25 = arith.addf %22, %24 : vector<16x32xf32>
    %26 = arith.addf %0, %25 : vector<16x32xf32>
    %c0_14 = arith.constant 0 : index
    %c0_15 = arith.constant 0 : index
    %27 = vector.load %arg6[%c0_14, %c0_15] : memref<1x32xf32, #tpu.memory_space<vmem>>, vector<1x32xf32>
    %c0_16 = arith.constant 0 : index
    %c0_17 = arith.constant 0 : index
    %28 = vector.load %arg7[%c0_16, %c0_17] : memref<1x32xf32, #tpu.memory_space<vmem>>, vector<1x32xf32>
    %cst_18 = arith.constant dense<0.000000e+00> : vector<16xf32>
    %29 = vector.multi_reduction <add>, %26, %cst_18 [1] : vector<16x32xf32> to vector<16xf32>
    %30 = vector.shape_cast %29 : vector<16xf32> to vector<16x1xf32>
    %cst_19 = arith.constant 3.200000e+01 : f32
    %31 = vector.broadcast %cst_19 : f32 to vector<16x1xf32>
    %32 = arith.divf %30, %31 : vector<16x1xf32>
    %33 = vector.broadcast %32 : vector<16x1xf32> to vector<16x32xf32>
    %34 = arith.subf %26, %33 : vector<16x32xf32>
    %35 = arith.mulf %34, %34 : vector<16x32xf32>
    %cst_20 = arith.constant dense<0.000000e+00> : vector<16xf32>
    %36 = vector.multi_reduction <add>, %35, %cst_20 [1] : vector<16x32xf32> to vector<16xf32>
    %37 = vector.shape_cast %36 : vector<16xf32> to vector<16x1xf32>
    %cst_21 = arith.constant 3.200000e+01 : f32
    %38 = vector.broadcast %cst_21 : f32 to vector<16x1xf32>
    %39 = arith.divf %37, %38 : vector<16x1xf32>
    %40 = vector.broadcast %32 : vector<16x1xf32> to vector<16x32xf32>
    %41 = arith.subf %26, %40 : vector<16x32xf32>
    %cst_22 = arith.constant 9.99999996E-13 : f32
    %42 = vector.broadcast %cst_22 : f32 to vector<16x1xf32>
    %43 = arith.addf %39, %42 : vector<16x1xf32>
    %44 = math.rsqrt %43 : vector<16x1xf32>
    %45 = vector.broadcast %44 : vector<16x1xf32> to vector<16x32xf32>
    %46 = arith.mulf %41, %45 : vector<16x32xf32>
    %47 = vector.broadcast %27 : vector<1x32xf32> to vector<16x32xf32>
    %48 = arith.mulf %46, %47 : vector<16x32xf32>
    %49 = vector.broadcast %28 : vector<1x32xf32> to vector<16x32xf32>
    %50 = arith.addf %48, %49 : vector<16x32xf32>
    %c0_23 = arith.constant 0 : index
    %c0_24 = arith.constant 0 : index
    %51 = vector.load %arg8[%c0_23, %c0_24] : memref<16x32xf32, #tpu.memory_space<vmem>>, vector<16x32xf32>
    tpu.vector_store %arg8[%c0_23, %c0_24], %50 {strides = array<i32>} : memref<16x32xf32, #tpu.memory_space<vmem>>, vector<16x32xf32>,
    return
  }
  func.func @transform_0(%arg0: i32) -> (i32, i32) {
    %c0_i32 = arith.constant 0 : i32
    %c0_i32_0 = arith.constant 0 : i32
    return %arg0, %c0_i32 : i32, i32
  }
  func.func @transform_1(%arg0: i32) -> (i32, i32) {
    %c0_i32 = arith.constant 0 : i32
    %c0_i32_0 = arith.constant 0 : i32
    %c0_i32_1 = arith.constant 0 : i32
    return %c0_i32, %c0_i32_0 : i32, i32
  }
  func.func @transform_2(%arg0: i32) -> (i32, i32) {
    %c0_i32 = arith.constant 0 : i32
    %c0_i32_0 = arith.constant 0 : i32
    %c0_i32_1 = arith.constant 0 : i32
    return %c0_i32, %c0_i32_0 : i32, i32
  }
  func.func @transform_3(%arg0: i32) -> (i32, i32) {
    %c0_i32 = arith.constant 0 : i32
    %c0_i32_0 = arith.constant 0 : i32
    %c0_i32_1 = arith.constant 0 : i32
    return %c0_i32, %c0_i32_0 : i32, i32
  }
  func.func @transform_4(%arg0: i32) -> (i32, i32) {
    %c0_i32 = arith.constant 0 : i32
    %c0_i32_0 = arith.constant 0 : i32
    %c0_i32_1 = arith.constant 0 : i32
    return %c0_i32, %c0_i32_0 : i32, i32
  }
  func.func @transform_5(%arg0: i32) -> (i32, i32) {
    %c0_i32 = arith.constant 0 : i32
    %c0_i32_0 = arith.constant 0 : i32
    %c0_i32_1 = arith.constant 0 : i32
    return %c0_i32, %c0_i32_0 : i32, i32
  }
  func.func @transform_6(%arg0: i32) -> (i32, i32) {
    %c0_i32 = arith.constant 0 : i32
    %c0_i32_0 = arith.constant 0 : i32
    %c0_i32_1 = arith.constant 0 : i32
    return %c0_i32, %c0_i32_0 : i32, i32
  }
  func.func @transform_7(%arg0: i32) -> (i32, i32) {
    %c0_i32 = arith.constant 0 : i32
    %c0_i32_0 = arith.constant 0 : i32
    return %arg0, %c0_i32 : i32, i32
  }
}

module attributes {stable_mosaic.version = 11 : i64} {
  func.func @_attn_sublayer_kernel(%arg0: i32, %arg1: i32, %arg2: memref<1x8x32xf32, #tpu.memory_space<vmem>>, %arg3: memref<1x8x32xf32, #tpu.memory_space<vmem>>, %arg4: memref<1x1x8xf32, #tpu.memory_space<vmem>>, %arg5: memref<3x32x32xbf16, #tpu.memory_space<vmem>>, %arg6: memref<3x1x32xf32, #tpu.memory_space<vmem>>, %arg7: memref<32x32xbf16, #tpu.memory_space<vmem>>, %arg8: memref<1x32xf32, #tpu.memory_space<vmem>>, %arg9: memref<1x32xf32, #tpu.memory_space<vmem>>, %arg10: memref<1x32xf32, #tpu.memory_space<vmem>>, %arg11: memref<1x32xf32, #tpu.memory_space<vmem>>, %arg12: memref<1x32xf32, #tpu.memory_space<vmem>>, %arg13: memref<1x8x32xf32, #tpu.memory_space<vmem>>) attributes {dimension_semantics = [#tpu.dimension_semantics<parallel>, #tpu.dimension_semantics<parallel>], iteration_bounds = array<i64: 2, 1>, scalar_prefetch = 0 : i64, scratch_operands = 0 : i64, tpu.core_type = #tpu.core_type<tc>, window_params = [{transform_indices = @transform_0, window_bounds = array<i64: 1, 8, 32>}, {transform_indices = @transform_1, window_bounds = array<i64: 1, 8, 32>}, {transform_indices = @transform_2, window_bounds = array<i64: 1, 1, 8>}, {pipeline_mode = #tpu.pipeline_mode<synchronous>, transform_indices = @transform_3, window_bounds = array<i64: 3, 32, 32>}, {pipeline_mode = #tpu.pipeline_mode<synchronous>, transform_indices = @transform_4, window_bounds = array<i64: 3, 1, 32>}, {pipeline_mode = #tpu.pipeline_mode<synchronous>, transform_indices = @transform_5, window_bounds = array<i64: 32, 32>}, {pipeline_mode = #tpu.pipeline_mode<synchronous>, transform_indices = @transform_6, window_bounds = array<i64: 1, 32>}, {pipeline_mode = #tpu.pipeline_mode<synchronous>, transform_indices = @transform_7, window_bounds = array<i64: 1, 32>}, {pipeline_mode = #tpu.pipeline_mode<synchronous>, transform_indices = @transform_8, window_bounds = array<i64: 1, 32>}, {pipeline_mode = #tpu.pipeline_mode<synchronous>, transform_indices = @transform_9, window_bounds = array<i64: 1, 32>}, {pipeline_mode = #tpu.pipeline_mode<synchronous>, transform_indices = @transform_10, window_bounds = array<i64: 1, 32>}, {transform_indices = @transform_11, window_bounds = array<i64: 1, 8, 32>}]} {
    %c0 = arith.constant 0 : index
    %c0_0 = arith.constant 0 : index
    %c0_1 = arith.constant 0 : index
    %0 = vector.load %arg2[%c0, %c0_0, %c0_1] : memref<1x8x32xf32, #tpu.memory_space<vmem>>, vector<1x8x32xf32>
    %1 = vector.shape_cast %0 : vector<1x8x32xf32> to vector<8x32xf32>
    %c0_2 = arith.constant 0 : index
    %c0_3 = arith.constant 0 : index
    %c0_4 = arith.constant 0 : index
    %2 = vector.load %arg3[%c0_2, %c0_3, %c0_4] : memref<1x8x32xf32, #tpu.memory_space<vmem>>, vector<1x8x32xf32>
    %3 = vector.shape_cast %2 : vector<1x8x32xf32> to vector<8x32xf32>
    %4 = arith.truncf %1 : vector<8x32xf32> to vector<8x32xbf16>
    %5 = arith.truncf %3 : vector<8x32xf32> to vector<8x32xbf16>
    %c0_5 = arith.constant 0 : index
    %c0_6 = arith.constant 0 : index
    %c0_7 = arith.constant 0 : index
    %6 = vector.load %arg5[%c0_5, %c0_6, %c0_7] : memref<3x32x32xbf16, #tpu.memory_space<vmem>>, vector<1x32x32xbf16>
    %7 = vector.shape_cast %6 : vector<1x32x32xbf16> to vector<32x32xbf16>
    %cst = arith.constant dense<0.000000e+00> : vector<8x32xf32>
    %8 = tpu.matmul %4, %7, %cst {dimension_numbers = #tpu.dot_dimension_numbers<[1], [0], [0], [1], [0, 0, 1, 1], [], []>} : vector<8x32xbf16>, vector<32x32xbf16>, vector<8x32xf32> -> vector<8x32xf32>
    %c0_8 = arith.constant 0 : index
    %c0_9 = arith.constant 0 : index
    %c0_10 = arith.constant 0 : index
    %9 = vector.load %arg6[%c0_8, %c0_9, %c0_10] : memref<3x1x32xf32, #tpu.memory_space<vmem>>, vector<1x1x32xf32>
    %10 = vector.shape_cast %9 : vector<1x1x32xf32> to vector<1x32xf32>
    %11 = vector.broadcast %10 : vector<1x32xf32> to vector<8x32xf32>
    %12 = arith.addf %8, %11 : vector<8x32xf32>
    %13 = arith.truncf %12 : vector<8x32xf32> to vector<8x32xbf16>
    %c1 = arith.constant 1 : index
    %c0_11 = arith.constant 0 : index
    %c0_12 = arith.constant 0 : index
    %14 = vector.load %arg5[%c1, %c0_11, %c0_12] : memref<3x32x32xbf16, #tpu.memory_space<vmem>>, vector<1x32x32xbf16>
    %15 = vector.shape_cast %14 : vector<1x32x32xbf16> to vector<32x32xbf16>
    %cst_13 = arith.constant dense<0.000000e+00> : vector<8x32xf32>
    %16 = tpu.matmul %5, %15, %cst_13 {dimension_numbers = #tpu.dot_dimension_numbers<[1], [0], [0], [1], [0, 0, 1, 1], [], []>} : vector<8x32xbf16>, vector<32x32xbf16>, vector<8x32xf32> -> vector<8x32xf32>
    %c1_14 = arith.constant 1 : index
    %c0_15 = arith.constant 0 : index
    %c0_16 = arith.constant 0 : index
    %17 = vector.load %arg6[%c1_14, %c0_15, %c0_16] : memref<3x1x32xf32, #tpu.memory_space<vmem>>, vector<1x1x32xf32>
    %18 = vector.shape_cast %17 : vector<1x1x32xf32> to vector<1x32xf32>
    %19 = vector.broadcast %18 : vector<1x32xf32> to vector<8x32xf32>
    %20 = arith.addf %16, %19 : vector<8x32xf32>
    %21 = arith.truncf %20 : vector<8x32xf32> to vector<8x32xbf16>
    %c2 = arith.constant 2 : index
    %c0_17 = arith.constant 0 : index
    %c0_18 = arith.constant 0 : index
    %22 = vector.load %arg5[%c2, %c0_17, %c0_18] : memref<3x32x32xbf16, #tpu.memory_space<vmem>>, vector<1x32x32xbf16>
    %23 = vector.shape_cast %22 : vector<1x32x32xbf16> to vector<32x32xbf16>
    %cst_19 = arith.constant dense<0.000000e+00> : vector<8x32xf32>
    %24 = tpu.matmul %5, %23, %cst_19 {dimension_numbers = #tpu.dot_dimension_numbers<[1], [0], [0], [1], [0, 0, 1, 1], [], []>} : vector<8x32xbf16>, vector<32x32xbf16>, vector<8x32xf32> -> vector<8x32xf32>
    %c2_20 = arith.constant 2 : index
    %c0_21 = arith.constant 0 : index
    %c0_22 = arith.constant 0 : index
    %25 = vector.load %arg6[%c2_20, %c0_21, %c0_22] : memref<3x1x32xf32, #tpu.memory_space<vmem>>, vector<1x1x32xf32>
    %26 = vector.shape_cast %25 : vector<1x1x32xf32> to vector<1x32xf32>
    %27 = vector.broadcast %26 : vector<1x32xf32> to vector<8x32xf32>
    %28 = arith.addf %24, %27 : vector<8x32xf32>
    %29 = arith.truncf %28 : vector<8x32xf32> to vector<8x32xbf16>
    %c0_23 = arith.constant 0 : index
    %c0_24 = arith.constant 0 : index
    %c0_25 = arith.constant 0 : index
    %30 = vector.load %arg4[%c0_23, %c0_24, %c0_25] : memref<1x1x8xf32, #tpu.memory_space<vmem>>, vector<1x1x8xf32>
    %31 = vector.shape_cast %30 : vector<1x1x8xf32> to vector<1x8xf32>
    %cst_26 = arith.constant 1.000000e+00 : f32
    %32 = vector.broadcast %cst_26 : f32 to vector<1x8xf32>
    %33 = arith.subf %31, %32 : vector<1x8xf32>
    %cst_27 = arith.constant 1.000000e+09 : f32
    %34 = vector.broadcast %cst_27 : f32 to vector<1x8xf32>
    %35 = arith.mulf %33, %34 : vector<1x8xf32>
    %36 = vector.shape_cast %35 : vector<1x8xf32> to vector<1x8xf32>
    %37 = vector.broadcast %36 : vector<1x8xf32> to vector<8x8xf32>
    %38 = vector.extract_strided_slice %13 {offsets = [0, 0], sizes = [8, 8], strides = [1, 1]} : vector<8x32xbf16> to vector<8x8xbf16>
    %39 = vector.extract_strided_slice %21 {offsets = [0, 0], sizes = [8, 8], strides = [1, 1]} : vector<8x32xbf16> to vector<8x8xbf16>
    %cst_28 = arith.constant dense<0.000000e+00> : vector<8x8xf32>
    %40 = tpu.matmul %38, %39, %cst_28 {dimension_numbers = #tpu.dot_dimension_numbers<[1], [1], [0], [0], [0, 0, 1, 0], [], []>} : vector<8x8xbf16>, vector<8x8xbf16>, vector<8x8xf32> -> vector<8x8xf32>
    %cst_29 = arith.constant 0.353553385 : f32
    %41 = vector.broadcast %cst_29 : f32 to vector<8x8xf32>
    %42 = arith.mulf %40, %41 : vector<8x8xf32>
    %43 = arith.addf %42, %37 : vector<8x8xf32>
    %cst_30 = arith.constant dense<0xFF800000> : vector<8xf32>
    %44 = vector.multi_reduction <maximumf>, %43, %cst_30 [1] : vector<8x8xf32> to vector<8xf32>
    %45 = vector.shape_cast %44 : vector<8xf32> to vector<8x1xf32>
    %46 = vector.broadcast %45 : vector<8x1xf32> to vector<8x8xf32>
    %47 = arith.subf %43, %46 : vector<8x8xf32>
    %48 = math.exp %47 : vector<8x8xf32>
    %cst_31 = arith.constant dense<0.000000e+00> : vector<8xf32>
    %49 = vector.multi_reduction <add>, %48, %cst_31 [1] : vector<8x8xf32> to vector<8xf32>
    %50 = vector.shape_cast %49 : vector<8xf32> to vector<8x1xf32>
    %51 = tpu.reciprocal %50 {approx = true} : vector<8x1xf32> -> vector<8x1xf32>
    %52 = vector.broadcast %51 : vector<8x1xf32> to vector<8x8xf32>
    %53 = arith.mulf %48, %52 : vector<8x8xf32>
    %54 = arith.truncf %53 : vector<8x8xf32> to vector<8x8xbf16>
    %55 = vector.extract_strided_slice %29 {offsets = [0, 0], sizes = [8, 8], strides = [1, 1]} : vector<8x32xbf16> to vector<8x8xbf16>
    %cst_32 = arith.constant dense<0.000000e+00> : vector<8x8xf32>
    %56 = tpu.matmul %54, %55, %cst_32 {dimension_numbers = #tpu.dot_dimension_numbers<[1], [0], [0], [1], [0, 0, 1, 1], [], []>} : vector<8x8xbf16>, vector<8x8xbf16>, vector<8x8xf32> -> vector<8x8xf32>
    %57 = vector.extract_strided_slice %13 {offsets = [0, 8], sizes = [8, 8], strides = [1, 1]} : vector<8x32xbf16> to vector<8x8xbf16>
    %58 = vector.extract_strided_slice %21 {offsets = [0, 8], sizes = [8, 8], strides = [1, 1]} : vector<8x32xbf16> to vector<8x8xbf16>
    %cst_33 = arith.constant dense<0.000000e+00> : vector<8x8xf32>
    %59 = tpu.matmul %57, %58, %cst_33 {dimension_numbers = #tpu.dot_dimension_numbers<[1], [1], [0], [0], [0, 0, 1, 0], [], []>} : vector<8x8xbf16>, vector<8x8xbf16>, vector<8x8xf32> -> vector<8x8xf32>
    %cst_34 = arith.constant 0.353553385 : f32
    %60 = vector.broadcast %cst_34 : f32 to vector<8x8xf32>
    %61 = arith.mulf %59, %60 : vector<8x8xf32>
    %62 = arith.addf %61, %37 : vector<8x8xf32>
    %cst_35 = arith.constant dense<0xFF800000> : vector<8xf32>
    %63 = vector.multi_reduction <maximumf>, %62, %cst_35 [1] : vector<8x8xf32> to vector<8xf32>
    %64 = vector.shape_cast %63 : vector<8xf32> to vector<8x1xf32>
    %65 = vector.broadcast %64 : vector<8x1xf32> to vector<8x8xf32>
    %66 = arith.subf %62, %65 : vector<8x8xf32>
    %67 = math.exp %66 : vector<8x8xf32>
    %cst_36 = arith.constant dense<0.000000e+00> : vector<8xf32>
    %68 = vector.multi_reduction <add>, %67, %cst_36 [1] : vector<8x8xf32> to vector<8xf32>
    %69 = vector.shape_cast %68 : vector<8xf32> to vector<8x1xf32>
    %70 = tpu.reciprocal %69 {approx = true} : vector<8x1xf32> -> vector<8x1xf32>
    %71 = vector.broadcast %70 : vector<8x1xf32> to vector<8x8xf32>
    %72 = arith.mulf %67, %71 : vector<8x8xf32>
    %73 = arith.truncf %72 : vector<8x8xf32> to vector<8x8xbf16>
    %74 = vector.extract_strided_slice %29 {offsets = [0, 8], sizes = [8, 8], strides = [1, 1]} : vector<8x32xbf16> to vector<8x8xbf16>
    %cst_37 = arith.constant dense<0.000000e+00> : vector<8x8xf32>
    %75 = tpu.matmul %73, %74, %cst_37 {dimension_numbers = #tpu.dot_dimension_numbers<[1], [0], [0], [1], [0, 0, 1, 1], [], []>} : vector<8x8xbf16>, vector<8x8xbf16>, vector<8x8xf32> -> vector<8x8xf32>
    %76 = vector.extract_strided_slice %13 {offsets = [0, 16], sizes = [8, 8], strides = [1, 1]} : vector<8x32xbf16> to vector<8x8xbf16>
    %77 = vector.extract_strided_slice %21 {offsets = [0, 16], sizes = [8, 8], strides = [1, 1]} : vector<8x32xbf16> to vector<8x8xbf16>
    %cst_38 = arith.constant dense<0.000000e+00> : vector<8x8xf32>
    %78 = tpu.matmul %76, %77, %cst_38 {dimension_numbers = #tpu.dot_dimension_numbers<[1], [1], [0], [0], [0, 0, 1, 0], [], []>} : vector<8x8xbf16>, vector<8x8xbf16>, vector<8x8xf32> -> vector<8x8xf32>
    %cst_39 = arith.constant 0.353553385 : f32
    %79 = vector.broadcast %cst_39 : f32 to vector<8x8xf32>
    %80 = arith.mulf %78, %79 : vector<8x8xf32>
    %81 = arith.addf %80, %37 : vector<8x8xf32>
    %cst_40 = arith.constant dense<0xFF800000> : vector<8xf32>
    %82 = vector.multi_reduction <maximumf>, %81, %cst_40 [1] : vector<8x8xf32> to vector<8xf32>
    %83 = vector.shape_cast %82 : vector<8xf32> to vector<8x1xf32>
    %84 = vector.broadcast %83 : vector<8x1xf32> to vector<8x8xf32>
    %85 = arith.subf %81, %84 : vector<8x8xf32>
    %86 = math.exp %85 : vector<8x8xf32>
    %cst_41 = arith.constant dense<0.000000e+00> : vector<8xf32>
    %87 = vector.multi_reduction <add>, %86, %cst_41 [1] : vector<8x8xf32> to vector<8xf32>
    %88 = vector.shape_cast %87 : vector<8xf32> to vector<8x1xf32>
    %89 = tpu.reciprocal %88 {approx = true} : vector<8x1xf32> -> vector<8x1xf32>
    %90 = vector.broadcast %89 : vector<8x1xf32> to vector<8x8xf32>
    %91 = arith.mulf %86, %90 : vector<8x8xf32>
    %92 = arith.truncf %91 : vector<8x8xf32> to vector<8x8xbf16>
    %93 = vector.extract_strided_slice %29 {offsets = [0, 16], sizes = [8, 8], strides = [1, 1]} : vector<8x32xbf16> to vector<8x8xbf16>
    %cst_42 = arith.constant dense<0.000000e+00> : vector<8x8xf32>
    %94 = tpu.matmul %92, %93, %cst_42 {dimension_numbers = #tpu.dot_dimension_numbers<[1], [0], [0], [1], [0, 0, 1, 1], [], []>} : vector<8x8xbf16>, vector<8x8xbf16>, vector<8x8xf32> -> vector<8x8xf32>
    %95 = vector.extract_strided_slice %13 {offsets = [0, 24], sizes = [8, 8], strides = [1, 1]} : vector<8x32xbf16> to vector<8x8xbf16>
    %96 = vector.extract_strided_slice %21 {offsets = [0, 24], sizes = [8, 8], strides = [1, 1]} : vector<8x32xbf16> to vector<8x8xbf16>
    %cst_43 = arith.constant dense<0.000000e+00> : vector<8x8xf32>
    %97 = tpu.matmul %95, %96, %cst_43 {dimension_numbers = #tpu.dot_dimension_numbers<[1], [1], [0], [0], [0, 0, 1, 0], [], []>} : vector<8x8xbf16>, vector<8x8xbf16>, vector<8x8xf32> -> vector<8x8xf32>
    %cst_44 = arith.constant 0.353553385 : f32
    %98 = vector.broadcast %cst_44 : f32 to vector<8x8xf32>
    %99 = arith.mulf %97, %98 : vector<8x8xf32>
    %100 = arith.addf %99, %37 : vector<8x8xf32>
    %cst_45 = arith.constant dense<0xFF800000> : vector<8xf32>
    %101 = vector.multi_reduction <maximumf>, %100, %cst_45 [1] : vector<8x8xf32> to vector<8xf32>
    %102 = vector.shape_cast %101 : vector<8xf32> to vector<8x1xf32>
    %103 = vector.broadcast %102 : vector<8x1xf32> to vector<8x8xf32>
    %104 = arith.subf %100, %103 : vector<8x8xf32>
    %105 = math.exp %104 : vector<8x8xf32>
    %cst_46 = arith.constant dense<0.000000e+00> : vector<8xf32>
    %106 = vector.multi_reduction <add>, %105, %cst_46 [1] : vector<8x8xf32> to vector<8xf32>
    %107 = vector.shape_cast %106 : vector<8xf32> to vector<8x1xf32>
    %108 = tpu.reciprocal %107 {approx = true} : vector<8x1xf32> -> vector<8x1xf32>
    %109 = vector.broadcast %108 : vector<8x1xf32> to vector<8x8xf32>
    %110 = arith.mulf %105, %109 : vector<8x8xf32>
    %111 = arith.truncf %110 : vector<8x8xf32> to vector<8x8xbf16>
    %112 = vector.extract_strided_slice %29 {offsets = [0, 24], sizes = [8, 8], strides = [1, 1]} : vector<8x32xbf16> to vector<8x8xbf16>
    %cst_47 = arith.constant dense<0.000000e+00> : vector<8x8xf32>
    %113 = tpu.matmul %111, %112, %cst_47 {dimension_numbers = #tpu.dot_dimension_numbers<[1], [0], [0], [1], [0, 0, 1, 1], [], []>} : vector<8x8xbf16>, vector<8x8xbf16>, vector<8x8xf32> -> vector<8x8xf32>
    %114 = tpu.concatenate %56, %75, %94, %113 in 1 : vector<8x8xf32>, vector<8x8xf32>, vector<8x8xf32>, vector<8x8xf32> -> vector<8x32xf32>
    %c0_48 = arith.constant 0 : index
    %c0_49 = arith.constant 0 : index
    %115 = vector.load %arg7[%c0_48, %c0_49] : memref<32x32xbf16, #tpu.memory_space<vmem>>, vector<32x32xbf16>
    %116 = arith.truncf %114 : vector<8x32xf32> to vector<8x32xbf16>
    %cst_50 = arith.constant dense<0.000000e+00> : vector<8x32xf32>
    %117 = tpu.matmul %116, %115, %cst_50 {dimension_numbers = #tpu.dot_dimension_numbers<[1], [0], [0], [1], [0, 0, 1, 1], [], []>} : vector<8x32xbf16>, vector<32x32xbf16>, vector<8x32xf32> -> vector<8x32xf32>
    %c0_51 = arith.constant 0 : index
    %c0_52 = arith.constant 0 : index
    %118 = vector.load %arg8[%c0_51, %c0_52] : memref<1x32xf32, #tpu.memory_space<vmem>>, vector<1x32xf32>
    %119 = vector.broadcast %118 : vector<1x32xf32> to vector<8x32xf32>
    %120 = arith.addf %117, %119 : vector<8x32xf32>
    %121 = arith.addf %1, %120 : vector<8x32xf32>
    %c0_53 = arith.constant 0 : index
    %c0_54 = arith.constant 0 : index
    %122 = vector.load %arg11[%c0_53, %c0_54] : memref<1x32xf32, #tpu.memory_space<vmem>>, vector<1x32xf32>
    %c0_55 = arith.constant 0 : index
    %c0_56 = arith.constant 0 : index
    %123 = vector.load %arg12[%c0_55, %c0_56] : memref<1x32xf32, #tpu.memory_space<vmem>>, vector<1x32xf32>
    %cst_57 = arith.constant dense<0.000000e+00> : vector<8xf32>
    %124 = vector.multi_reduction <add>, %121, %cst_57 [1] : vector<8x32xf32> to vector<8xf32>
    %125 = vector.shape_cast %124 : vector<8xf32> to vector<8x1xf32>
    %cst_58 = arith.constant 3.200000e+01 : f32
    %126 = vector.broadcast %cst_58 : f32 to vector<8x1xf32>
    %127 = arith.divf %125, %126 : vector<8x1xf32>
    %128 = vector.broadcast %127 : vector<8x1xf32> to vector<8x32xf32>
    %129 = arith.subf %121, %128 : vector<8x32xf32>
    %130 = arith.mulf %129, %129 : vector<8x32xf32>
    %cst_59 = arith.constant dense<0.000000e+00> : vector<8xf32>
    %131 = vector.multi_reduction <add>, %130, %cst_59 [1] : vector<8x32xf32> to vector<8xf32>
    %132 = vector.shape_cast %131 : vector<8xf32> to vector<8x1xf32>
    %cst_60 = arith.constant 3.200000e+01 : f32
    %133 = vector.broadcast %cst_60 : f32 to vector<8x1xf32>
    %134 = arith.divf %132, %133 : vector<8x1xf32>
    %135 = vector.broadcast %127 : vector<8x1xf32> to vector<8x32xf32>
    %136 = arith.subf %121, %135 : vector<8x32xf32>
    %cst_61 = arith.constant 9.99999996E-13 : f32
    %137 = vector.broadcast %cst_61 : f32 to vector<8x1xf32>
    %138 = arith.addf %134, %137 : vector<8x1xf32>
    %139 = math.rsqrt %138 : vector<8x1xf32>
    %140 = vector.broadcast %139 : vector<8x1xf32> to vector<8x32xf32>
    %141 = arith.mulf %136, %140 : vector<8x32xf32>
    %142 = vector.broadcast %122 : vector<1x32xf32> to vector<8x32xf32>
    %143 = arith.mulf %141, %142 : vector<8x32xf32>
    %144 = vector.broadcast %123 : vector<1x32xf32> to vector<8x32xf32>
    %145 = arith.addf %143, %144 : vector<8x32xf32>
    %c0_62 = arith.constant 0 : index
    %c0_63 = arith.constant 0 : index
    %c0_64 = arith.constant 0 : index
    %146 = vector.load %arg13[%c0_62, %c0_63, %c0_64] : memref<1x8x32xf32, #tpu.memory_space<vmem>>, vector<1x8x32xf32>
    %147 = vector.shape_cast %146 : vector<1x8x32xf32> to vector<8x32xf32>
    %148 = vector.shape_cast %145 : vector<8x32xf32> to vector<1x8x32xf32>
    tpu.vector_store %arg13[%c0_62, %c0_63, %c0_64], %148 {strides = array<i32>} : memref<1x8x32xf32, #tpu.memory_space<vmem>>, vector<1x8x32xf32>,
    return
  }
  func.func @transform_0(%arg0: i32, %arg1: i32) -> (i32, i32, i32) {
    %c0_i32 = arith.constant 0 : i32
    %c0_i32_0 = arith.constant 0 : i32
    return %arg0, %arg1, %c0_i32 : i32, i32, i32
  }
  func.func @transform_1(%arg0: i32, %arg1: i32) -> (i32, i32, i32) {
    %c0_i32 = arith.constant 0 : i32
    %c0_i32_0 = arith.constant 0 : i32
    %c0_i32_1 = arith.constant 0 : i32
    return %arg0, %c0_i32, %c0_i32_0 : i32, i32, i32
  }
  func.func @transform_2(%arg0: i32, %arg1: i32) -> (i32, i32, i32) {
    %c0_i32 = arith.constant 0 : i32
    %c0_i32_0 = arith.constant 0 : i32
    %c0_i32_1 = arith.constant 0 : i32
    return %arg0, %c0_i32, %c0_i32_0 : i32, i32, i32
  }
  func.func @transform_3(%arg0: i32, %arg1: i32) -> (i32, i32, i32) {
    %c0_i32 = arith.constant 0 : i32
    %c0_i32_0 = arith.constant 0 : i32
    %c0_i32_1 = arith.constant 0 : i32
    %c0_i32_2 = arith.constant 0 : i32
    return %c0_i32, %c0_i32_0, %c0_i32_1 : i32, i32, i32
  }
  func.func @transform_4(%arg0: i32, %arg1: i32) -> (i32, i32, i32) {
    %c0_i32 = arith.constant 0 : i32
    %c0_i32_0 = arith.constant 0 : i32
    %c0_i32_1 = arith.constant 0 : i32
    %c0_i32_2 = arith.constant 0 : i32
    return %c0_i32, %c0_i32_0, %c0_i32_1 : i32, i32, i32
  }
  func.func @transform_5(%arg0: i32, %arg1: i32) -> (i32, i32) {
    %c0_i32 = arith.constant 0 : i32
    %c0_i32_0 = arith.constant 0 : i32
    %c0_i32_1 = arith.constant 0 : i32
    return %c0_i32, %c0_i32_0 : i32, i32
  }
  func.func @transform_6(%arg0: i32, %arg1: i32) -> (i32, i32) {
    %c0_i32 = arith.constant 0 : i32
    %c0_i32_0 = arith.constant 0 : i32
    %c0_i32_1 = arith.constant 0 : i32
    return %c0_i32, %c0_i32_0 : i32, i32
  }
  func.func @transform_7(%arg0: i32, %arg1: i32) -> (i32, i32) {
    %c0_i32 = arith.constant 0 : i32
    %c0_i32_0 = arith.constant 0 : i32
    %c0_i32_1 = arith.constant 0 : i32
    return %c0_i32, %c0_i32_0 : i32, i32
  }
  func.func @transform_8(%arg0: i32, %arg1: i32) -> (i32, i32) {
    %c0_i32 = arith.constant 0 : i32
    %c0_i32_0 = arith.constant 0 : i32
    %c0_i32_1 = arith.constant 0 : i32
    return %c0_i32, %c0_i32_0 : i32, i32
  }
  func.func @transform_9(%arg0: i32, %arg1: i32) -> (i32, i32) {
    %c0_i32 = arith.constant 0 : i32
    %c0_i32_0 = arith.constant 0 : i32
    %c0_i32_1 = arith.constant 0 : i32
    return %c0_i32, %c0_i32_0 : i32, i32
  }
  func.func @transform_10(%arg0: i32, %arg1: i32) -> (i32, i32) {
    %c0_i32 = arith.constant 0 : i32
    %c0_i32_0 = arith.constant 0 : i32
    %c0_i32_1 = arith.constant 0 : i32
    return %c0_i32, %c0_i32_0 : i32, i32
  }
  func.func @transform_11(%arg0: i32, %arg1: i32) -> (i32, i32, i32) {
    %c0_i32 = arith.constant 0 : i32
    %c0_i32_0 = arith.constant 0 : i32
    return %arg0, %arg1, %c0_i32 : i32, i32, i32
  }
}

module attributes {stable_mosaic.version = 11 : i64} {
  func.func @_attn_sublayer_kernel(%arg0: i32, %arg1: i32, %arg2: memref<1x8x32xf32, #tpu.memory_space<vmem>>, %arg3: memref<1x8x32xf32, #tpu.memory_space<vmem>>, %arg4: memref<1x1x8xf32, #tpu.memory_space<vmem>>, %arg5: memref<3x32x32xbf16, #tpu.memory_space<vmem>>, %arg6: memref<3x1x32xf32, #tpu.memory_space<vmem>>, %arg7: memref<32x32xbf16, #tpu.memory_space<vmem>>, %arg8: memref<1x32xf32, #tpu.memory_space<vmem>>, %arg9: memref<1x32xf32, #tpu.memory_space<vmem>>, %arg10: memref<1x32xf32, #tpu.memory_space<vmem>>, %arg11: memref<1x32xf32, #tpu.memory_space<vmem>>, %arg12: memref<1x32xf32, #tpu.memory_space<vmem>>, %arg13: memref<1x8x32xf32, #tpu.memory_space<vmem>>) attributes {dimension_semantics = [#tpu.dimension_semantics<parallel>, #tpu.dimension_semantics<parallel>], iteration_bounds = array<i64: 2, 1>, scalar_prefetch = 0 : i64, scratch_operands = 0 : i64, tpu.core_type = #tpu.core_type<tc>, window_params = [{transform_indices = @transform_0, window_bounds = array<i64: 1, 8, 32>}, {transform_indices = @transform_1, window_bounds = array<i64: 1, 8, 32>}, {transform_indices = @transform_2, window_bounds = array<i64: 1, 1, 8>}, {pipeline_mode = #tpu.pipeline_mode<synchronous>, transform_indices = @transform_3, window_bounds = array<i64: 3, 32, 32>}, {pipeline_mode = #tpu.pipeline_mode<synchronous>, transform_indices = @transform_4, window_bounds = array<i64: 3, 1, 32>}, {pipeline_mode = #tpu.pipeline_mode<synchronous>, transform_indices = @transform_5, window_bounds = array<i64: 32, 32>}, {pipeline_mode = #tpu.pipeline_mode<synchronous>, transform_indices = @transform_6, window_bounds = array<i64: 1, 32>}, {pipeline_mode = #tpu.pipeline_mode<synchronous>, transform_indices = @transform_7, window_bounds = array<i64: 1, 32>}, {pipeline_mode = #tpu.pipeline_mode<synchronous>, transform_indices = @transform_8, window_bounds = array<i64: 1, 32>}, {pipeline_mode = #tpu.pipeline_mode<synchronous>, transform_indices = @transform_9, window_bounds = array<i64: 1, 32>}, {pipeline_mode = #tpu.pipeline_mode<synchronous>, transform_indices = @transform_10, window_bounds = array<i64: 1, 32>}, {transform_indices = @transform_11, window_bounds = array<i64: 1, 8, 32>}]} {
    %c0 = arith.constant 0 : index
    %c0_0 = arith.constant 0 : index
    %c0_1 = arith.constant 0 : index
    %0 = vector.load %arg2[%c0, %c0_0, %c0_1] : memref<1x8x32xf32, #tpu.memory_space<vmem>>, vector<1x8x32xf32>
    %1 = vector.shape_cast %0 : vector<1x8x32xf32> to vector<8x32xf32>
    %c0_2 = arith.constant 0 : index
    %c0_3 = arith.constant 0 : index
    %2 = vector.load %arg9[%c0_2, %c0_3] : memref<1x32xf32, #tpu.memory_space<vmem>>, vector<1x32xf32>
    %c0_4 = arith.constant 0 : index
    %c0_5 = arith.constant 0 : index
    %3 = vector.load %arg10[%c0_4, %c0_5] : memref<1x32xf32, #tpu.memory_space<vmem>>, vector<1x32xf32>
    %cst = arith.constant dense<0.000000e+00> : vector<8xf32>
    %4 = vector.multi_reduction <add>, %1, %cst [1] : vector<8x32xf32> to vector<8xf32>
    %5 = vector.shape_cast %4 : vector<8xf32> to vector<8x1xf32>
    %cst_6 = arith.constant 3.200000e+01 : f32
    %6 = vector.broadcast %cst_6 : f32 to vector<8x1xf32>
    %7 = arith.divf %5, %6 : vector<8x1xf32>
    %8 = vector.broadcast %7 : vector<8x1xf32> to vector<8x32xf32>
    %9 = arith.subf %1, %8 : vector<8x32xf32>
    %10 = arith.mulf %9, %9 : vector<8x32xf32>
    %cst_7 = arith.constant dense<0.000000e+00> : vector<8xf32>
    %11 = vector.multi_reduction <add>, %10, %cst_7 [1] : vector<8x32xf32> to vector<8xf32>
    %12 = vector.shape_cast %11 : vector<8xf32> to vector<8x1xf32>
    %cst_8 = arith.constant 3.200000e+01 : f32
    %13 = vector.broadcast %cst_8 : f32 to vector<8x1xf32>
    %14 = arith.divf %12, %13 : vector<8x1xf32>
    %15 = vector.broadcast %7 : vector<8x1xf32> to vector<8x32xf32>
    %16 = arith.subf %1, %15 : vector<8x32xf32>
    %cst_9 = arith.constant 9.99999996E-13 : f32
    %17 = vector.broadcast %cst_9 : f32 to vector<8x1xf32>
    %18 = arith.addf %14, %17 : vector<8x1xf32>
    %19 = math.rsqrt %18 : vector<8x1xf32>
    %20 = vector.broadcast %19 : vector<8x1xf32> to vector<8x32xf32>
    %21 = arith.mulf %16, %20 : vector<8x32xf32>
    %22 = vector.broadcast %2 : vector<1x32xf32> to vector<8x32xf32>
    %23 = arith.mulf %21, %22 : vector<8x32xf32>
    %24 = vector.broadcast %3 : vector<1x32xf32> to vector<8x32xf32>
    %25 = arith.addf %23, %24 : vector<8x32xf32>
    %c0_10 = arith.constant 0 : index
    %c0_11 = arith.constant 0 : index
    %c0_12 = arith.constant 0 : index
    %26 = vector.load %arg3[%c0_10, %c0_11, %c0_12] : memref<1x8x32xf32, #tpu.memory_space<vmem>>, vector<1x8x32xf32>
    %27 = vector.shape_cast %26 : vector<1x8x32xf32> to vector<8x32xf32>
    %c0_13 = arith.constant 0 : index
    %c0_14 = arith.constant 0 : index
    %28 = vector.load %arg9[%c0_13, %c0_14] : memref<1x32xf32, #tpu.memory_space<vmem>>, vector<1x32xf32>
    %c0_15 = arith.constant 0 : index
    %c0_16 = arith.constant 0 : index
    %29 = vector.load %arg10[%c0_15, %c0_16] : memref<1x32xf32, #tpu.memory_space<vmem>>, vector<1x32xf32>
    %cst_17 = arith.constant dense<0.000000e+00> : vector<8xf32>
    %30 = vector.multi_reduction <add>, %27, %cst_17 [1] : vector<8x32xf32> to vector<8xf32>
    %31 = vector.shape_cast %30 : vector<8xf32> to vector<8x1xf32>
    %cst_18 = arith.constant 3.200000e+01 : f32
    %32 = vector.broadcast %cst_18 : f32 to vector<8x1xf32>
    %33 = arith.divf %31, %32 : vector<8x1xf32>
    %34 = vector.broadcast %33 : vector<8x1xf32> to vector<8x32xf32>
    %35 = arith.subf %27, %34 : vector<8x32xf32>
    %36 = arith.mulf %35, %35 : vector<8x32xf32>
    %cst_19 = arith.constant dense<0.000000e+00> : vector<8xf32>
    %37 = vector.multi_reduction <add>, %36, %cst_19 [1] : vector<8x32xf32> to vector<8xf32>
    %38 = vector.shape_cast %37 : vector<8xf32> to vector<8x1xf32>
    %cst_20 = arith.constant 3.200000e+01 : f32
    %39 = vector.broadcast %cst_20 : f32 to vector<8x1xf32>
    %40 = arith.divf %38, %39 : vector<8x1xf32>
    %41 = vector.broadcast %33 : vector<8x1xf32> to vector<8x32xf32>
    %42 = arith.subf %27, %41 : vector<8x32xf32>
    %cst_21 = arith.constant 9.99999996E-13 : f32
    %43 = vector.broadcast %cst_21 : f32 to vector<8x1xf32>
    %44 = arith.addf %40, %43 : vector<8x1xf32>
    %45 = math.rsqrt %44 : vector<8x1xf32>
    %46 = vector.broadcast %45 : vector<8x1xf32> to vector<8x32xf32>
    %47 = arith.mulf %42, %46 : vector<8x32xf32>
    %48 = vector.broadcast %28 : vector<1x32xf32> to vector<8x32xf32>
    %49 = arith.mulf %47, %48 : vector<8x32xf32>
    %50 = vector.broadcast %29 : vector<1x32xf32> to vector<8x32xf32>
    %51 = arith.addf %49, %50 : vector<8x32xf32>
    %52 = arith.truncf %25 : vector<8x32xf32> to vector<8x32xbf16>
    %53 = arith.truncf %51 : vector<8x32xf32> to vector<8x32xbf16>
    %c0_22 = arith.constant 0 : index
    %c0_23 = arith.constant 0 : index
    %c0_24 = arith.constant 0 : index
    %54 = vector.load %arg5[%c0_22, %c0_23, %c0_24] : memref<3x32x32xbf16, #tpu.memory_space<vmem>>, vector<1x32x32xbf16>
    %55 = vector.shape_cast %54 : vector<1x32x32xbf16> to vector<32x32xbf16>
    %cst_25 = arith.constant dense<0.000000e+00> : vector<8x32xf32>
    %56 = tpu.matmul %52, %55, %cst_25 {dimension_numbers = #tpu.dot_dimension_numbers<[1], [0], [0], [1], [0, 0, 1, 1], [], []>} : vector<8x32xbf16>, vector<32x32xbf16>, vector<8x32xf32> -> vector<8x32xf32>
    %c0_26 = arith.constant 0 : index
    %c0_27 = arith.constant 0 : index
    %c0_28 = arith.constant 0 : index
    %57 = vector.load %arg6[%c0_26, %c0_27, %c0_28] : memref<3x1x32xf32, #tpu.memory_space<vmem>>, vector<1x1x32xf32>
    %58 = vector.shape_cast %57 : vector<1x1x32xf32> to vector<1x32xf32>
    %59 = vector.broadcast %58 : vector<1x32xf32> to vector<8x32xf32>
    %60 = arith.addf %56, %59 : vector<8x32xf32>
    %61 = arith.truncf %60 : vector<8x32xf32> to vector<8x32xbf16>
    %c1 = arith.constant 1 : index
    %c0_29 = arith.constant 0 : index
    %c0_30 = arith.constant 0 : index
    %62 = vector.load %arg5[%c1, %c0_29, %c0_30] : memref<3x32x32xbf16, #tpu.memory_space<vmem>>, vector<1x32x32xbf16>
    %63 = vector.shape_cast %62 : vector<1x32x32xbf16> to vector<32x32xbf16>
    %cst_31 = arith.constant dense<0.000000e+00> : vector<8x32xf32>
    %64 = tpu.matmul %53, %63, %cst_31 {dimension_numbers = #tpu.dot_dimension_numbers<[1], [0], [0], [1], [0, 0, 1, 1], [], []>} : vector<8x32xbf16>, vector<32x32xbf16>, vector<8x32xf32> -> vector<8x32xf32>
    %c1_32 = arith.constant 1 : index
    %c0_33 = arith.constant 0 : index
    %c0_34 = arith.constant 0 : index
    %65 = vector.load %arg6[%c1_32, %c0_33, %c0_34] : memref<3x1x32xf32, #tpu.memory_space<vmem>>, vector<1x1x32xf32>
    %66 = vector.shape_cast %65 : vector<1x1x32xf32> to vector<1x32xf32>
    %67 = vector.broadcast %66 : vector<1x32xf32> to vector<8x32xf32>
    %68 = arith.addf %64, %67 : vector<8x32xf32>
    %69 = arith.truncf %68 : vector<8x32xf32> to vector<8x32xbf16>
    %c2 = arith.constant 2 : index
    %c0_35 = arith.constant 0 : index
    %c0_36 = arith.constant 0 : index
    %70 = vector.load %arg5[%c2, %c0_35, %c0_36] : memref<3x32x32xbf16, #tpu.memory_space<vmem>>, vector<1x32x32xbf16>
    %71 = vector.shape_cast %70 : vector<1x32x32xbf16> to vector<32x32xbf16>
    %cst_37 = arith.constant dense<0.000000e+00> : vector<8x32xf32>
    %72 = tpu.matmul %53, %71, %cst_37 {dimension_numbers = #tpu.dot_dimension_numbers<[1], [0], [0], [1], [0, 0, 1, 1], [], []>} : vector<8x32xbf16>, vector<32x32xbf16>, vector<8x32xf32> -> vector<8x32xf32>
    %c2_38 = arith.constant 2 : index
    %c0_39 = arith.constant 0 : index
    %c0_40 = arith.constant 0 : index
    %73 = vector.load %arg6[%c2_38, %c0_39, %c0_40] : memref<3x1x32xf32, #tpu.memory_space<vmem>>, vector<1x1x32xf32>
    %74 = vector.shape_cast %73 : vector<1x1x32xf32> to vector<1x32xf32>
    %75 = vector.broadcast %74 : vector<1x32xf32> to vector<8x32xf32>
    %76 = arith.addf %72, %75 : vector<8x32xf32>
    %77 = arith.truncf %76 : vector<8x32xf32> to vector<8x32xbf16>
    %c0_41 = arith.constant 0 : index
    %c0_42 = arith.constant 0 : index
    %c0_43 = arith.constant 0 : index
    %78 = vector.load %arg4[%c0_41, %c0_42, %c0_43] : memref<1x1x8xf32, #tpu.memory_space<vmem>>, vector<1x1x8xf32>
    %79 = vector.shape_cast %78 : vector<1x1x8xf32> to vector<1x8xf32>
    %cst_44 = arith.constant 1.000000e+00 : f32
    %80 = vector.broadcast %cst_44 : f32 to vector<1x8xf32>
    %81 = arith.subf %79, %80 : vector<1x8xf32>
    %cst_45 = arith.constant 1.000000e+09 : f32
    %82 = vector.broadcast %cst_45 : f32 to vector<1x8xf32>
    %83 = arith.mulf %81, %82 : vector<1x8xf32>
    %84 = vector.shape_cast %83 : vector<1x8xf32> to vector<1x8xf32>
    %85 = vector.broadcast %84 : vector<1x8xf32> to vector<8x8xf32>
    %86 = tpu.iota {dimensions = array<i32: 0>} : vector<8x8xi32>
    %c8_i32 = arith.constant 8 : i32
    %87 = arith.muli %arg1, %c8_i32 : i32
    %88 = vector.broadcast %87 : i32 to vector<8x8xi32>
    %89 = arith.addi %86, %88 : vector<8x8xi32>
    %90 = tpu.iota {dimensions = array<i32: 1>} : vector<8x8xi32>
    %91 = arith.cmpi sle, %90, %89 : vector<8x8xi32>
    %cst_46 = arith.constant 0.000000e+00 : f32
    %cst_47 = arith.constant -1.000000e+09 : f32
    %92 = vector.broadcast %cst_46 : f32 to vector<8x8xf32>
    %93 = vector.broadcast %cst_47 : f32 to vector<8x8xf32>
    %94 = arith.select %91, %92, %93 : vector<8x8xi1>, vector<8x8xf32>
    %95 = arith.addf %85, %94 : vector<8x8xf32>
    %96 = vector.extract_strided_slice %61 {offsets = [0, 0], sizes = [8, 8], strides = [1, 1]} : vector<8x32xbf16> to vector<8x8xbf16>
    %97 = vector.extract_strided_slice %69 {offsets = [0, 0], sizes = [8, 8], strides = [1, 1]} : vector<8x32xbf16> to vector<8x8xbf16>
    %cst_48 = arith.constant dense<0.000000e+00> : vector<8x8xf32>
    %98 = tpu.matmul %96, %97, %cst_48 {dimension_numbers = #tpu.dot_dimension_numbers<[1], [1], [0], [0], [0, 0, 1, 0], [], []>} : vector<8x8xbf16>, vector<8x8xbf16>, vector<8x8xf32> -> vector<8x8xf32>
    %cst_49 = arith.constant 0.353553385 : f32
    %99 = vector.broadcast %cst_49 : f32 to vector<8x8xf32>
    %100 = arith.mulf %98, %99 : vector<8x8xf32>
    %101 = arith.addf %100, %95 : vector<8x8xf32>
    %cst_50 = arith.constant dense<0xFF800000> : vector<8xf32>
    %102 = vector.multi_reduction <maximumf>, %101, %cst_50 [1] : vector<8x8xf32> to vector<8xf32>
    %103 = vector.shape_cast %102 : vector<8xf32> to vector<8x1xf32>
    %104 = vector.broadcast %103 : vector<8x1xf32> to vector<8x8xf32>
    %105 = arith.subf %101, %104 : vector<8x8xf32>
    %106 = math.exp %105 : vector<8x8xf32>
    %cst_51 = arith.constant dense<0.000000e+00> : vector<8xf32>
    %107 = vector.multi_reduction <add>, %106, %cst_51 [1] : vector<8x8xf32> to vector<8xf32>
    %108 = vector.shape_cast %107 : vector<8xf32> to vector<8x1xf32>
    %109 = tpu.reciprocal %108 {approx = true} : vector<8x1xf32> -> vector<8x1xf32>
    %110 = vector.broadcast %109 : vector<8x1xf32> to vector<8x8xf32>
    %111 = arith.mulf %106, %110 : vector<8x8xf32>
    %112 = arith.truncf %111 : vector<8x8xf32> to vector<8x8xbf16>
    %113 = vector.extract_strided_slice %77 {offsets = [0, 0], sizes = [8, 8], strides = [1, 1]} : vector<8x32xbf16> to vector<8x8xbf16>
    %cst_52 = arith.constant dense<0.000000e+00> : vector<8x8xf32>
    %114 = tpu.matmul %112, %113, %cst_52 {dimension_numbers = #tpu.dot_dimension_numbers<[1], [0], [0], [1], [0, 0, 1, 1], [], []>} : vector<8x8xbf16>, vector<8x8xbf16>, vector<8x8xf32> -> vector<8x8xf32>
    %115 = vector.extract_strided_slice %61 {offsets = [0, 8], sizes = [8, 8], strides = [1, 1]} : vector<8x32xbf16> to vector<8x8xbf16>
    %116 = vector.extract_strided_slice %69 {offsets = [0, 8], sizes = [8, 8], strides = [1, 1]} : vector<8x32xbf16> to vector<8x8xbf16>
    %cst_53 = arith.constant dense<0.000000e+00> : vector<8x8xf32>
    %117 = tpu.matmul %115, %116, %cst_53 {dimension_numbers = #tpu.dot_dimension_numbers<[1], [1], [0], [0], [0, 0, 1, 0], [], []>} : vector<8x8xbf16>, vector<8x8xbf16>, vector<8x8xf32> -> vector<8x8xf32>
    %cst_54 = arith.constant 0.353553385 : f32
    %118 = vector.broadcast %cst_54 : f32 to vector<8x8xf32>
    %119 = arith.mulf %117, %118 : vector<8x8xf32>
    %120 = arith.addf %119, %95 : vector<8x8xf32>
    %cst_55 = arith.constant dense<0xFF800000> : vector<8xf32>
    %121 = vector.multi_reduction <maximumf>, %120, %cst_55 [1] : vector<8x8xf32> to vector<8xf32>
    %122 = vector.shape_cast %121 : vector<8xf32> to vector<8x1xf32>
    %123 = vector.broadcast %122 : vector<8x1xf32> to vector<8x8xf32>
    %124 = arith.subf %120, %123 : vector<8x8xf32>
    %125 = math.exp %124 : vector<8x8xf32>
    %cst_56 = arith.constant dense<0.000000e+00> : vector<8xf32>
    %126 = vector.multi_reduction <add>, %125, %cst_56 [1] : vector<8x8xf32> to vector<8xf32>
    %127 = vector.shape_cast %126 : vector<8xf32> to vector<8x1xf32>
    %128 = tpu.reciprocal %127 {approx = true} : vector<8x1xf32> -> vector<8x1xf32>
    %129 = vector.broadcast %128 : vector<8x1xf32> to vector<8x8xf32>
    %130 = arith.mulf %125, %129 : vector<8x8xf32>
    %131 = arith.truncf %130 : vector<8x8xf32> to vector<8x8xbf16>
    %132 = vector.extract_strided_slice %77 {offsets = [0, 8], sizes = [8, 8], strides = [1, 1]} : vector<8x32xbf16> to vector<8x8xbf16>
    %cst_57 = arith.constant dense<0.000000e+00> : vector<8x8xf32>
    %133 = tpu.matmul %131, %132, %cst_57 {dimension_numbers = #tpu.dot_dimension_numbers<[1], [0], [0], [1], [0, 0, 1, 1], [], []>} : vector<8x8xbf16>, vector<8x8xbf16>, vector<8x8xf32> -> vector<8x8xf32>
    %134 = vector.extract_strided_slice %61 {offsets = [0, 16], sizes = [8, 8], strides = [1, 1]} : vector<8x32xbf16> to vector<8x8xbf16>
    %135 = vector.extract_strided_slice %69 {offsets = [0, 16], sizes = [8, 8], strides = [1, 1]} : vector<8x32xbf16> to vector<8x8xbf16>
    %cst_58 = arith.constant dense<0.000000e+00> : vector<8x8xf32>
    %136 = tpu.matmul %134, %135, %cst_58 {dimension_numbers = #tpu.dot_dimension_numbers<[1], [1], [0], [0], [0, 0, 1, 0], [], []>} : vector<8x8xbf16>, vector<8x8xbf16>, vector<8x8xf32> -> vector<8x8xf32>
    %cst_59 = arith.constant 0.353553385 : f32
    %137 = vector.broadcast %cst_59 : f32 to vector<8x8xf32>
    %138 = arith.mulf %136, %137 : vector<8x8xf32>
    %139 = arith.addf %138, %95 : vector<8x8xf32>
    %cst_60 = arith.constant dense<0xFF800000> : vector<8xf32>
    %140 = vector.multi_reduction <maximumf>, %139, %cst_60 [1] : vector<8x8xf32> to vector<8xf32>
    %141 = vector.shape_cast %140 : vector<8xf32> to vector<8x1xf32>
    %142 = vector.broadcast %141 : vector<8x1xf32> to vector<8x8xf32>
    %143 = arith.subf %139, %142 : vector<8x8xf32>
    %144 = math.exp %143 : vector<8x8xf32>
    %cst_61 = arith.constant dense<0.000000e+00> : vector<8xf32>
    %145 = vector.multi_reduction <add>, %144, %cst_61 [1] : vector<8x8xf32> to vector<8xf32>
    %146 = vector.shape_cast %145 : vector<8xf32> to vector<8x1xf32>
    %147 = tpu.reciprocal %146 {approx = true} : vector<8x1xf32> -> vector<8x1xf32>
    %148 = vector.broadcast %147 : vector<8x1xf32> to vector<8x8xf32>
    %149 = arith.mulf %144, %148 : vector<8x8xf32>
    %150 = arith.truncf %149 : vector<8x8xf32> to vector<8x8xbf16>
    %151 = vector.extract_strided_slice %77 {offsets = [0, 16], sizes = [8, 8], strides = [1, 1]} : vector<8x32xbf16> to vector<8x8xbf16>
    %cst_62 = arith.constant dense<0.000000e+00> : vector<8x8xf32>
    %152 = tpu.matmul %150, %151, %cst_62 {dimension_numbers = #tpu.dot_dimension_numbers<[1], [0], [0], [1], [0, 0, 1, 1], [], []>} : vector<8x8xbf16>, vector<8x8xbf16>, vector<8x8xf32> -> vector<8x8xf32>
    %153 = vector.extract_strided_slice %61 {offsets = [0, 24], sizes = [8, 8], strides = [1, 1]} : vector<8x32xbf16> to vector<8x8xbf16>
    %154 = vector.extract_strided_slice %69 {offsets = [0, 24], sizes = [8, 8], strides = [1, 1]} : vector<8x32xbf16> to vector<8x8xbf16>
    %cst_63 = arith.constant dense<0.000000e+00> : vector<8x8xf32>
    %155 = tpu.matmul %153, %154, %cst_63 {dimension_numbers = #tpu.dot_dimension_numbers<[1], [1], [0], [0], [0, 0, 1, 0], [], []>} : vector<8x8xbf16>, vector<8x8xbf16>, vector<8x8xf32> -> vector<8x8xf32>
    %cst_64 = arith.constant 0.353553385 : f32
    %156 = vector.broadcast %cst_64 : f32 to vector<8x8xf32>
    %157 = arith.mulf %155, %156 : vector<8x8xf32>
    %158 = arith.addf %157, %95 : vector<8x8xf32>
    %cst_65 = arith.constant dense<0xFF800000> : vector<8xf32>
    %159 = vector.multi_reduction <maximumf>, %158, %cst_65 [1] : vector<8x8xf32> to vector<8xf32>
    %160 = vector.shape_cast %159 : vector<8xf32> to vector<8x1xf32>
    %161 = vector.broadcast %160 : vector<8x1xf32> to vector<8x8xf32>
    %162 = arith.subf %158, %161 : vector<8x8xf32>
    %163 = math.exp %162 : vector<8x8xf32>
    %cst_66 = arith.constant dense<0.000000e+00> : vector<8xf32>
    %164 = vector.multi_reduction <add>, %163, %cst_66 [1] : vector<8x8xf32> to vector<8xf32>
    %165 = vector.shape_cast %164 : vector<8xf32> to vector<8x1xf32>
    %166 = tpu.reciprocal %165 {approx = true} : vector<8x1xf32> -> vector<8x1xf32>
    %167 = vector.broadcast %166 : vector<8x1xf32> to vector<8x8xf32>
    %168 = arith.mulf %163, %167 : vector<8x8xf32>
    %169 = arith.truncf %168 : vector<8x8xf32> to vector<8x8xbf16>
    %170 = vector.extract_strided_slice %77 {offsets = [0, 24], sizes = [8, 8], strides = [1, 1]} : vector<8x32xbf16> to vector<8x8xbf16>
    %cst_67 = arith.constant dense<0.000000e+00> : vector<8x8xf32>
    %171 = tpu.matmul %169, %170, %cst_67 {dimension_numbers = #tpu.dot_dimension_numbers<[1], [0], [0], [1], [0, 0, 1, 1], [], []>} : vector<8x8xbf16>, vector<8x8xbf16>, vector<8x8xf32> -> vector<8x8xf32>
    %172 = tpu.concatenate %114, %133, %152, %171 in 1 : vector<8x8xf32>, vector<8x8xf32>, vector<8x8xf32>, vector<8x8xf32> -> vector<8x32xf32>
    %c0_68 = arith.constant 0 : index
    %c0_69 = arith.constant 0 : index
    %173 = vector.load %arg7[%c0_68, %c0_69] : memref<32x32xbf16, #tpu.memory_space<vmem>>, vector<32x32xbf16>
    %174 = arith.truncf %172 : vector<8x32xf32> to vector<8x32xbf16>
    %cst_70 = arith.constant dense<0.000000e+00> : vector<8x32xf32>
    %175 = tpu.matmul %174, %173, %cst_70 {dimension_numbers = #tpu.dot_dimension_numbers<[1], [0], [0], [1], [0, 0, 1, 1], [], []>} : vector<8x32xbf16>, vector<32x32xbf16>, vector<8x32xf32> -> vector<8x32xf32>
    %c0_71 = arith.constant 0 : index
    %c0_72 = arith.constant 0 : index
    %176 = vector.load %arg8[%c0_71, %c0_72] : memref<1x32xf32, #tpu.memory_space<vmem>>, vector<1x32xf32>
    %177 = vector.broadcast %176 : vector<1x32xf32> to vector<8x32xf32>
    %178 = arith.addf %175, %177 : vector<8x32xf32>
    %179 = arith.addf %25, %178 : vector<8x32xf32>
    %c0_73 = arith.constant 0 : index
    %c0_74 = arith.constant 0 : index
    %180 = vector.load %arg11[%c0_73, %c0_74] : memref<1x32xf32, #tpu.memory_space<vmem>>, vector<1x32xf32>
    %c0_75 = arith.constant 0 : index
    %c0_76 = arith.constant 0 : index
    %181 = vector.load %arg12[%c0_75, %c0_76] : memref<1x32xf32, #tpu.memory_space<vmem>>, vector<1x32xf32>
    %cst_77 = arith.constant dense<0.000000e+00> : vector<8xf32>
    %182 = vector.multi_reduction <add>, %179, %cst_77 [1] : vector<8x32xf32> to vector<8xf32>
    %183 = vector.shape_cast %182 : vector<8xf32> to vector<8x1xf32>
    %cst_78 = arith.constant 3.200000e+01 : f32
    %184 = vector.broadcast %cst_78 : f32 to vector<8x1xf32>
    %185 = arith.divf %183, %184 : vector<8x1xf32>
    %186 = vector.broadcast %185 : vector<8x1xf32> to vector<8x32xf32>
    %187 = arith.subf %179, %186 : vector<8x32xf32>
    %188 = arith.mulf %187, %187 : vector<8x32xf32>
    %cst_79 = arith.constant dense<0.000000e+00> : vector<8xf32>
    %189 = vector.multi_reduction <add>, %188, %cst_79 [1] : vector<8x32xf32> to vector<8xf32>
    %190 = vector.shape_cast %189 : vector<8xf32> to vector<8x1xf32>
    %cst_80 = arith.constant 3.200000e+01 : f32
    %191 = vector.broadcast %cst_80 : f32 to vector<8x1xf32>
    %192 = arith.divf %190, %191 : vector<8x1xf32>
    %193 = vector.broadcast %185 : vector<8x1xf32> to vector<8x32xf32>
    %194 = arith.subf %179, %193 : vector<8x32xf32>
    %cst_81 = arith.constant 9.99999996E-13 : f32
    %195 = vector.broadcast %cst_81 : f32 to vector<8x1xf32>
    %196 = arith.addf %192, %195 : vector<8x1xf32>
    %197 = math.rsqrt %196 : vector<8x1xf32>
    %198 = vector.broadcast %197 : vector<8x1xf32> to vector<8x32xf32>
    %199 = arith.mulf %194, %198 : vector<8x32xf32>
    %200 = vector.broadcast %180 : vector<1x32xf32> to vector<8x32xf32>
    %201 = arith.mulf %199, %200 : vector<8x32xf32>
    %202 = vector.broadcast %181 : vector<1x32xf32> to vector<8x32xf32>
    %203 = arith.addf %201, %202 : vector<8x32xf32>
    %c0_82 = arith.constant 0 : index
    %c0_83 = arith.constant 0 : index
    %c0_84 = arith.constant 0 : index
    %204 = vector.load %arg13[%c0_82, %c0_83, %c0_84] : memref<1x8x32xf32, #tpu.memory_space<vmem>>, vector<1x8x32xf32>
    %205 = vector.shape_cast %204 : vector<1x8x32xf32> to vector<8x32xf32>
    %206 = vector.shape_cast %203 : vector<8x32xf32> to vector<1x8x32xf32>
    tpu.vector_store %arg13[%c0_82, %c0_83, %c0_84], %206 {strides = array<i32>} : memref<1x8x32xf32, #tpu.memory_space<vmem>>, vector<1x8x32xf32>,
    return
  }
  func.func @transform_0(%arg0: i32, %arg1: i32) -> (i32, i32, i32) {
    %c0_i32 = arith.constant 0 : i32
    %c0_i32_0 = arith.constant 0 : i32
    return %arg0, %arg1, %c0_i32 : i32, i32, i32
  }
  func.func @transform_1(%arg0: i32, %arg1: i32) -> (i32, i32, i32) {
    %c0_i32 = arith.constant 0 : i32
    %c0_i32_0 = arith.constant 0 : i32
    %c0_i32_1 = arith.constant 0 : i32
    return %arg0, %c0_i32, %c0_i32_0 : i32, i32, i32
  }
  func.func @transform_2(%arg0: i32, %arg1: i32) -> (i32, i32, i32) {
    %c0_i32 = arith.constant 0 : i32
    %c0_i32_0 = arith.constant 0 : i32
    %c0_i32_1 = arith.constant 0 : i32
    return %arg0, %c0_i32, %c0_i32_0 : i32, i32, i32
  }
  func.func @transform_3(%arg0: i32, %arg1: i32) -> (i32, i32, i32) {
    %c0_i32 = arith.constant 0 : i32
    %c0_i32_0 = arith.constant 0 : i32
    %c0_i32_1 = arith.constant 0 : i32
    %c0_i32_2 = arith.constant 0 : i32
    return %c0_i32, %c0_i32_0, %c0_i32_1 : i32, i32, i32
  }
  func.func @transform_4(%arg0: i32, %arg1: i32) -> (i32, i32, i32) {
    %c0_i32 = arith.constant 0 : i32
    %c0_i32_0 = arith.constant 0 : i32
    %c0_i32_1 = arith.constant 0 : i32
    %c0_i32_2 = arith.constant 0 : i32
    return %c0_i32, %c0_i32_0, %c0_i32_1 : i32, i32, i32
  }
  func.func @transform_5(%arg0: i32, %arg1: i32) -> (i32, i32) {
    %c0_i32 = arith.constant 0 : i32
    %c0_i32_0 = arith.constant 0 : i32
    %c0_i32_1 = arith.constant 0 : i32
    return %c0_i32, %c0_i32_0 : i32, i32
  }
  func.func @transform_6(%arg0: i32, %arg1: i32) -> (i32, i32) {
    %c0_i32 = arith.constant 0 : i32
    %c0_i32_0 = arith.constant 0 : i32
    %c0_i32_1 = arith.constant 0 : i32
    return %c0_i32, %c0_i32_0 : i32, i32
  }
  func.func @transform_7(%arg0: i32, %arg1: i32) -> (i32, i32) {
    %c0_i32 = arith.constant 0 : i32
    %c0_i32_0 = arith.constant 0 : i32
    %c0_i32_1 = arith.constant 0 : i32
    return %c0_i32, %c0_i32_0 : i32, i32
  }
  func.func @transform_8(%arg0: i32, %arg1: i32) -> (i32, i32) {
    %c0_i32 = arith.constant 0 : i32
    %c0_i32_0 = arith.constant 0 : i32
    %c0_i32_1 = arith.constant 0 : i32
    return %c0_i32, %c0_i32_0 : i32, i32
  }
  func.func @transform_9(%arg0: i32, %arg1: i32) -> (i32, i32) {
    %c0_i32 = arith.constant 0 : i32
    %c0_i32_0 = arith.constant 0 : i32
    %c0_i32_1 = arith.constant 0 : i32
    return %c0_i32, %c0_i32_0 : i32, i32
  }
  func.func @transform_10(%arg0: i32, %arg1: i32) -> (i32, i32) {
    %c0_i32 = arith.constant 0 : i32
    %c0_i32_0 = arith.constant 0 : i32
    %c0_i32_1 = arith.constant 0 : i32
    return %c0_i32, %c0_i32_0 : i32, i32
  }
  func.func @transform_11(%arg0: i32, %arg1: i32) -> (i32, i32, i32) {
    %c0_i32 = arith.constant 0 : i32
    %c0_i32_0 = arith.constant 0 : i32
    return %arg0, %arg1, %c0_i32 : i32, i32, i32
  }
}

module attributes {stable_mosaic.version = 11 : i64} {
  func.func @_lmhead_ce_kernel(%arg0: i32, %arg1: i32, %arg2: memref<16x32xf32, #tpu.memory_space<vmem>>, %arg3: memref<16x1xi32, #tpu.memory_space<vmem>>, %arg4: memref<32x64xbf16, #tpu.memory_space<vmem>>, %arg5: memref<1x64xf32, #tpu.memory_space<vmem>>, %arg6: memref<16x1xf32, #tpu.memory_space<vmem>>, %arg7: memref<16x1xf32, #tpu.memory_space<vmem>>, %arg8: memref<16x64xf32, #tpu.memory_space<vmem>>, %arg9: memref<16x1xf32, #tpu.memory_space<vmem>>, %arg10: memref<16x1xf32, #tpu.memory_space<vmem>>, %arg11: memref<16x1xf32, #tpu.memory_space<vmem>>) attributes {dimension_semantics = [#tpu.dimension_semantics<parallel>, #tpu.dimension_semantics<arbitrary>], iteration_bounds = array<i64: 1, 1>, scalar_prefetch = 0 : i64, scratch_operands = 3 : i64, tpu.core_type = #tpu.core_type<tc>, window_params = [{transform_indices = @transform_0, window_bounds = array<i64: 16, 32>}, {transform_indices = @transform_1, window_bounds = array<i64: 16, 1>}, {transform_indices = @transform_2, window_bounds = array<i64: 32, 64>}, {transform_indices = @transform_3, window_bounds = array<i64: 1, 64>}, {transform_indices = @transform_4, window_bounds = array<i64: 16, 1>}, {transform_indices = @transform_5, window_bounds = array<i64: 16, 1>}, {transform_indices = @transform_6, window_bounds = array<i64: 16, 64>}]} {
    %c0_i32 = arith.constant 0 : i32
    %0 = arith.cmpi eq, %arg1, %c0_i32 : i32
    %1 = arith.extui %0 : i1 to i32
    %c0_i32_0 = arith.constant 0 : i32
    %2 = arith.cmpi ne, %1, %c0_i32_0 : i32
    scf.if %2 {
      %cst_30 = arith.constant 0xFF800000 : f32
      %45 = vector.broadcast %cst_30 : f32 to vector<16x1xf32>
      %c0_31 = arith.constant 0 : index
      %c0_32 = arith.constant 0 : index
      %46 = vector.load %arg9[%c0_31, %c0_32] : memref<16x1xf32, #tpu.memory_space<vmem>>, vector<16x1xf32>
      tpu.vector_store %arg9[%c0_31, %c0_32], %45 {strides = array<i32>} : memref<16x1xf32, #tpu.memory_space<vmem>>, vector<16x1xf32>,
      %cst_33 = arith.constant 0.000000e+00 : f32
      %47 = vector.broadcast %cst_33 : f32 to vector<16x1xf32>
      %c0_34 = arith.constant 0 : index
      %c0_35 = arith.constant 0 : index
      %48 = vector.load %arg10[%c0_34, %c0_35] : memref<16x1xf32, #tpu.memory_space<vmem>>, vector<16x1xf32>
      tpu.vector_store %arg10[%c0_34, %c0_35], %47 {strides = array<i32>} : memref<16x1xf32, #tpu.memory_space<vmem>>, vector<16x1xf32>,
      %cst_36 = arith.constant 0.000000e+00 : f32
      %49 = vector.broadcast %cst_36 : f32 to vector<16x1xf32>
      %c0_37 = arith.constant 0 : index
      %c0_38 = arith.constant 0 : index
      %50 = vector.load %arg11[%c0_37, %c0_38] : memref<16x1xf32, #tpu.memory_space<vmem>>, vector<16x1xf32>
      tpu.vector_store %arg11[%c0_37, %c0_38], %49 {strides = array<i32>} : memref<16x1xf32, #tpu.memory_space<vmem>>, vector<16x1xf32>,
    } else {
    }
    %c0 = arith.constant 0 : index
    %c0_1 = arith.constant 0 : index
    %3 = vector.load %arg2[%c0, %c0_1] : memref<16x32xf32, #tpu.memory_space<vmem>>, vector<16x32xf32>
    %c0_2 = arith.constant 0 : index
    %c0_3 = arith.constant 0 : index
    %4 = vector.load %arg4[%c0_2, %c0_3] : memref<32x64xbf16, #tpu.memory_space<vmem>>, vector<32x64xbf16>
    %5 = arith.truncf %3 : vector<16x32xf32> to vector<16x32xbf16>
    %cst = arith.constant dense<0.000000e+00> : vector<16x64xf32>
    %6 = tpu.matmul %5, %4, %cst {dimension_numbers = #tpu.dot_dimension_numbers<[1], [0], [0], [1], [0, 0, 1, 1], [], []>} : vector<16x32xbf16>, vector<32x64xbf16>, vector<16x64xf32> -> vector<16x64xf32>
    %c0_4 = arith.constant 0 : index
    %c0_5 = arith.constant 0 : index
    %7 = vector.load %arg5[%c0_4, %c0_5] : memref<1x64xf32, #tpu.memory_space<vmem>>, vector<1x64xf32>
    %8 = vector.broadcast %7 : vector<1x64xf32> to vector<16x64xf32>
    %9 = arith.addf %6, %8 : vector<16x64xf32>
    %10 = tpu.iota {dimensions = array<i32: 1>} : vector<16x64xi32>
    %c64_i32 = arith.constant 64 : i32
    %11 = arith.muli %arg1, %c64_i32 : i32
    %12 = vector.broadcast %11 : i32 to vector<16x64xi32>
    %13 = arith.addi %10, %12 : vector<16x64xi32>
    %c0_6 = arith.constant 0 : index
    %c0_7 = arith.constant 0 : index
    %14 = vector.load %arg8[%c0_6, %c0_7] : memref<16x64xf32, #tpu.memory_space<vmem>>, vector<16x64xf32>
    tpu.vector_store %arg8[%c0_6, %c0_7], %9 {strides = array<i32>} : memref<16x64xf32, #tpu.memory_space<vmem>>, vector<16x64xf32>,
    %c0_8 = arith.constant 0 : index
    %c0_9 = arith.constant 0 : index
    %15 = vector.load %arg9[%c0_8, %c0_9] : memref<16x1xf32, #tpu.memory_space<vmem>>, vector<16x1xf32>
    %cst_10 = arith.constant dense<0xFF800000> : vector<16xf32>
    %16 = vector.multi_reduction <maximumf>, %9, %cst_10 [1] : vector<16x64xf32> to vector<16xf32>
    %17 = vector.shape_cast %16 : vector<16xf32> to vector<16x1xf32>
    %18 = arith.maximumf %15, %17 : vector<16x1xf32>
    %c0_11 = arith.constant 0 : index
    %c0_12 = arith.constant 0 : index
    %19 = vector.load %arg10[%c0_11, %c0_12] : memref<16x1xf32, #tpu.memory_space<vmem>>, vector<16x1xf32>
    %c0_13 = arith.constant 0 : index
    %c0_14 = arith.constant 0 : index
    %20 = vector.load %arg9[%c0_13, %c0_14] : memref<16x1xf32, #tpu.memory_space<vmem>>, vector<16x1xf32>
    %21 = arith.subf %20, %18 : vector<16x1xf32>
    %22 = math.exp %21 : vector<16x1xf32>
    %23 = arith.mulf %19, %22 : vector<16x1xf32>
    %24 = vector.broadcast %18 : vector<16x1xf32> to vector<16x64xf32>
    %25 = arith.subf %9, %24 : vector<16x64xf32>
    %26 = math.exp %25 : vector<16x64xf32>
    %cst_15 = arith.constant dense<0.000000e+00> : vector<16xf32>
    %27 = vector.multi_reduction <add>, %26, %cst_15 [1] : vector<16x64xf32> to vector<16xf32>
    %28 = vector.shape_cast %27 : vector<16xf32> to vector<16x1xf32>
    %29 = arith.addf %23, %28 : vector<16x1xf32>
    %c0_16 = arith.constant 0 : index
    %c0_17 = arith.constant 0 : index
    %30 = vector.load %arg10[%c0_16, %c0_17] : memref<16x1xf32, #tpu.memory_space<vmem>>, vector<16x1xf32>
    tpu.vector_store %arg10[%c0_16, %c0_17], %29 {strides = array<i32>} : memref<16x1xf32, #tpu.memory_space<vmem>>, vector<16x1xf32>,
    %c0_18 = arith.constant 0 : index
    %c0_19 = arith.constant 0 : index
    %31 = vector.load %arg9[%c0_18, %c0_19] : memref<16x1xf32, #tpu.memory_space<vmem>>, vector<16x1xf32>
    tpu.vector_store %arg9[%c0_18, %c0_19], %18 {strides = array<i32>} : memref<16x1xf32, #tpu.memory_space<vmem>>, vector<16x1xf32>,
    %c0_20 = arith.constant 0 : index
    %c0_21 = arith.constant 0 : index
    %32 = vector.load %arg3[%c0_20, %c0_21] : memref<16x1xi32, #tpu.memory_space<vmem>>, vector<16x1xi32>
    %33 = vector.broadcast %32 : vector<16x1xi32> to vector<16x64xi32>
    %34 = arith.cmpi eq, %13, %33 : vector<16x64xi32>
    %c0_22 = arith.constant 0 : index
    %c0_23 = arith.constant 0 : index
    %35 = vector.load %arg11[%c0_22, %c0_23] : memref<16x1xf32, #tpu.memory_space<vmem>>, vector<16x1xf32>
    %cst_24 = arith.constant 0.000000e+00 : f32
    %36 = vector.broadcast %cst_24 : f32 to vector<16x64xf32>
    %37 = arith.select %34, %9, %36 : vector<16x64xi1>, vector<16x64xf32>
    %cst_25 = arith.constant dense<0.000000e+00> : vector<16xf32>
    %38 = vector.multi_reduction <add>, %37, %cst_25 [1] : vector<16x64xf32> to vector<16xf32>
    %39 = vector.shape_cast %38 : vector<16xf32> to vector<16x1xf32>
    %40 = arith.addf %35, %39 : vector<16x1xf32>
    %c0_26 = arith.constant 0 : index
    %c0_27 = arith.constant 0 : index
    %41 = vector.load %arg11[%c0_26, %c0_27] : memref<16x1xf32, #tpu.memory_space<vmem>>, vector<16x1xf32>
    tpu.vector_store %arg11[%c0_26, %c0_27], %40 {strides = array<i32>} : memref<16x1xf32, #tpu.memory_space<vmem>>, vector<16x1xf32>,
    %c0_i32_28 = arith.constant 0 : i32
    %42 = arith.cmpi eq, %arg1, %c0_i32_28 : i32
    %43 = arith.extui %42 : i1 to i32
    %c0_i32_29 = arith.constant 0 : i32
    %44 = arith.cmpi ne, %43, %c0_i32_29 : i32
    scf.if %44 {
      %c0_30 = arith.constant 0 : index
      %c0_31 = arith.constant 0 : index
      %45 = vector.load %arg9[%c0_30, %c0_31] : memref<16x1xf32, #tpu.memory_space<vmem>>, vector<16x1xf32>
      %c0_32 = arith.constant 0 : index
      %c0_33 = arith.constant 0 : index
      %46 = vector.load %arg10[%c0_32, %c0_33] : memref<16x1xf32, #tpu.memory_space<vmem>>, vector<16x1xf32>
      %47 = math.log %46 : vector<16x1xf32>
      %48 = arith.addf %45, %47 : vector<16x1xf32>
      %c0_34 = arith.constant 0 : index
      %c0_35 = arith.constant 0 : index
      %49 = vector.load %arg7[%c0_34, %c0_35] : memref<16x1xf32, #tpu.memory_space<vmem>>, vector<16x1xf32>
      tpu.vector_store %arg7[%c0_34, %c0_35], %48 {strides = array<i32>} : memref<16x1xf32, #tpu.memory_space<vmem>>, vector<16x1xf32>,
      %c0_36 = arith.constant 0 : index
      %c0_37 = arith.constant 0 : index
      %50 = vector.load %arg11[%c0_36, %c0_37] : memref<16x1xf32, #tpu.memory_space<vmem>>, vector<16x1xf32>
      %51 = arith.subf %48, %50 : vector<16x1xf32>
      %c0_38 = arith.constant 0 : index
      %c0_39 = arith.constant 0 : index
      %52 = vector.load %arg6[%c0_38, %c0_39] : memref<16x1xf32, #tpu.memory_space<vmem>>, vector<16x1xf32>
      tpu.vector_store %arg6[%c0_38, %c0_39], %51 {strides = array<i32>} : memref<16x1xf32, #tpu.memory_space<vmem>>, vector<16x1xf32>,
    } else {
    }
    return
  }
  func.func @transform_0(%arg0: i32, %arg1: i32) -> (i32, i32) {
    %c0_i32 = arith.constant 0 : i32
    %c0_i32_0 = arith.constant 0 : i32
    return %arg0, %c0_i32 : i32, i32
  }
  func.func @transform_1(%arg0: i32, %arg1: i32) -> (i32, i32) {
    %c0_i32 = arith.constant 0 : i32
    %c0_i32_0 = arith.constant 0 : i32
    return %arg0, %c0_i32 : i32, i32
  }
  func.func @transform_2(%arg0: i32, %arg1: i32) -> (i32, i32) {
    %c0_i32 = arith.constant 0 : i32
    %c0_i32_0 = arith.constant 0 : i32
    return %c0_i32, %arg1 : i32, i32
  }
  func.func @transform_3(%arg0: i32, %arg1: i32) -> (i32, i32) {
    %c0_i32 = arith.constant 0 : i32
    %c0_i32_0 = arith.constant 0 : i32
    return %c0_i32, %arg1 : i32, i32
  }
  func.func @transform_4(%arg0: i32, %arg1: i32) -> (i32, i32) {
    %c0_i32 = arith.constant 0 : i32
    %c0_i32_0 = arith.constant 0 : i32
    return %arg0, %c0_i32 : i32, i32
  }
  func.func @transform_5(%arg0: i32, %arg1: i32) -> (i32, i32) {
    %c0_i32 = arith.constant 0 : i32
    %c0_i32_0 = arith.constant 0 : i32
    return %arg0, %c0_i32 : i32, i32
  }
  func.func @transform_6(%arg0: i32, %arg1: i32) -> (i32, i32) {
    %c0_i32 = arith.constant 0 : i32
    return %arg0, %arg1 : i32, i32
  }
}

</mosaic_0001>

<bundles_post_ra>
// kernel: forward.7
= control target key start
LH: loop header
LB: loop body
LE: loop exit
PB: predicated region body
PF: predicated region fallthrough
CT: control target
= control target key end

     0   :  { %v310_v0 = vmov 0.0   ;;  %vm311_vm0 = vmmov 0   ;;  %vm53_vm1 = vcmask 261120   ;;  %vm156_vm2 = vcmask 523264   ;;  %s401_s1 = inlined_call_operand.vmem [shape: bf16[32,64], index: 1, kind: input, shape index: {}]   ;;  %s402_s0 = inlined_call_operand.vmem [shape: f32[16,32], index: 0, kind: input, shape index: {}]   ;;  %s403_s3 = inlined_call_operand.vmem [shape: bf16[64,32], index: 3, kind: input, shape index: {}]   ;;  %s404_s2 = inlined_call_operand.vmem [shape: f32[1,64], index: 2, kind: input, shape index: {}]   ;;  %s405_s4 = inlined_call_operand.vmem [shape: f32[1,32], index: 4, kind: input, shape index: {}, may-alias: {4,6}]   ;;  %s406_s5 = inlined_call_operand.vmem [shape: f32[1,32], index: 5, kind: input, shape index: {}]   ;;  %s407_s6 = inlined_call_operand.vmem [shape: f32[1,32], index: 6, kind: input, shape index: {}, may-alias: {4,6}]   ;;  %s408_s7 = inlined_call_operand.vmem [shape: f32[16,32], index: 7, kind: output, shape index: {}]  }
   0x1   :  { %274 = vmatprep.subr.bf16.mxu0 %v310_v0  ;;  %v296_v1 = vld [vmem:[%s401_s1] sm:$0xff]   ;;  %278 = vmatprep.mubr.msk.bf16.mxu0 %vm311_vm0, %v310_v0  ;;  %v297_v2 = vld [vmem:[%s401_s1 + $0x8] sm:$0xff]   ;;  %v300_v8 = vld [vmem:[%s403_s3 + $0x10] sm:$0xff]  }
   0x2   :  { %282 = vmatprep.subr.bf16.mxu1 %v310_v0  ;;  %290 = vmatprep.mubr.msk.bf16.mxu1 %vm311_vm0, %v310_v0  ;;  %v27_v3 = vld [vmem:[%s402_s0] sm:$0xff]  ;;  %v28_v4 = vld [vmem:[%s402_s0 + $0x8] sm:$0xff]  ;;  %v301_v9 = vld [vmem:[%s403_s3 + $0x18] sm:$0xff]  }
   0x3   :  { %275 = vmatpush3.bf16.msra.mxu0 %v296_v1  ;;  %v33_v5 = vpack.c.bf16 %v28_v4, %v27_v3  ;;  %v298_v6 = vld [vmem:[%s403_s3] sm:$0xff]   ;;  %v299_v7 = vld [vmem:[%s403_s3 + $0x8] sm:$0xff]  }
   0x4   :  { %276 = vmatprep.subr.bf16.mxu0 %v310_v0  ;;  %283 = vmatpush3.bf16.msra.mxu1 %v298_v6  ;;  %v254_v10 = vld [vmem:[%s404_s2] ss:$0 sm:$0xff] }
   0x5   :  { %284 = vmatprep.subr.bf16.mxu1 %v310_v0  ;;  %v258_v36 = vld [vmem:[%s405_s4] ss:$0 sm:$0xff] }
   0x7   :  { %277 = vmatpush3.bf16.msra.mxu0 %v297_v2  ;;  %v265_v2 = vld [vmem:[%s407_s6] ss:$0 sm:$0xff] }
   0x8   :  { %285 = vmatpush3.bf16.msra.mxu1 %v299_v7 }
   0x9   :  { %286 = vmatprep.subr.bf16.mxu1 %v310_v0 }
   0xa   :  { %279 = vmatmul.mubr.msk.bf16.vlgmr.msra.gmra.mrb[0].mxu0 %vm53_vm1, %v33_v5 }
   0xc   :  { %287 = vmatpush3.bf16.msra.mxu1 %v300_v8 }
   0xd   :  { %288 = vmatprep.subr.bf16.mxu1 %v310_v0  ;;  %v264_v0 = vld [vmem:[%s406_s5] ss:$0 sm:$0xff] }
  0x10   :  { %289 = vmatpush3.bf16.msra.mxu1 %v301_v9 }
  0xdd   :  { %v91_v11 = vpop.f32.mrb[0].mxu0 }
  0xde   :  { %v92_v12 = vadd.f32 %v254_v10, %v91_v11  ;;  %v280_v13 = vpop.f32.mrb[1].mxu0 }
  0xdf   :  { %v94_v14 = vpop.f32.mrb[2].mxu0 }
  0xe0   :  { %v98_v15 = vmul.f32 %v92_v12, %v92_v12  ;;  %v95_v16 = vadd.f32 %v254_v10, %v94_v14  ;;  %v281_v17 = vpop.f32.mrb[3].mxu0 }
  0xe2   :  { %v100_v18 = vmul.f32 %v98_v15, %v92_v12  ;;  %v99_v19 = vmul.f32 %v95_v16, %v95_v16 }
  0xe4   :  { %v102_v20 = vmul.f32 0.044715, %v100_v18  ;;  %v101_v21 = vmul.f32 %v99_v19, %v95_v16 }
  0xe6   :  { %v104_v22 = vadd.f32 %v102_v20, %v92_v12  ;;  %v103_v23 = vmul.f32 0.044715, %v101_v21 }
  0xe8   :  { %v106_v24 = vmul.f32 0.7978846, %v104_v22  ;;  %v105_v25 = vadd.f32 %v103_v23, %v95_v16 }
  0xea   :  { %302 = vtanh.f32 %v106_v24  ;;  %v107_v26 = vmul.f32 0.7978846, %v105_v25 }
  0xec   :  { %304 = vtanh.f32 %v107_v26 }
  0xf4   :  { %v303_v27 = vpop.eup %302 }
  0xf5   :  { %v110_v28 = vadd.f32 1.0, %v303_v27 }
  0xf6   :  { %v305_v29 = vpop.eup %304 }
  0xf7   :  { %v112_v30 = vmul.f32 0.5, %v110_v28  ;;  %v111_v31 = vadd.f32 1.0, %v305_v29 }
  0xf9   :  { %v113_v32 = vmul.f32 0.5, %v111_v31  ;;  %v114_v33 = vmul.f32 %v112_v30, %v92_v12 }
  0xfb   :  { %v115_v34 = vmul.f32 %v113_v32, %v95_v16 }
  0xfd   :  { %v124_v35 = vpack.c.bf16 %v115_v34, %v114_v33 }
  0xff   :  { %291 = vmatmul.mubr.msk.bf16.vlgmr.msra.gmra.mrb[0].mxu1 %vm156_vm2, %v124_v35 }
 0x1d2   :  { %v194_v37 = vpop.f32.mrb[0].mxu1 }
 0x1d3   :  { %v195_v38 = vadd.f32 %v258_v36, %v194_v37  ;;  %v292_v39 = vpop.f32.mrb[1].mxu1 }
 0x1d4   :  { %v197_v40 = vpop.f32.mrb[2].mxu1 }
 0x1d5   :  { %v198_v41 = vadd.f32 %v258_v36, %v197_v40  ;;  %v293_v42 = vpop.f32.mrb[3].mxu1  ;;  %v201_v43 = vadd.f32 %v195_v38, %v27_v3 }
 0x1d7   :  { %v205_v44 = vsel %vm53_vm1, %v201_v43, 0.0  ;;  %v202_v45 = vadd.f32 %v198_v41, %v28_v4 }
 0x1d8   :  { %206 = vadd.xlane.f32.xlu0 %v205_v44 }
 0x1d9   :  { %v208_v46 = vsel %vm53_vm1, %v202_v45, 0.0 }
 0x1dc   :  { %209 = vadd.xlane.f32.xlu0 %v208_v46 }
 0x265   :  { %v207_v47 = vpop.xlane.xlu0 %206 }
 0x266   :  { %v212_v48 = vmul.f32 0.03125, %v207_v47 }
 0x268   :  { %v214_v49 = vsub.f32 %v201_v43, %v212_v48 }
 0x269   :  { %v210_v50 = vpop.xlane.xlu0 %209 }
 0x26a   :  { %v213_v51 = vmul.f32 0.03125, %v210_v50  ;;  %v216_v52 = vmul.f32 %v214_v49, %v214_v49 }
 0x26c   :  { %v215_v53 = vsub.f32 %v202_v45, %v213_v51  ;;  %v218_v54 = vsel %vm53_vm1, %v216_v52, 0.0 }
 0x26d   :  { %219 = vadd.xlane.f32.xlu1 %v218_v54 }
 0x26e   :  { %v217_v55 = vmul.f32 %v215_v53, %v215_v53 }
 0x270   :  { %v221_v56 = vsel %vm53_vm1, %v217_v55, 0.0 }
 0x271   :  { %222 = vadd.xlane.f32.xlu1 %v221_v56 }
 0x2fa   :  { %v220_v57 = vpop.xlane.xlu1 %219 }
 0x2fb   :  { %v224_v58 = vmul.f32 0.03125, %v220_v57 }
 0x2fd   :  { %v226_v59 = vadd.f32 1e-12, %v224_v58 }
 0x2fe   :  { %v223_v60 = vpop.xlane.xlu1 %222 }
 0x2ff   :  { %306 = vrsqrt.f32 %v226_v59  ;;  %v225_v61 = vmul.f32 0.03125, %v223_v60 }
 0x301   :  { %v227_v62 = vadd.f32 1e-12, %v225_v61 }
 0x303   :  { %308 = vrsqrt.f32 %v227_v62 }
 0x309   :  { %v307_v63 = vpop.eup %306 }
 0x30a   :  { %v230_v1 = vmul.f32 %v307_v63, %v214_v49 }
 0x30c   :  { %v238_v3 = vmul.f32 %v264_v0, %v230_v1 }
 0x30d   :  { %v309_v4 = vpop.eup %308 }
 0x30e   :  { %v246_v5 = vadd.f32 %v265_v2, %v238_v3  ;;  %v231_v6 = vmul.f32 %v309_v4, %v215_v53 }
 0x310   :  { %248 = vst.msk [vmem:[%s408_s7] sm:$0xff] %vm53_vm1, %v246_v5  ;;  %v239_v7 = vmul.f32 %v264_v0, %v231_v6 }
 0x312   :  { %v247_v8 = vadd.f32 %v265_v2, %v239_v7 }
 0x314   :  { %249 = vst.msk [vmem:[%s408_s7 + $0x8] sm:$0xff] %vm53_vm1, %v247_v8 }

// kernel: forward.6
= control target key start
LH: loop header
LB: loop body
LE: loop exit
PB: predicated region body
PF: predicated region fallthrough
CT: control target
= control target key end

     0   :  { %s1674_s17 = smov 0   ;;  %s1676_s18 = smov 0   ;;  %s1866_s0 = inlined_call_operand.vmem [shape: f32[2,8,32], index: 0, kind: input, shape index: {}, may-alias: {0,1}]   ;;  %s1867_s1 = inlined_call_operand.vmem [shape: f32[2,8,32], index: 1, kind: input, shape index: {}, may-alias: {0,1}]   ;;  %s1868_s2 = inlined_call_operand.vmem [shape: f32[2,1,8], index: 2, kind: input, shape index: {}]   ;;  %s1869_s3 = inlined_call_operand.vmem [shape: bf16[3,32,32], index: 3, kind: input, shape index: {}]   ;;  %s1870_s4 = inlined_call_operand.vmem [shape: f32[3,1,32], index: 4, kind: input, shape index: {}]   ;;  %s1871_s5 = inlined_call_operand.vmem [shape: bf16[32,32], index: 5, kind: input, shape index: {}]   ;;  %s1872_s6 = inlined_call_operand.vmem [shape: f32[1,32], index: 6, kind: input, shape index: {}, may-alias: {6,8,10}]   ;;  %s1873_s7 = inlined_call_operand.vmem [shape: f32[1,32], index: 7, kind: input, shape index: {}, may-alias: {7,9}]   ;;  %s1874_s8 = inlined_call_operand.vmem [shape: f32[1,32], index: 8, kind: input, shape index: {}, may-alias: {6,8,10}]   ;;  %s1875_s9 = inlined_call_operand.vmem [shape: f32[1,32], index: 9, kind: input, shape index: {}, may-alias: {7,9}]   ;;  %s1876_s10 = inlined_call_operand.vmem [shape: f32[1,32], index: 10, kind: input, shape index: {}, may-alias: {6,8,10}]   ;;  %s1877_s11 = inlined_call_operand.vmem [shape: f32[2,8,32], index: 11, kind: output, shape index: {}]  }
   0x1   :  { %s1678_s19 = smov 0  }
   0x2 LB: > { %s33_s20 = sadd.s32 1, %s1600_s18  ;;  %p1367_p0 = scmp.ge.s32.totalorder %s1604_s19, 1  ;;  %s1604_s19 = sphi %s1678_s19, %s21_s19   ;;  %s1600_s18 = sphi %s1676_s18, %s1879_s18   ;;  %s1596_s17 = sphi %s1674_s17, %s1878_s17  }
   0x3   : > { %p35_p1 = scmp.ge.s32.totalorder %s33_s20, 2  ;;  %p372_p2 = scmp.lt.s32.totalorder %s1604_s19, 3 }
   0x5   : > { %s1881_s20 = smov (%p35_p1, %s33_s20), 0  ;;  %p373_p3 = pnand %p1367_p0, %p372_p2 }
   0x6   : > { %p423_p4 = scmp.lt.s32.totalorder (!%p373_p3), %s1596_s17, 1  ;;  %vm448_vm0 = vcmask (!%p373_p3), 261120   ;;  %v1552_v14 = vld [vmem:[%s1869_s3 + $0x10] sm:$0xff] (!%p373_p3)   ;;  %v1606_v15 = vmov (!%p373_p3), 0.0   ;;  %v1553_v16 = vld [vmem:[%s1869_s3] sm:$0xff] (!%p373_p3)   ;;  %v1554_v17 = vld [vmem:[%s1869_s3 + $0x18] sm:$0xff] (!%p373_p3)  }
   0x7   : > { %376 = sbr.rel (%p373_p3) target bundleno = 2117 (0x845), region = 64  ;;  %1448 = vmatprep.subr.bf16.mxu1 (!%p373_p3), %v1606_v15  ;;  %1440 = vmatprep.subr.bf16.mxu0 (!%p373_p3), %v1606_v15  ;;  %vm1607_vm1 = vmmov (!%p373_p3), 0   ;;  %v1555_v18 = vld [vmem:[%s1869_s3 + $0x8] sm:$0xff] (!%p373_p3)   ;;  %v1371_v26 = vld [vmem:[%s1873_s7] ss:$0 sm:$0xff] (!%p373_p3)  ;;  %vm706_vm2 = vcmask (!%p373_p3), 64512  }
   0x8   : > { %1449 = vmatpush3.bf16.msra.mxu1 (!%p373_p3), %v1552_v14  ;;  %1441 = vmatpush3.bf16.msra.mxu0 (!%p373_p3), %v1553_v16  ;;  %v1372_v28 = vld [vmem:[%s1874_s8] ss:$0 sm:$0xff] (!%p373_p3)  ;;  %v1557_v38 = vld [vmem:[%s1869_s3 + $0x28] sm:$0xff] (!%p373_p3)   ;;  %v1382_v39 = vld [vmem:[%s1870_s4 + $0x1] ss:$0 sm:$0xff] (!%p373_p3)  ;;  %s1608_s15 = smov (!%p373_p3), 120  }
   0x9   : > { %1450 = vmatprep.subr.bf16.mxu1 (!%p373_p3), %v1606_v15  ;;  %1452 = vmatprep.mubr.msk.bf16.mxu1 (!%p373_p3), %vm1607_vm1, %v1606_v15  ;;  %v1556_v36 = vld [vmem:[%s1869_s3 + $0x20] sm:$0xff] (!%p373_p3)   ;;  %s1609_s16 = smov (!%p373_p3), 104   ;;  %vm770_vm3 = vcmask (!%p373_p3), 1043456   ;;  %s1611_s29 = smov (!%p373_p3), 8   ;;  %vm1166_vm4 = vcmask (!%p373_p3), 130048   ;;  %vm1168_vm5 = vcmask (!%p373_p3), 195584  }
   0xa   : > { %1442 = vmatprep.subr.bf16.mxu0 (!%p373_p3), %v1606_v15  ;;  %1444 = vmatprep.mubr.msk.bf16.mxu0 (!%p373_p3), %vm1607_vm1, %v1606_v15  ;;  %v1373_v44 = vld [vmem:[%s1870_s4] ss:$0 sm:$0xff] (!%p373_p3)  ;;  %v1391_v54 = vld [vmem:[%s1870_s4 + $0x2] ss:$0 sm:$0xff] (!%p373_p3)  ;;  %s1612_s30 = smov (!%p373_p3), 16   ;;  %s1613_s14 = smov (!%p373_p3), 24  }
   0xc   : > { %1451 = vmatpush3.bf16.msra.mxu1 (!%p373_p3), %v1554_v17  ;;  %1443 = vmatpush3.bf16.msra.mxu0 (!%p373_p3), %v1555_v18 }
   0xd   : > { %1464 = vmatprep.subr.bf16.mxu1 (!%p373_p3), %v1606_v15  ;;  %1456 = vmatprep.subr.bf16.mxu0 (!%p373_p3), %v1606_v15 }
   0xe   : > { %s1883_s17 = smov (!%p423_p4, %s1596_s17), 1 }
   0xf   : > { %s1695_s21 = sshll.u32 %s1883_s17, 3 }
  0x10   : > { %s433_s24 = scalar_lea.vmem %s1867_s1, %s1695_s21  ;;  %s429_s27 = scalar_lea.vmem %s1866_s0, %s1695_s21 }
  0x11   : > { %v477_v0 = vld [vmem:[%s433_s24] sm:$0xff]  ;;  %s1610_s24 = smov 112  }
  0x12   : > { %v478_v1 = vsel %vm448_vm0, %v477_v0, 0.0  ;;  %v445_v2 = vld [vmem:[%s429_s27] sm:$0xff]  ;;  %s436_s27 = scalar_lea.vmem %s1868_s2, %s1883_s17  ;;  %s443_s17 = scalar_lea.vmem %s1877_s11, %s1695_s21 }
  0x13   : > { %479 = vadd.xlane.f32.xlu0 %v478_v1  ;;  %v449_v3 = vsel %vm448_vm0, %v445_v2, 0.0 }
  0x17   : > { %450 = vadd.xlane.f32.xlu0 %v449_v3 }
  0xa0   : > { %v480_v4 = vpop.xlane.xlu0 %479 }
  0xa1   : > { %v481_v5 = vmul.f32 0.03125, %v480_v4 }
  0xa3   : > { %v482_v6 = vsub.f32 %v477_v0, %v481_v5 }
  0xa4   : > { %v451_v7 = vpop.xlane.xlu0 %450 }
  0xa5   : > { %v453_v8 = vmul.f32 0.03125, %v451_v7  ;;  %v483_v9 = vmul.f32 %v482_v6, %v482_v6  ;;  %v701_v7 = vlaneseq }
  0xa7   : > { %v454_v10 = vsub.f32 %v445_v2, %v453_v8  ;;  %v484_v11 = vsel %vm448_vm0, %v483_v9, 0.0  ;;  %v697_v8 = vld [vmem:[%s436_s27] sm:$0x1] }
  0xa8   : > { %485 = vadd.xlane.f32.xlu1 %v484_v11  ;;  %v1395_v9 = vadd.f32 -1.0, %v697_v8 }
  0xa9   : > { %v455_v12 = vmul.f32 %v454_v10, %v454_v10 }
  0xaa   : > { %v699_v11 = vmul.f32 1e+09, %v1395_v9 }
  0xab   : > { %v456_v13 = vsel %vm448_vm0, %v455_v12, 0.0 }
  0xac   : > { %457 = vadd.xlane.f32.xlu1 %v456_v13 }
 0x135   : > { %v486_v19 = vpop.xlane.xlu1 %485 }
 0x136   : > { %v487_v20 = vmul.f32 0.03125, %v486_v19 }
 0x138   : > { %v488_v21 = vadd.f32 1e-12, %v487_v20 }
 0x139   : > { %v458_v22 = vpop.xlane.xlu1 %457 }
 0x13a   : > { %1560 = vrsqrt.f32 %v488_v21  ;;  %v459_v23 = vmul.f32 0.03125, %v458_v22 }
 0x13c   : > { %v460_v24 = vadd.f32 1e-12, %v459_v23 }
 0x13e   : > { %1562 = vrsqrt.f32 %v460_v24 }
 0x144   : > { %v1561_v25 = vpop.eup %1560 }
 0x145   : > { %v490_v27 = vmul.f32 %v1561_v25, %v482_v6 }
 0x147   : > { %v491_v29 = vmul.f32 %v1371_v26, %v490_v27 }
 0x148   : > { %v1563_v30 = vpop.eup %1562 }
 0x149   : > { %v462_v31 = vmul.f32 %v1563_v30, %v454_v10  ;;  %v492_v32 = vadd.f32 %v1372_v28, %v491_v29  ;;  %v702_v10 = vshrl.u32 %v701_v7, 7 }
 0x14b   : > { %v494_v33 = vpack.c.bf16 %v492_v32, %v492_v32  ;;  %v469_v34 = vmul.f32 %v1371_v26, %v462_v31  ;;  %v703_v12 = vsub.s32 0, %v702_v10 }
 0x14d   : > { %1453 = vmatmul.mubr.msk.bf16.vlgmr.msra.gmra.mrb[0].mxu1 %vm448_vm0, %v494_v33  ;;  %v1738_v35 = vadd.f32 %v1372_v28, %v469_v34  ;;  %v704_v13 = vrot.slane %v699_v11, %v703_v12 }
 0x14e   : > { %1466 = vmatprep.mubr.msk.bf16.mxu1 %vm1607_vm1, %v1606_v15 }
 0x14f   : > { %v493_v37 = vpack.c.bf16 %v1738_v35, %v1738_v35 }
 0x151   : > { %1445 = vmatmul.mubr.msk.bf16.vlgmr.msra.gmra.mrb[0].mxu0 %vm448_vm0, %v493_v37 }
 0x152   : > { %1457 = vmatpush3.bf16.msra.mxu0 %v1556_v36  ;;  %1460 = vmatprep.mubr.msk.bf16.mxu0 %vm1607_vm1, %v1606_v15 }
 0x153   : > { %1458 = vmatprep.subr.bf16.mxu0 %v1606_v15 }
 0x156   : > { %1459 = vmatpush3.bf16.msra.mxu0 %v1557_v38 }
 0x157   : > { %1470 = vmatprep.subr.bf16.mxu0 %v1606_v15 }
 0x159   : > { %1461 = vmatmul.mubr.msk.bf16.vlgmr.msra.gmra.mrb[4].mxu0 %vm448_vm0, %v494_v33 }
 0x15a   : > { %1472 = vmatprep.mubr.msk.bf16.mxu0 %vm1607_vm1, %v1606_v15 }
 0x220   : > { %v624_v40 = vpop.f32.mrb[0].mxu1 }
 0x221   : > { %v625_v41 = vadd.f32 %v1382_v39, %v624_v40  ;;  %v1454_v42 = vpop.f32.mrb[1].mxu1 }
 0x222   : > { %v627_v43 = vpop.f32.mrb[2].mxu1 }
 0x223   : > { %v630_v45 = vpack.c.bf16 %v625_v41, %v625_v41  ;;  %v1455_v46 = vpop.f32.mrb[3].mxu1 }
 0x224   : > { %v555_v47 = vpop.f32.mrb[0].mxu0 }
 0x225   : > { %v556_v48 = vadd.f32 %v1373_v44, %v555_v47  ;;  %818 = vrot.lane.b32.xlu0 %v630_v45, %s1608_s15  ;;  %v1446_v49 = vpop.f32.mrb[1].mxu0  ;;  %v711_v50 = vsel %vm706_vm2, %v630_v45, 0 }
 0x226   : > { %v558_v51 = vpop.f32.mrb[2].mxu0  ;;  %1465 = vmatpush3.bf16.xpose.msra.mxu1 %v711_v50 }
 0x227   : > { %v561_v52 = vpack.c.bf16 %v556_v48, %v556_v48  ;;  %v1447_v53 = vpop.f32.mrb[3].mxu0  ;;  %1476 = vmatprep.subr.bf16.mxu1 %v1606_v15 }
 0x229   : > { %1043 = vrot.lane.b32.xlu0 %v630_v45, %s1609_s16  ;;  %815 = vrot.lane.b32.xlu1 %v561_v52, %s1608_s15 }
 0x22c   : > { %v690_v55 = vpop.f32.mrb[4].mxu0 }
 0x22d   : > { %v691_v56 = vadd.f32 %v1391_v54, %v690_v55  ;;  %931 = vrot.lane.b32.xlu1 %v630_v45, %s1610_s24  ;;  %v1462_v57 = vpop.f32.mrb[5].mxu0  ;;  %1467 = vmatmul.mubr.msk.bf16.vlgmr.msra.gmra.mrb[4].mxu1 %vm706_vm2, %v561_v52 }
 0x22e   : > { %v693_v58 = vpop.f32.mrb[6].mxu0  ;;  %1478 = vmatprep.mubr.msk.bf16.mxu1 %vm1607_vm1, %v1606_v15 }
 0x22f   : > { %v1776_v59 = vpack.c.bf16 %v691_v56, %v691_v56  ;;  %v1463_v60 = vpop.f32.mrb[7].mxu0 }
 0x231   : > { %929 = vrot.lane.b32.xlu1 %v561_v52, %s1610_s24  ;;  %v772_v61 = vsel %vm770_vm3, %v1776_v59, 0 }
 0x232   : > { %1471 = vmatpush3.bf16.msra.mxu0 %v772_v61 }
 0x233   : > { %1482 = vmatprep.subr.bf16.mxu0 %v1606_v15 }
 0x235   : > { %1041 = vrot.lane.b32.xlu1 %v561_v52, %s1609_s16 }
 0x297   : > { %v819_v62 = vpop.permute.xlu0 %818 }
 0x298   : > { %v824_v63 = vsel %vm706_vm2, %v819_v62, 0 }
 0x299   : > { %1477 = vmatpush3.bf16.xpose.msra.mxu1 %v824_v63 }
 0x29a   : > { %1488 = vmatprep.subr.bf16.mxu1 %v1606_v15 }
 0x29b   : > { %v816_v0 = vpop.permute.xlu1 %815  ;;  %v1044_v3 = vpop.permute.xlu0 %1043 }
 0x29c   : > { %v1049_v5 = vsel %vm706_vm2, %v1044_v3, 0 }
 0x29f   : > { %v932_v1 = vpop.permute.xlu1 %931 }
 0x2a0   : > { %v937_v2 = vsel %vm706_vm2, %v932_v1, 0  ;;  %1479 = vmatmul.mubr.msk.bf16.vlgmr.msra.gmra.mrb[8].mxu1 %vm706_vm2, %v816_v0 }
 0x2a1   : > { %1489 = vmatpush3.bf16.xpose.msra.mxu1 %v937_v2  ;;  %1490 = vmatprep.mubr.msk.bf16.mxu1 %vm1607_vm1, %v1606_v15 }
 0x2a2   : > { %1500 = vmatprep.subr.bf16.mxu1 %v1606_v15 }
 0x2a3   : > { %v930_v4 = vpop.permute.xlu1 %929 }
 0x2a7   : > { %v1042_v6 = vpop.permute.xlu1 %1041 }
 0x2a8   : > { %1491 = vmatmul.mubr.msk.bf16.vlgmr.msra.gmra.mrb[12].mxu1 %vm706_vm2, %v930_v4 }
 0x2a9   : > { %1501 = vmatpush3.bf16.xpose.msra.mxu1 %v1049_v5  ;;  %1502 = vmatprep.mubr.msk.bf16.mxu1 %vm1607_vm1, %v1606_v15 }
 0x2aa   : > { %1512 = vmatprep.subr.bf16.mxu1 %v1606_v15 }
 0x2b0   : > { %1503 = vmatmul.mubr.msk.bf16.vlgmr.msra.gmra.mrb[16].mxu1 %vm706_vm2, %v1042_v6 }
 0x2b1   : > { %1516 = vmatprep.mubr.msk.bf16.mxu1 %vm1607_vm1, %v1606_v15 }
 0x300   : > { %v747_v14 = vpop.f32.mrb[4].mxu1 }
 0x301   : > { %v753_v16 = vmul.f32 0.35355338, %v747_v14  ;;  %v1468_v17 = vpop.f32.mrb[5].mxu1 }
 0x302   : > { %v750_v18 = vpop.f32.mrb[6].mxu1 }
 0x303   : > { %v1469_v19 = vpop.f32.mrb[7].mxu1  ;;  %v754_v20 = vadd.f32 %v753_v16, %v704_v13 }
 0x305   : > { %v755_v21 = vsel %vm706_vm2, %v754_v20, -inf }
 0x306   : > { %756 = vmax.xlane.f32.xlu0 %v755_v21 }
 0x373   : > { %v860_v22 = vpop.f32.mrb[8].mxu1 }
 0x374   : > { %v866_v23 = vmul.f32 0.35355338, %v860_v22  ;;  %v1480_v24 = vpop.f32.mrb[9].mxu1 }
 0x375   : > { %v863_v25 = vpop.f32.mrb[10].mxu1 }
 0x376   : > { %v1481_v26 = vpop.f32.mrb[11].mxu1  ;;  %v867_v27 = vadd.f32 %v866_v23, %v704_v13 }
 0x378   : > { %v868_v28 = vsel %vm706_vm2, %v867_v27, -inf }
 0x379   : > { %869 = vmax.xlane.f32.xlu1 %v868_v28 }
 0x37b   : > { %v973_v29 = vpop.f32.mrb[12].mxu1 }
 0x37c   : > { %v979_v30 = vmul.f32 0.35355338, %v973_v29  ;;  %v1492_v31 = vpop.f32.mrb[13].mxu1 }
 0x37d   : > { %v976_v32 = vpop.f32.mrb[14].mxu1 }
 0x37e   : > { %v1493_v33 = vpop.f32.mrb[15].mxu1  ;;  %v980_v34 = vadd.f32 %v979_v30, %v704_v13 }
 0x380   : > { %v981_v36 = vsel %vm706_vm2, %v980_v34, -inf }
 0x381   : > { %982 = vmax.xlane.f32.xlu0 %v981_v36 }
 0x383   : > { %v1085_v37 = vpop.f32.mrb[16].mxu1 }
 0x384   : > { %v1091_v38 = vmul.f32 0.35355338, %v1085_v37  ;;  %v1504_v39 = vpop.f32.mrb[17].mxu1  ;;  %v1559_v37 = vld [vmem:[%s1871_s5 + $0x8] sm:$0xff]  }
 0x385   : > { %v1088_v40 = vpop.f32.mrb[18].mxu1 }
 0x386   : > { %v1505_v41 = vpop.f32.mrb[19].mxu1  ;;  %v1092_v42 = vadd.f32 %v1091_v38, %v704_v13 }
 0x388   : > { %v1093_v43 = vsel %vm706_vm2, %v1092_v42, -inf }
 0x389   : > { %1094 = vmax.xlane.f32.xlu0 %v1093_v43 }
 0x393   : > { %v757_v44 = vpop.xlane.xlu0 %756 }
 0x394   : > { %v758_v45 = vsub.f32 %v754_v20, %v757_v44 }
 0x396   : > { %v759_v46 = vmul.f32 1.442695, %v758_v45 }
 0x398   : > { %1564 = vpow2.f32 %v759_v46 }
 0x3a2   : > { %v1565_v47 = vpop.eup %1564 }
 0x3a3   : > { %v761_v48 = vsel %vm706_vm2, %v1565_v47, 0.0 }
 0x3a4   : > { %762 = vadd.xlane.f32.xlu0 %v761_v48  ;;  %v1404_v48 = vld [vmem:[%s1872_s6] ss:$0 sm:$0xff] }
 0x406   : > { %v870_v49 = vpop.xlane.xlu1 %869 }
 0x407   : > { %v871_v50 = vsub.f32 %v867_v27, %v870_v49  ;;  %v1558_v27 = vld [vmem:[%s1871_s5] sm:$0xff]  }
 0x408   : > { %1513 = vmatpush3.bf16.msra.mxu1 %v1558_v27 }
 0x409   : > { %v872_v51 = vmul.f32 1.442695, %v871_v50  ;;  %1514 = vmatprep.subr.bf16.mxu1 %v1606_v15 }
 0x40b   : > { %1566 = vpow2.f32 %v872_v51 }
 0x40c   : > { %1515 = vmatpush3.bf16.msra.mxu1 %v1559_v37 }
 0x40e   : > { %v983_v52 = vpop.xlane.xlu0 %982 }
 0x40f   : > { %v984_v53 = vsub.f32 %v980_v34, %v983_v52 }
 0x411   : > { %v985_v54 = vmul.f32 1.442695, %v984_v53 }
 0x413   : > { %1568 = vpow2.f32 %v985_v54 }
 0x415   : > { %v1567_v55 = vpop.eup %1566 }
 0x416   : > { %v874_v56 = vsel %vm706_vm2, %v1567_v55, 0.0  ;;  %v1095_v60 = vpop.xlane.xlu0 %1094 }
 0x417   : > { %875 = vadd.xlane.f32.xlu1 %v874_v56  ;;  %v1096_v62 = vsub.f32 %v1092_v42, %v1095_v60 }
 0x419   : > { %v1097_v63 = vmul.f32 1.442695, %v1096_v62 }
 0x41d   : > { %v1569_v57 = vpop.eup %1568 }
 0x41e   : > { %v987_v58 = vsel %vm706_vm2, %v1569_v57, 0.0 }
 0x41f   : > { %988 = vadd.xlane.f32.xlu0 %v987_v58 }
 0x428   : > { %993 = vrot.lane.b32.xlu1 %v1776_v59, %s1610_s24 }
 0x431   : > { %v763_v61 = vpop.xlane.xlu0 %762 }
 0x432   : > { %1570 = vrcp.f32 %v763_v61 }
 0x433   : > { %1572 = vpow2.f32 %v1097_v63 }
 0x435   : > { %881 = vrot.lane.b32.xlu0 %v1776_v59, %s1608_s15 }
 0x43c   : > { %v1571_v0 = vpop.eup %1570 }
 0x43d   : > { %v765_v1 = vmul.f32 %v1571_v0, %v1565_v47  ;;  %v1573_v3 = vpop.eup %1572 }
 0x43e   : > { %v1099_v4 = vsel %vm706_vm2, %v1573_v3, 0.0 }
 0x43f   : > { %v766_v2 = vpack.c.bf16 %v765_v1, %v765_v1 }
 0x441   : > { %1473 = vmatmul.mubr.msk.bf16.vlgmr.msra.gmra.mrb[8].mxu0 %vm706_vm2, %v766_v2 }
 0x442   : > { %1484 = vmatprep.mubr.msk.bf16.mxu0 %vm1607_vm1, %v1606_v15 }
 0x44c   : > { %1100 = vadd.xlane.f32.xlu1 %v1099_v4 }
 0x45d   : > { %1105 = vrot.lane.b32.xlu1 %v1776_v59, %s1609_s16 }
 0x4a4   : > { %v876_v5 = vpop.xlane.xlu1 %875 }
 0x4a5   : > { %1574 = vrcp.f32 %v876_v5 }
 0x4a8   : > { %v994_v11 = vpop.permute.xlu1 %993 }
 0x4a9   : > { %v999_v13 = vsel %vm770_vm3, %v994_v11, 0 }
 0x4ac   : > { %v989_v6 = vpop.xlane.xlu0 %988 }
 0x4ad   : > { %1576 = vrcp.f32 %v989_v6 }
 0x4af   : > { %v1575_v7 = vpop.eup %1574 }
 0x4b0   : > { %v878_v8 = vmul.f32 %v1575_v7, %v1567_v55  ;;  %v882_v9 = vpop.permute.xlu0 %881 }
 0x4b1   : > { %v887_v10 = vsel %vm770_vm3, %v882_v9, 0 }
 0x4b2   : > { %1483 = vmatpush3.bf16.msra.mxu0 %v887_v10  ;;  %v879_v12 = vpack.c.bf16 %v878_v8, %v878_v8 }
 0x4b3   : > { %1494 = vmatprep.subr.bf16.mxu0 %v1606_v15 }
 0x4b5   : > { %1485 = vmatmul.mubr.msk.bf16.vlgmr.msra.gmra.mrb[12].mxu0 %vm706_vm2, %v879_v12 }
 0x4b6   : > { %1495 = vmatpush3.bf16.msra.mxu0 %v999_v13  ;;  %1496 = vmatprep.mubr.msk.bf16.mxu0 %vm1607_vm1, %v1606_v15 }
 0x4b7   : > { %v1577_v59 = vpop.eup %1576  ;;  %1506 = vmatprep.subr.bf16.mxu0 %v1606_v15 }
 0x4b8   : > { %v991_v14 = vmul.f32 %v1577_v59, %v1569_v57 }
 0x4ba   : > { %v992_v16 = vpack.c.bf16 %v991_v14, %v991_v14 }
 0x4bd   : > { %1497 = vmatmul.mubr.msk.bf16.vlgmr.msra.gmra.mrb[16].mxu0 %vm706_vm2, %v992_v16 }
 0x4be   : > { %1508 = vmatprep.mubr.msk.bf16.mxu0 %vm1607_vm1, %v1606_v15 }
 0x4d9   : > { %v1101_v17 = vpop.xlane.xlu1 %1100 }
 0x4da   : > { %1578 = vrcp.f32 %v1101_v17 }
 0x4dd   : > { %v1106_v18 = vpop.permute.xlu1 %1105 }
 0x4de   : > { %v1111_v19 = vsel %vm770_vm3, %v1106_v18, 0 }
 0x4df   : > { %1507 = vmatpush3.bf16.msra.mxu0 %v1111_v19 }
 0x4e4   : > { %v1579_v20 = vpop.eup %1578 }
 0x4e5   : > { %v1103_v21 = vmul.f32 %v1579_v20, %v1573_v3  ;;  %v1409_v3 = vld [vmem:[%s1876_s10] ss:$0 sm:$0xff] }
 0x4e7   : > { %v1104_v22 = vpack.c.bf16 %v1103_v21, %v1103_v21 }
 0x4e9   : > { %1509 = vmatmul.mubr.msk.bf16.vlgmr.msra.gmra.mrb[20].mxu0 %vm706_vm2, %v1104_v22 }
 0x514   : > { %v808_v23 = vpop.f32.mrb[8].mxu0 }
 0x515   : > { %v1474_v24 = vpop.f32.mrb[9].mxu0 }
 0x516   : > { %v811_v25 = vpop.f32.mrb[10].mxu0 }
 0x517   : > { %v1475_v26 = vpop.f32.mrb[11].mxu0 }
 0x588   : > { %v923_v28 = vpop.f32.mrb[12].mxu0 }
 0x589   : > { %1154 = vrot.lane.b32.xlu1 %v923_v28, %s1611_s29  ;;  %v1486_v29 = vpop.f32.mrb[13].mxu0 }
 0x58a   : > { %v926_v30 = vpop.f32.mrb[14].mxu0 }
 0x58b   : > { %v1487_v31 = vpop.f32.mrb[15].mxu0 }
 0x590   : > { %v1035_v32 = vpop.f32.mrb[16].mxu0 }
 0x591   : > { %1158 = vrot.lane.b32.xlu0 %v1035_v32, %s1612_s30  ;;  %v1498_v33 = vpop.f32.mrb[17].mxu0 }
 0x592   : > { %v1038_v34 = vpop.f32.mrb[18].mxu0 }
 0x593   : > { %v1499_v36 = vpop.f32.mrb[19].mxu0 }
 0x5bc   : > { %v1147_v38 = vpop.f32.mrb[20].mxu0 }
 0x5bd   : > { %1162 = vrot.lane.b32.xlu1 %v1147_v38, %s1613_s14  ;;  %v1510_v15 = vpop.f32.mrb[21].mxu0 }
 0x5be   : > { %v1150_v39 = vpop.f32.mrb[22].mxu0 }
 0x5bf   : > { %v1511_v40 = vpop.f32.mrb[23].mxu0 }
 0x5fb   : > { %v1155_v41 = vpop.permute.xlu1 %1154 }
 0x5fc   : > { %v1165_v43 = vsel %vm706_vm2, %v808_v23, %v1155_v41 }
 0x603   : > { %v1159_v42 = vpop.permute.xlu0 %1158 }
 0x604   : > { %v1167_v44 = vsel %vm1166_vm4, %v1165_v43, %v1159_v42 }
 0x62f   : > { %v1163_v45 = vpop.permute.xlu1 %1162 }
 0x630   : > { %v1169_v46 = vsel %vm1168_vm5, %v1167_v44, %v1163_v45 }
 0x631   : > { %v1174_v47 = vpack.c.bf16 %v1169_v46, %v1169_v46 }
 0x633   : > { %1517 = vmatmul.mubr.msk.bf16.vlgmr.msra.gmra.mrb[20].mxu1 %vm448_vm0, %v1174_v47 }
 0x706   : > { %v1231_v49 = vpop.f32.mrb[20].mxu1 }
 0x707   : > { %v1232_v50 = vadd.f32 %v1404_v48, %v1231_v49  ;;  %v1518_v51 = vpop.f32.mrb[21].mxu1 }
 0x708   : > { %v1234_v52 = vpop.f32.mrb[22].mxu1 }
 0x709   : > { %v1519_v53 = vpop.f32.mrb[23].mxu1  ;;  %v1237_v54 = vadd.f32 %v1232_v50, %v1738_v35  ;;  %v1408_v35 = vld [vmem:[%s1875_s9] ss:$0 sm:$0xff] }
 0x70b   : > { %v1240_v55 = vsel %vm448_vm0, %v1237_v54, 0.0 }
 0x70c   : > { %1241 = vadd.xlane.f32.xlu0 %v1240_v55 }
 0x799   : > { %v1242_v56 = vpop.xlane.xlu0 %1241 }
 0x79a   : > { %v1243_v57 = vmul.f32 0.03125, %v1242_v56 }
 0x79c   : > { %v1244_v58 = vsub.f32 %v1237_v54, %v1243_v57 }
 0x79e   : > { %v1245_v60 = vmul.f32 %v1244_v58, %v1244_v58 }
 0x7a0   : > { %v1246_v61 = vsel %vm448_vm0, %v1245_v60, 0.0 }
 0x7a1   : > { %1247 = vadd.xlane.f32.xlu1 %v1246_v61 }
 0x82e   : > { %v1248_v62 = vpop.xlane.xlu1 %1247 }
 0x82f   : > { %v1249_v63 = vmul.f32 0.03125, %v1248_v62 }
 0x831   : > { %v1250_v0 = vadd.f32 1e-12, %v1249_v63 }
 0x833   : > { %1580 = vrsqrt.f32 %v1250_v0 }
 0x83d   : > { %v1581_v1 = vpop.eup %1580 }
 0x83e   : > { %v1252_v2 = vmul.f32 %v1581_v1, %v1244_v58 }
 0x840   : > { %v1259_v4 = vmul.f32 %v1408_v35, %v1252_v2 }
 0x842   : > { %v1266_v5 = vadd.f32 %v1409_v3, %v1259_v4 }
 0x844   : > { %1267 = vst.msk [vmem:[%s443_s17] sm:$0xff] %vm448_vm0, %v1266_v5 }
 0x845 PF: > { %s21_s19 = sadd.s32 1, %s1604_s19   ;;  %s1878_s17 = smov %s1600_s18 }
 0x846   : > { %p18_p5 = scmp.ge.s32.totalorder %s21_s19, 4   ;;  %s1879_s18 = smov %s1881_s20 }
 0x848   :  { %20 = sbr.rel (!%p18_p5) target bundleno = 2 (0x2), region = 104 }

// kernel: forward.9
= control target key start
LH: loop header
LB: loop body
LE: loop exit
PB: predicated region body
PF: predicated region fallthrough
CT: control target
= control target key end

     0   :  { %s1624_s17 = smov 0   ;;  %s1626_s18 = smov 0   ;;  %s1800_s0 = inlined_call_operand.vmem [shape: f32[2,8,32], index: 0, kind: input, shape index: {}]   ;;  %s1801_s1 = inlined_call_operand.vmem [shape: f32[2,8,32], index: 1, kind: input, shape index: {}]   ;;  %s1802_s2 = inlined_call_operand.vmem [shape: f32[2,1,8], index: 2, kind: input, shape index: {}]   ;;  %s1803_s3 = inlined_call_operand.vmem [shape: bf16[3,32,32], index: 3, kind: input, shape index: {}]   ;;  %s1804_s4 = inlined_call_operand.vmem [shape: f32[3,1,32], index: 4, kind: input, shape index: {}]   ;;  %s1805_s5 = inlined_call_operand.vmem [shape: bf16[32,32], index: 5, kind: input, shape index: {}]   ;;  %s1806_s6 = inlined_call_operand.vmem [shape: f32[1,32], index: 6, kind: input, shape index: {}, may-alias: {6,8,10}]   ;;  %s1807_s7 = inlined_call_operand.vmem [shape: f32[1,32], index: 7, kind: input, shape index: {}, may-alias: {7,9}]   ;;  %s1808_s8 = inlined_call_operand.vmem [shape: f32[1,32], index: 8, kind: input, shape index: {}, may-alias: {6,8,10}]   ;;  %s1809_s9 = inlined_call_operand.vmem [shape: f32[1,32], index: 9, kind: input, shape index: {}, may-alias: {7,9}]   ;;  %s1810_s10 = inlined_call_operand.vmem [shape: f32[1,32], index: 10, kind: input, shape index: {}, may-alias: {6,8,10}]   ;;  %s1811_s11 = inlined_call_operand.vmem [shape: f32[2,8,32], index: 11, kind: output, shape index: {}]  }
   0x1   :  { %s1628_s19 = smov 0  }
   0x2 LB: > { %s33_s7 = sadd.s32 1, %s1550_s18  ;;  %p1323_p0 = scmp.ge.s32.totalorder %s1554_s19, 1  ;;  %s1554_s19 = sphi %s1628_s19, %s21_s19   ;;  %s1550_s18 = sphi %s1626_s18, %s1813_s18   ;;  %s1546_s17 = sphi %s1624_s17, %s1812_s17  }
   0x3   : > { %p35_p1 = scmp.ge.s32.totalorder %s33_s7, 2  ;;  %p372_p2 = scmp.lt.s32.totalorder %s1554_s19, 3 }
   0x5   : > { %s1815_s7 = smov (%p35_p1, %s33_s7), 0  ;;  %p373_p3 = pnand %p1323_p0, %p372_p2 }
   0x6   : > { %v1506_v0 = vld [vmem:[%s1803_s3 + $0x10] sm:$0xff] (!%p373_p3)   ;;  %v1556_v1 = vmov (!%p373_p3), 0.0   ;;  %v1507_v2 = vld [vmem:[%s1803_s3] sm:$0xff] (!%p373_p3)   ;;  %v1508_v3 = vld [vmem:[%s1803_s3 + $0x18] sm:$0xff] (!%p373_p3)   ;;  %vm1557_vm0 = vmmov (!%p373_p3), 0   ;;  %p423_p4 = scmp.lt.s32.totalorder (!%p373_p3), %s1546_s17, 1  ;;  %v656_v35 = vlaneseq (!%p373_p3) }
   0x7   : > { %376 = sbr.rel (%p373_p3) target bundleno = 1768 (0x6e8), region = 64  ;;  %1402 = vmatprep.subr.bf16.mxu1 (!%p373_p3), %v1556_v1  ;;  %1394 = vmatprep.subr.bf16.mxu0 (!%p373_p3), %v1556_v1  ;;  %v1509_v4 = vld [vmem:[%s1803_s3 + $0x8] sm:$0xff] (!%p373_p3)   ;;  %vm472_vm1 = vcmask (!%p373_p3), 261120   ;;  %v1336_v9 = vld [vmem:[%s1804_s4 + $0x1] ss:$0 sm:$0xff] (!%p373_p3)  ;;  %vm661_vm2 = vcmask (!%p373_p3), 64512  }
   0x8   : > { %1403 = vmatpush3.bf16.msra.mxu1 (!%p373_p3), %v1506_v0  ;;  %1406 = vmatprep.mubr.msk.bf16.mxu1 (!%p373_p3), %vm1557_vm0, %v1556_v1  ;;  %v1327_v10 = vld [vmem:[%s1804_s4] ss:$0 sm:$0xff] (!%p373_p3)  ;;  %s1558_s21 = smov (!%p373_p3), 112   ;;  %s1559_s22 = smov (!%p373_p3), 120   ;;  %v1511_v25 = vld [vmem:[%s1803_s3 + $0x28] sm:$0xff] (!%p373_p3)   ;;  %v657_v38 = vshrl.u32 (!%p373_p3), %v656_v35, 7 }
   0x9   : > { %1404 = vmatprep.subr.bf16.mxu1 (!%p373_p3), %v1556_v1  ;;  %1395 = vmatpush3.bf16.msra.mxu0 (!%p373_p3), %v1507_v2  ;;  %s1560_s23 = smov (!%p373_p3), 104   ;;  %v1510_v24 = vld [vmem:[%s1803_s3 + $0x20] sm:$0xff] (!%p373_p3)   ;;  %vm725_vm3 = vcmask (!%p373_p3), 1043456   ;;  %s1561_s16 = smov (!%p373_p3), 8   ;;  %vm1121_vm4 = vcmask (!%p373_p3), 130048   ;;  %vm1123_vm5 = vcmask (!%p373_p3), 195584  }
   0xa   : > { %1396 = vmatprep.subr.bf16.mxu0 (!%p373_p3), %v1556_v1  ;;  %1398 = vmatprep.mubr.msk.bf16.mxu0 (!%p373_p3), %vm1557_vm0, %v1556_v1  ;;  %v658_v40 = vsub.s32 (!%p373_p3), 0, %v657_v38  ;;  %v1345_v49 = vld [vmem:[%s1804_s4 + $0x2] ss:$0 sm:$0xff] (!%p373_p3) }
   0xc   : > { %1405 = vmatpush3.bf16.msra.mxu1 (!%p373_p3), %v1508_v3 }
   0xd   : > { %1397 = vmatpush3.bf16.msra.mxu0 (!%p373_p3), %v1509_v4  ;;  %1418 = vmatprep.subr.bf16.mxu1 (!%p373_p3), %v1556_v1 }
   0xe   : > { %s1817_s17 = smov (!%p423_p4, %s1546_s17), 1  ;;  %1410 = vmatprep.subr.bf16.mxu0 %v1556_v1 }
   0xf   : > { %s1665_s27 = sshll.u32 %s1817_s17, 3  ;;  %s436_s12 = scalar_lea.vmem %s1802_s2, %s1817_s17 }
  0x10   : > { %s433_s30 = scalar_lea.vmem %s1801_s1, %s1665_s27  ;;  %s429_s14 = scalar_lea.vmem %s1800_s0, %s1665_s27  ;;  %v652_v36 = vld [vmem:[%s436_s12] sm:$0x1] }
  0x11   : > { %v446_v5 = vld [vmem:[%s433_s30] sm:$0xff]  ;;  %v1349_v37 = vadd.f32 -1.0, %v652_v36  ;;  %s443_s13 = scalar_lea.vmem %s1811_s11, %s1665_s27 }
  0x12   : > { %v448_v6 = vpack.c.bf16 %v446_v5, %v446_v5  ;;  %v1677_v7 = vld [vmem:[%s429_s14] sm:$0xff] }
  0x13   : > { %v447_v8 = vpack.c.bf16 %v1677_v7, %v1677_v7  ;;  %v654_v39 = vmul.f32 1e+09, %v1349_v37 }
  0x14   : > { %1407 = vmatmul.mubr.msk.bf16.vlgmr.msra.gmra.mrb[0].mxu1 %vm472_vm1, %v448_v6 }
  0x15   : > { %1399 = vmatmul.mubr.msk.bf16.vlgmr.msra.gmra.mrb[0].mxu0 %vm472_vm1, %v447_v8  ;;  %1420 = vmatprep.mubr.msk.bf16.mxu1 %vm1557_vm0, %v1556_v1  ;;  %v659_v41 = vrot.slane %v654_v39, %v658_v40 }
  0x16   : > { %1414 = vmatprep.mubr.msk.bf16.mxu0 %vm1557_vm0, %v1556_v1  ;;  %1411 = vmatpush3.bf16.msra.mxu0 %v1510_v24 }
  0x17   : > { %1412 = vmatprep.subr.bf16.mxu0 %v1556_v1 }
  0x1a   : > { %1413 = vmatpush3.bf16.msra.mxu0 %v1511_v25 }
  0x1b   : > { %1424 = vmatprep.subr.bf16.mxu0 %v1556_v1 }
  0x1d   : > { %1415 = vmatmul.mubr.msk.bf16.vlgmr.msra.gmra.mrb[4].mxu0 %vm472_vm1, %v448_v6 }
  0x1e   : > { %1426 = vmatprep.mubr.msk.bf16.mxu0 %vm1557_vm0, %v1556_v1 }
  0xe7   : > { %v579_v11 = vpop.f32.mrb[0].mxu1 }
  0xe8   : > { %v580_v12 = vadd.f32 %v1336_v9, %v579_v11  ;;  %v1408_v13 = vpop.f32.mrb[1].mxu1  ;;  %v510_v14 = vpop.f32.mrb[0].mxu0 }
  0xe9   : > { %v582_v15 = vpop.f32.mrb[2].mxu1  ;;  %v511_v16 = vadd.f32 %v1327_v10, %v510_v14  ;;  %v1400_v17 = vpop.f32.mrb[1].mxu0 }
  0xea   : > { %v585_v18 = vpack.c.bf16 %v580_v12, %v580_v12  ;;  %v1409_v19 = vpop.f32.mrb[3].mxu1  ;;  %v513_v20 = vpop.f32.mrb[2].mxu0 }
  0xeb   : > { %v1401_v21 = vpop.f32.mrb[3].mxu0  ;;  %v516_v22 = vpack.c.bf16 %v511_v16, %v511_v16 }
  0xec   : > { %886 = vrot.lane.b32.xlu1 %v585_v18, %s1558_s21  ;;  %773 = vrot.lane.b32.xlu0 %v585_v18, %s1559_s22  ;;  %v666_v23 = vsel %vm661_vm2, %v585_v18, 0 }
  0xed   : > { %1419 = vmatpush3.bf16.xpose.msra.mxu1 %v666_v23 }
  0xee   : > { %1430 = vmatprep.subr.bf16.mxu1 %v1556_v1 }
  0xf0   : > { %884 = vrot.lane.b32.xlu1 %v516_v22, %s1558_s21  ;;  %770 = vrot.lane.b32.xlu0 %v516_v22, %s1559_s22  ;;  %v645_v50 = vpop.f32.mrb[4].mxu0 }
  0xf1   : > { %v646_v51 = vadd.f32 %v1345_v49, %v645_v50  ;;  %v1416_v52 = vpop.f32.mrb[5].mxu0 }
  0xf2   : > { %v648_v53 = vpop.f32.mrb[6].mxu0 }
  0xf3   : > { %v651_v54 = vpack.c.bf16 %v646_v51, %v646_v51  ;;  %v1417_v55 = vpop.f32.mrb[7].mxu0 }
  0xf4   : > { %996 = vrot.lane.b32.xlu1 %v516_v22, %s1560_s23  ;;  %998 = vrot.lane.b32.xlu0 %v585_v18, %s1560_s23 }
  0xf5   : > { %1421 = vmatmul.mubr.msk.bf16.vlgmr.msra.gmra.mrb[4].mxu1 %vm661_vm2, %v516_v22  ;;  %v727_v56 = vsel %vm725_vm3, %v651_v54, 0 }
  0xf6   : > { %1432 = vmatprep.mubr.msk.bf16.mxu1 %vm1557_vm0, %v1556_v1  ;;  %1425 = vmatpush3.bf16.msra.mxu0 %v727_v56 }
  0xf7   : > { %1436 = vmatprep.subr.bf16.mxu0 %v1556_v1 }
 0x15e   : > { %v774_v26 = vpop.permute.xlu0 %773  ;;  %v887_v28 = vpop.permute.xlu1 %886 }
 0x15f   : > { %v779_v27 = vsel %vm661_vm2, %v774_v26, 0  ;;  %v892_v30 = vsel %vm661_vm2, %v887_v28, 0 }
 0x160   : > { %1431 = vmatpush3.bf16.xpose.msra.mxu1 %v779_v27 }
 0x161   : > { %1442 = vmatprep.subr.bf16.mxu1 %v1556_v1 }
 0x162   : > { %v771_v29 = vpop.permute.xlu0 %770  ;;  %v885_v32 = vpop.permute.xlu1 %884 }
 0x166   : > { %v999_v31 = vpop.permute.xlu0 %998  ;;  %v997_v34 = vpop.permute.xlu1 %996 }
 0x167   : > { %1433 = vmatmul.mubr.msk.bf16.vlgmr.msra.gmra.mrb[8].mxu1 %vm661_vm2, %v771_v29  ;;  %v1004_v33 = vsel %vm661_vm2, %v999_v31, 0 }
 0x168   : > { %1443 = vmatpush3.bf16.xpose.msra.mxu1 %v892_v30  ;;  %1444 = vmatprep.mubr.msk.bf16.mxu1 %vm1557_vm0, %v1556_v1 }
 0x169   : > { %1454 = vmatprep.subr.bf16.mxu1 %v1556_v1 }
 0x16f   : > { %1445 = vmatmul.mubr.msk.bf16.vlgmr.msra.gmra.mrb[12].mxu1 %vm661_vm2, %v885_v32 }
 0x170   : > { %1455 = vmatpush3.bf16.xpose.msra.mxu1 %v1004_v33  ;;  %1456 = vmatprep.mubr.msk.bf16.mxu1 %vm1557_vm0, %v1556_v1 }
 0x171   : > { %1466 = vmatprep.subr.bf16.mxu1 %v1556_v1 }
 0x177   : > { %1457 = vmatmul.mubr.msk.bf16.vlgmr.msra.gmra.mrb[16].mxu1 %vm661_vm2, %v997_v34 }
 0x178   : > { %1470 = vmatprep.mubr.msk.bf16.mxu1 %vm1557_vm0, %v1556_v1 }
 0x1c8   : > { %v702_v42 = vpop.f32.mrb[4].mxu1 }
 0x1c9   : > { %v708_v43 = vmul.f32 0.35355338, %v702_v42  ;;  %v1422_v44 = vpop.f32.mrb[5].mxu1 }
 0x1ca   : > { %v705_v45 = vpop.f32.mrb[6].mxu1 }
 0x1cb   : > { %v1423_v46 = vpop.f32.mrb[7].mxu1  ;;  %v709_v47 = vadd.f32 %v708_v43, %v659_v41 }
 0x1cd   : > { %v710_v48 = vsel %vm661_vm2, %v709_v47, -inf }
 0x1ce   : > { %711 = vmax.xlane.f32.xlu0 %v710_v48 }
 0x23a   : > { %v815_v57 = vpop.f32.mrb[8].mxu1 }
 0x23b   : > { %v821_v58 = vmul.f32 0.35355338, %v815_v57  ;;  %v1434_v59 = vpop.f32.mrb[9].mxu1 }
 0x23c   : > { %v818_v60 = vpop.f32.mrb[10].mxu1 }
 0x23d   : > { %v1435_v61 = vpop.f32.mrb[11].mxu1  ;;  %v822_v62 = vadd.f32 %v821_v58, %v659_v41 }
 0x23f   : > { %v823_v63 = vsel %vm661_vm2, %v822_v62, -inf }
 0x240   : > { %824 = vmax.xlane.f32.xlu1 %v823_v63 }
 0x242   : > { %v928_v0 = vpop.f32.mrb[12].mxu1 }
 0x243   : > { %v934_v2 = vmul.f32 0.35355338, %v928_v0  ;;  %v1446_v3 = vpop.f32.mrb[13].mxu1 }
 0x244   : > { %v931_v4 = vpop.f32.mrb[14].mxu1 }
 0x245   : > { %v1447_v5 = vpop.f32.mrb[15].mxu1  ;;  %v935_v6 = vadd.f32 %v934_v2, %v659_v41  ;;  %v1513_v4 = vld [vmem:[%s1805_s5 + $0x8] sm:$0xff]  }
 0x247   : > { %v936_v8 = vsel %vm661_vm2, %v935_v6, -inf }
 0x248   : > { %937 = vmax.xlane.f32.xlu0 %v936_v8 }
 0x24a   : > { %v1040_v9 = vpop.f32.mrb[16].mxu1 }
 0x24b   : > { %v1046_v10 = vmul.f32 0.35355338, %v1040_v9  ;;  %v1458_v11 = vpop.f32.mrb[17].mxu1 }
 0x24c   : > { %v1043_v12 = vpop.f32.mrb[18].mxu1 }
 0x24d   : > { %v1459_v13 = vpop.f32.mrb[19].mxu1  ;;  %v1047_v14 = vadd.f32 %v1046_v10, %v659_v41 }
 0x24f   : > { %v1048_v15 = vsel %vm661_vm2, %v1047_v14, -inf }
 0x250   : > { %1049 = vmax.xlane.f32.xlu0 %v1048_v15 }
 0x25b   : > { %v712_v16 = vpop.xlane.xlu0 %711 }
 0x25c   : > { %v713_v17 = vsub.f32 %v709_v47, %v712_v16 }
 0x25e   : > { %v714_v18 = vmul.f32 1.442695, %v713_v17 }
 0x260   : > { %1514 = vpow2.f32 %v714_v18 }
 0x26a   : > { %v1515_v19 = vpop.eup %1514 }
 0x26b   : > { %v716_v20 = vsel %vm661_vm2, %v1515_v19, 0.0 }
 0x26c   : > { %717 = vadd.xlane.f32.xlu1 %v716_v20  ;;  %v1358_v20 = vld [vmem:[%s1806_s6] ss:$0 sm:$0xff] }
 0x27d   : > { %836 = vrot.lane.b32.xlu1 %v651_v54, %s1559_s22  ;;  %s1563_s22 = smov 24  }
 0x2cd   : > { %v825_v21 = vpop.xlane.xlu1 %824 }
 0x2ce   : > { %v826_v22 = vsub.f32 %v822_v62, %v825_v21  ;;  %v1512_v62 = vld [vmem:[%s1805_s5] sm:$0xff]  }
 0x2cf   : > { %1467 = vmatpush3.bf16.msra.mxu1 %v1512_v62 }
 0x2d0   : > { %v827_v23 = vmul.f32 1.442695, %v826_v22  ;;  %1468 = vmatprep.subr.bf16.mxu1 %v1556_v1 }
 0x2d2   : > { %1516 = vpow2.f32 %v827_v23 }
 0x2d3   : > { %1469 = vmatpush3.bf16.msra.mxu1 %v1513_v4 }
 0x2d5   : > { %v938_v24 = vpop.xlane.xlu0 %937 }
 0x2d6   : > { %v939_v25 = vsub.f32 %v935_v6, %v938_v24 }
 0x2d8   : > { %v940_v26 = vmul.f32 1.442695, %v939_v25 }
 0x2da   : > { %1518 = vpow2.f32 %v940_v26 }
 0x2dc   : > { %v1517_v27 = vpop.eup %1516 }
 0x2dd   : > { %v1050_v28 = vpop.xlane.xlu0 %1049  ;;  %v829_v29 = vsel %vm661_vm2, %v1517_v27, 0.0 }
 0x2de   : > { %v1051_v30 = vsub.f32 %v1047_v14, %v1050_v28  ;;  %830 = vadd.xlane.f32.xlu0 %v829_v29 }
 0x2e0   : > { %v1052_v31 = vmul.f32 1.442695, %v1051_v30 }
 0x2e2   : > { %1520 = vpow2.f32 %v1052_v31 }
 0x2e4   : > { %v1519_v32 = vpop.eup %1518 }
 0x2e5   : > { %v942_v33 = vsel %vm661_vm2, %v1519_v32, 0.0 }
 0x2e6   : > { %943 = vadd.xlane.f32.xlu1 %v942_v33 }
 0x2ec   : > { %v1521_v34 = vpop.eup %1520 }
 0x2ed   : > { %v1054_v35 = vsel %vm661_vm2, %v1521_v34, 0.0 }
 0x2ee   : > { %1055 = vadd.xlane.f32.xlu0 %v1054_v35 }
 0x2f7   : > { %1060 = vrot.lane.b32.xlu1 %v651_v54, %s1560_s23 }
 0x2f9   : > { %v718_v36 = vpop.xlane.xlu1 %717 }
 0x2fa   : > { %1522 = vrcp.f32 %v718_v36 }
 0x2fd   : > { %v837_v38 = vpop.permute.xlu1 %836 }
 0x2fe   : > { %v842_v41 = vsel %vm725_vm3, %v837_v38, 0  ;;  %v1363_v38 = vld [vmem:[%s1810_s10] ss:$0 sm:$0xff] }
 0x304   : > { %v1523_v37 = vpop.eup %1522  ;;  %948 = vrot.lane.b32.xlu0 %v651_v54, %s1558_s21  ;;  %s1562_s21 = smov 16  }
 0x305   : > { %v720_v39 = vmul.f32 %v1523_v37, %v1515_v19 }
 0x307   : > { %v721_v40 = vpack.c.bf16 %v720_v39, %v720_v39 }
 0x309   : > { %1427 = vmatmul.mubr.msk.bf16.vlgmr.msra.gmra.mrb[8].mxu0 %vm661_vm2, %v721_v40 }
 0x30a   : > { %1437 = vmatpush3.bf16.msra.mxu0 %v842_v41  ;;  %1438 = vmatprep.mubr.msk.bf16.mxu0 %vm1557_vm0, %v1556_v1 }
 0x30b   : > { %1448 = vmatprep.subr.bf16.mxu0 %v1556_v1 }
 0x36b   : > { %v831_v42 = vpop.xlane.xlu0 %830 }
 0x36c   : > { %1524 = vrcp.f32 %v831_v42 }
 0x373   : > { %v944_v43 = vpop.xlane.xlu1 %943 }
 0x374   : > { %1526 = vrcp.f32 %v944_v43 }
 0x376   : > { %v1525_v44 = vpop.eup %1524 }
 0x377   : > { %v833_v45 = vmul.f32 %v1525_v44, %v1517_v27  ;;  %v1061_v52 = vpop.permute.xlu1 %1060 }
 0x378   : > { %v1066_v54 = vsel %vm725_vm3, %v1061_v52, 0 }
 0x379   : > { %v834_v46 = vpack.c.bf16 %v833_v45, %v833_v45 }
 0x37b   : > { %v1056_v47 = vpop.xlane.xlu0 %1055  ;;  %1439 = vmatmul.mubr.msk.bf16.vlgmr.msra.gmra.mrb[12].mxu0 %vm661_vm2, %v834_v46 }
 0x37c   : > { %1528 = vrcp.f32 %v1056_v47  ;;  %1450 = vmatprep.mubr.msk.bf16.mxu0 %vm1557_vm0, %v1556_v1 }
 0x37e   : > { %v1527_v48 = vpop.eup %1526 }
 0x37f   : > { %v946_v49 = vmul.f32 %v1527_v48, %v1519_v32  ;;  %v949_v50 = vpop.permute.xlu0 %948 }
 0x380   : > { %v954_v51 = vsel %vm725_vm3, %v949_v50, 0 }
 0x381   : > { %1449 = vmatpush3.bf16.msra.mxu0 %v954_v51  ;;  %v947_v53 = vpack.c.bf16 %v946_v49, %v946_v49 }
 0x382   : > { %1460 = vmatprep.subr.bf16.mxu0 %v1556_v1 }
 0x384   : > { %1451 = vmatmul.mubr.msk.bf16.vlgmr.msra.gmra.mrb[16].mxu0 %vm661_vm2, %v947_v53 }
 0x385   : > { %1461 = vmatpush3.bf16.msra.mxu0 %v1066_v54  ;;  %1462 = vmatprep.mubr.msk.bf16.mxu0 %vm1557_vm0, %v1556_v1 }
 0x386   : > { %v1529_v55 = vpop.eup %1528 }
 0x387   : > { %v1058_v56 = vmul.f32 %v1529_v55, %v1521_v34 }
 0x389   : > { %v1059_v57 = vpack.c.bf16 %v1058_v56, %v1058_v56 }
 0x38c   : > { %1463 = vmatmul.mubr.msk.bf16.vlgmr.msra.gmra.mrb[20].mxu0 %vm661_vm2, %v1059_v57 }
 0x3dc   : > { %v763_v58 = vpop.f32.mrb[8].mxu0 }
 0x3dd   : > { %v1428_v59 = vpop.f32.mrb[9].mxu0 }
 0x3de   : > { %v766_v60 = vpop.f32.mrb[10].mxu0 }
 0x3df   : > { %v1429_v61 = vpop.f32.mrb[11].mxu0 }
 0x44e   : > { %v878_v63 = vpop.f32.mrb[12].mxu0 }
 0x44f   : > { %1109 = vrot.lane.b32.xlu1 %v878_v63, %s1561_s16  ;;  %v1440_v0 = vpop.f32.mrb[13].mxu0 }
 0x450   : > { %v881_v2 = vpop.f32.mrb[14].mxu0 }
 0x451   : > { %v1441_v3 = vpop.f32.mrb[15].mxu0 }
 0x457   : > { %v990_v5 = vpop.f32.mrb[16].mxu0 }
 0x458   : > { %1113 = vrot.lane.b32.xlu0 %v990_v5, %s1562_s21  ;;  %v1452_v6 = vpop.f32.mrb[17].mxu0 }
 0x459   : > { %v993_v8 = vpop.f32.mrb[18].mxu0 }
 0x45a   : > { %v1453_v9 = vpop.f32.mrb[19].mxu0 }
 0x45f   : > { %v1102_v10 = vpop.f32.mrb[20].mxu0 }
 0x460   : > { %1117 = vrot.lane.b32.xlu1 %v1102_v10, %s1563_s22  ;;  %v1464_v1 = vpop.f32.mrb[21].mxu0 }
 0x461   : > { %v1105_v11 = vpop.f32.mrb[22].mxu0 }
 0x462   : > { %v1465_v12 = vpop.f32.mrb[23].mxu0 }
 0x4c1   : > { %v1110_v13 = vpop.permute.xlu1 %1109 }
 0x4c2   : > { %v1120_v15 = vsel %vm661_vm2, %v763_v58, %v1110_v13 }
 0x4ca   : > { %v1114_v14 = vpop.permute.xlu0 %1113 }
 0x4cb   : > { %v1122_v16 = vsel %vm1121_vm4, %v1120_v15, %v1114_v14 }
 0x4d2   : > { %v1118_v17 = vpop.permute.xlu1 %1117 }
 0x4d3   : > { %v1124_v18 = vsel %vm1123_vm5, %v1122_v16, %v1118_v17 }
 0x4d4   : > { %v1129_v19 = vpack.c.bf16 %v1124_v18, %v1124_v18 }
 0x4d6   : > { %1471 = vmatmul.mubr.msk.bf16.vlgmr.msra.gmra.mrb[20].mxu1 %vm472_vm1, %v1129_v19 }
 0x5a9   : > { %v1186_v21 = vpop.f32.mrb[20].mxu1 }
 0x5aa   : > { %v1187_v22 = vadd.f32 %v1358_v20, %v1186_v21  ;;  %v1472_v23 = vpop.f32.mrb[21].mxu1 }
 0x5ab   : > { %v1189_v24 = vpop.f32.mrb[22].mxu1 }
 0x5ac   : > { %v1473_v25 = vpop.f32.mrb[23].mxu1  ;;  %v1192_v26 = vadd.f32 %v1187_v22, %v1677_v7  ;;  %v1362_v7 = vld [vmem:[%s1809_s9] ss:$0 sm:$0xff] }
 0x5ae   : > { %v1195_v27 = vsel %vm472_vm1, %v1192_v26, 0.0 }
 0x5af   : > { %1196 = vadd.xlane.f32.xlu0 %v1195_v27 }
 0x63c   : > { %v1197_v28 = vpop.xlane.xlu0 %1196 }
 0x63d   : > { %v1199_v29 = vmul.f32 0.03125, %v1197_v28 }
 0x63f   : > { %v1200_v30 = vsub.f32 %v1192_v26, %v1199_v29 }
 0x641   : > { %v1201_v31 = vmul.f32 %v1200_v30, %v1200_v30 }
 0x643   : > { %v1202_v32 = vsel %vm472_vm1, %v1201_v31, 0.0 }
 0x644   : > { %1203 = vadd.xlane.f32.xlu1 %v1202_v32 }
 0x6d1   : > { %v1204_v33 = vpop.xlane.xlu1 %1203 }
 0x6d2   : > { %v1205_v34 = vmul.f32 0.03125, %v1204_v33 }
 0x6d4   : > { %v1206_v35 = vadd.f32 1e-12, %v1205_v34 }
 0x6d6   : > { %1530 = vrsqrt.f32 %v1206_v35 }
 0x6e0   : > { %v1531_v36 = vpop.eup %1530 }
 0x6e1   : > { %v1208_v37 = vmul.f32 %v1531_v36, %v1200_v30 }
 0x6e3   : > { %v1215_v39 = vmul.f32 %v1362_v7, %v1208_v37 }
 0x6e5   : > { %v1222_v40 = vadd.f32 %v1363_v38, %v1215_v39 }
 0x6e7   : > { %1223 = vst.msk [vmem:[%s443_s13] sm:$0xff] %vm472_vm1, %v1222_v40 }
 0x6e8 PF: > { %s21_s19 = sadd.s32 1, %s1554_s19   ;;  %s1812_s17 = smov %s1550_s18 }
 0x6e9   : > { %p18_p5 = scmp.ge.s32.totalorder %s21_s19, 4   ;;  %s1813_s18 = smov %s1815_s7 }
 0x6eb   :  { %20 = sbr.rel (!%p18_p5) target bundleno = 2 (0x2), region = 104 }

// kernel: forward.8
= control target key start
LH: loop header
LB: loop body
LE: loop exit
PB: predicated region body
PF: predicated region fallthrough
CT: control target
= control target key end

     0   :  { %s1686_s17 = smov 0   ;;  %s1688_s18 = smov 0   ;;  %s1878_s0 = inlined_call_operand.vmem [shape: f32[2,8,32], index: 0, kind: input, shape index: {}, may-alias: {0,1}]   ;;  %s1879_s1 = inlined_call_operand.vmem [shape: f32[2,8,32], index: 1, kind: input, shape index: {}, may-alias: {0,1}]   ;;  %s1880_s2 = inlined_call_operand.vmem [shape: f32[2,1,8], index: 2, kind: input, shape index: {}]   ;;  %s1881_s3 = inlined_call_operand.vmem [shape: bf16[3,32,32], index: 3, kind: input, shape index: {}]   ;;  %s1882_s4 = inlined_call_operand.vmem [shape: f32[3,1,32], index: 4, kind: input, shape index: {}]   ;;  %s1883_s5 = inlined_call_operand.vmem [shape: bf16[32,32], index: 5, kind: input, shape index: {}]   ;;  %s1884_s6 = inlined_call_operand.vmem [shape: f32[1,32], index: 6, kind: input, shape index: {}, may-alias: {6,8,10}]   ;;  %s1885_s7 = inlined_call_operand.vmem [shape: f32[1,32], index: 7, kind: input, shape index: {}, may-alias: {7,9}]   ;;  %s1886_s8 = inlined_call_operand.vmem [shape: f32[1,32], index: 8, kind: input, shape index: {}, may-alias: {6,8,10}]   ;;  %s1887_s9 = inlined_call_operand.vmem [shape: f32[1,32], index: 9, kind: input, shape index: {}, may-alias: {7,9}]   ;;  %s1888_s10 = inlined_call_operand.vmem [shape: f32[1,32], index: 10, kind: input, shape index: {}, may-alias: {6,8,10}]   ;;  %s1889_s11 = inlined_call_operand.vmem [shape: f32[2,8,32], index: 11, kind: output, shape index: {}]  }
   0x1   :  { %s1690_s19 = smov 0  }
   0x2 LB: > { %s33_s20 = sadd.s32 1, %s1611_s18  ;;  %p1377_p0 = scmp.ge.s32.totalorder %s1615_s19, 1  ;;  %s1615_s19 = sphi %s1690_s19, %s21_s19   ;;  %s1611_s18 = sphi %s1688_s18, %s1891_s18   ;;  %s1607_s17 = sphi %s1686_s17, %s1890_s17  }
   0x3   : > { %p35_p1 = scmp.ge.s32.totalorder %s33_s20, 2  ;;  %p372_p2 = scmp.lt.s32.totalorder %s1615_s19, 3 }
   0x5   : > { %s1893_s20 = smov (%p35_p1, %s33_s20), 0  ;;  %p373_p3 = pnand %p1377_p0, %p372_p2 }
   0x6   : > { %p423_p4 = scmp.lt.s32.totalorder (!%p373_p3), %s1607_s17, 1  ;;  %vm448_vm0 = vcmask (!%p373_p3), 261120   ;;  %v1563_v14 = vld [vmem:[%s1881_s3 + $0x10] sm:$0xff] (!%p373_p3)   ;;  %v1617_v15 = vmov (!%p373_p3), 0.0   ;;  %v1564_v16 = vld [vmem:[%s1881_s3] sm:$0xff] (!%p373_p3)   ;;  %v1565_v17 = vld [vmem:[%s1881_s3 + $0x18] sm:$0xff] (!%p373_p3)  }
   0x7   : > { %376 = sbr.rel (%p373_p3) target bundleno = 2117 (0x845), region = 64  ;;  %1458 = vmatprep.subr.bf16.mxu1 (!%p373_p3), %v1617_v15  ;;  %1450 = vmatprep.subr.bf16.mxu0 (!%p373_p3), %v1617_v15  ;;  %vm1618_vm1 = vmmov (!%p373_p3), 0   ;;  %v1566_v18 = vld [vmem:[%s1881_s3 + $0x8] sm:$0xff] (!%p373_p3)   ;;  %v1381_v26 = vld [vmem:[%s1885_s7] ss:$0 sm:$0xff] (!%p373_p3)  ;;  %vm716_vm2 = vcmask (!%p373_p3), 64512  }
   0x8   : > { %1459 = vmatpush3.bf16.msra.mxu1 (!%p373_p3), %v1563_v14  ;;  %1451 = vmatpush3.bf16.msra.mxu0 (!%p373_p3), %v1564_v16  ;;  %v1382_v28 = vld [vmem:[%s1886_s8] ss:$0 sm:$0xff] (!%p373_p3)  ;;  %v1568_v38 = vld [vmem:[%s1881_s3 + $0x28] sm:$0xff] (!%p373_p3)   ;;  %v1392_v39 = vld [vmem:[%s1882_s4 + $0x1] ss:$0 sm:$0xff] (!%p373_p3)  ;;  %s1619_s15 = smov (!%p373_p3), 120  }
   0x9   : > { %1460 = vmatprep.subr.bf16.mxu1 (!%p373_p3), %v1617_v15  ;;  %1462 = vmatprep.mubr.msk.bf16.mxu1 (!%p373_p3), %vm1618_vm1, %v1617_v15  ;;  %v1567_v36 = vld [vmem:[%s1881_s3 + $0x20] sm:$0xff] (!%p373_p3)   ;;  %s1620_s16 = smov (!%p373_p3), 104   ;;  %vm780_vm3 = vcmask (!%p373_p3), 1043456   ;;  %v1622_v16 = vmov (!%p373_p3), -1e+09   ;;  %s1623_s29 = smov (!%p373_p3), 8  }
   0xa   : > { %1452 = vmatprep.subr.bf16.mxu0 (!%p373_p3), %v1617_v15  ;;  %1454 = vmatprep.mubr.msk.bf16.mxu0 (!%p373_p3), %vm1618_vm1, %v1617_v15  ;;  %v1383_v44 = vld [vmem:[%s1882_s4] ss:$0 sm:$0xff] (!%p373_p3)  ;;  %v1401_v54 = vld [vmem:[%s1882_s4 + $0x2] ss:$0 sm:$0xff] (!%p373_p3)  ;;  %s1624_s30 = smov (!%p373_p3), 16   ;;  %s1625_s14 = smov (!%p373_p3), 24  }
   0xb   : > { %vm1176_vm5 = vcmask (!%p373_p3), 130048   ;;  %vm1178_vm6 = vcmask (!%p373_p3), 195584  }
   0xc   : > { %1461 = vmatpush3.bf16.msra.mxu1 (!%p373_p3), %v1565_v17  ;;  %1453 = vmatpush3.bf16.msra.mxu0 (!%p373_p3), %v1566_v18 }
   0xd   : > { %1474 = vmatprep.subr.bf16.mxu1 (!%p373_p3), %v1617_v15  ;;  %1466 = vmatprep.subr.bf16.mxu0 (!%p373_p3), %v1617_v15 }
   0xe   : > { %s1895_s17 = smov (!%p423_p4, %s1607_s17), 1 }
   0xf   : > { %s1707_s21 = sshll.u32 %s1895_s17, 3 }
  0x10   : > { %s433_s24 = scalar_lea.vmem %s1879_s1, %s1707_s21  ;;  %s429_s27 = scalar_lea.vmem %s1878_s0, %s1707_s21 }
  0x11   : > { %v477_v0 = vld [vmem:[%s433_s24] sm:$0xff]  ;;  %s1621_s24 = smov 112  }
  0x12   : > { %v478_v1 = vsel %vm448_vm0, %v477_v0, 0.0  ;;  %v445_v2 = vld [vmem:[%s429_s27] sm:$0xff]  ;;  %s436_s27 = scalar_lea.vmem %s1880_s2, %s1895_s17  ;;  %s443_s17 = scalar_lea.vmem %s1889_s11, %s1707_s21 }
  0x13   : > { %479 = vadd.xlane.f32.xlu0 %v478_v1  ;;  %v449_v3 = vsel %vm448_vm0, %v445_v2, 0.0 }
  0x17   : > { %450 = vadd.xlane.f32.xlu0 %v449_v3 }
  0xa0   : > { %v480_v4 = vpop.xlane.xlu0 %479 }
  0xa1   : > { %v481_v5 = vmul.f32 0.03125, %v480_v4 }
  0xa3   : > { %v482_v6 = vsub.f32 %v477_v0, %v481_v5 }
  0xa4   : > { %v451_v7 = vpop.xlane.xlu0 %450 }
  0xa5   : > { %v453_v8 = vmul.f32 0.03125, %v451_v7  ;;  %v483_v9 = vmul.f32 %v482_v6, %v482_v6  ;;  %v701_v7 = vlaneseq }
  0xa7   : > { %v454_v10 = vsub.f32 %v445_v2, %v453_v8  ;;  %v484_v11 = vsel %vm448_vm0, %v483_v9, 0.0  ;;  %v697_v8 = vld [vmem:[%s436_s27] sm:$0x1] }
  0xa8   : > { %485 = vadd.xlane.f32.xlu1 %v484_v11  ;;  %v1405_v9 = vadd.f32 -1.0, %v697_v8  ;;  %v712_v11 = vand.u32 127, %v701_v7 }
  0xa9   : > { %v455_v12 = vmul.f32 %v454_v10, %v454_v10 }
  0xab   : > { %v456_v13 = vsel %vm448_vm0, %v455_v12, 0.0  ;;  %v699_v12 = vmul.f32 1e+09, %v1405_v9 }
  0xac   : > { %457 = vadd.xlane.f32.xlu1 %v456_v13 }
 0x135   : > { %v486_v19 = vpop.xlane.xlu1 %485 }
 0x136   : > { %v487_v20 = vmul.f32 0.03125, %v486_v19 }
 0x138   : > { %v488_v21 = vadd.f32 1e-12, %v487_v20 }
 0x139   : > { %v458_v22 = vpop.xlane.xlu1 %457 }
 0x13a   : > { %1571 = vrsqrt.f32 %v488_v21  ;;  %v459_v23 = vmul.f32 0.03125, %v458_v22 }
 0x13c   : > { %v460_v24 = vadd.f32 1e-12, %v459_v23 }
 0x13e   : > { %1573 = vrsqrt.f32 %v460_v24 }
 0x144   : > { %v1572_v25 = vpop.eup %1571 }
 0x145   : > { %v490_v27 = vmul.f32 %v1572_v25, %v482_v6 }
 0x147   : > { %v491_v29 = vmul.f32 %v1381_v26, %v490_v27 }
 0x148   : > { %v1574_v30 = vpop.eup %1573 }
 0x149   : > { %v462_v31 = vmul.f32 %v1574_v30, %v454_v10  ;;  %v492_v32 = vadd.f32 %v1382_v28, %v491_v29  ;;  %v702_v10 = vshrl.u32 %v701_v7, 7 }
 0x14b   : > { %v494_v33 = vpack.c.bf16 %v492_v32, %v492_v32  ;;  %v469_v34 = vmul.f32 %v1381_v26, %v462_v31  ;;  %v703_v13 = vsub.s32 0, %v702_v10  ;;  %vm713_vm4 = vcmp.le.s32.totalorder %v712_v11, %v702_v10 }
 0x14c   : > { %v714_v17 = vsel %vm713_vm4, 0.0, %v1622_v16 }
 0x14d   : > { %1463 = vmatmul.mubr.msk.bf16.vlgmr.msra.gmra.mrb[0].mxu1 %vm448_vm0, %v494_v33  ;;  %v1750_v35 = vadd.f32 %v1382_v28, %v469_v34  ;;  %v704_v14 = vrot.slane %v699_v12, %v703_v13 }
 0x14e   : > { %1476 = vmatprep.mubr.msk.bf16.mxu1 %vm1618_vm1, %v1617_v15 }
 0x14f   : > { %v493_v37 = vpack.c.bf16 %v1750_v35, %v1750_v35  ;;  %v715_v18 = vadd.f32 %v714_v17, %v704_v14 }
 0x151   : > { %1455 = vmatmul.mubr.msk.bf16.vlgmr.msra.gmra.mrb[0].mxu0 %vm448_vm0, %v493_v37 }
 0x152   : > { %1467 = vmatpush3.bf16.msra.mxu0 %v1567_v36  ;;  %1470 = vmatprep.mubr.msk.bf16.mxu0 %vm1618_vm1, %v1617_v15 }
 0x153   : > { %1468 = vmatprep.subr.bf16.mxu0 %v1617_v15 }
 0x156   : > { %1469 = vmatpush3.bf16.msra.mxu0 %v1568_v38 }
 0x157   : > { %1480 = vmatprep.subr.bf16.mxu0 %v1617_v15 }
 0x159   : > { %1471 = vmatmul.mubr.msk.bf16.vlgmr.msra.gmra.mrb[4].mxu0 %vm448_vm0, %v494_v33 }
 0x15a   : > { %1482 = vmatprep.mubr.msk.bf16.mxu0 %vm1618_vm1, %v1617_v15 }
 0x220   : > { %v624_v40 = vpop.f32.mrb[0].mxu1 }
 0x221   : > { %v625_v41 = vadd.f32 %v1392_v39, %v624_v40  ;;  %v1464_v42 = vpop.f32.mrb[1].mxu1 }
 0x222   : > { %v627_v43 = vpop.f32.mrb[2].mxu1 }
 0x223   : > { %v630_v45 = vpack.c.bf16 %v625_v41, %v625_v41  ;;  %v1465_v46 = vpop.f32.mrb[3].mxu1 }
 0x224   : > { %v555_v47 = vpop.f32.mrb[0].mxu0 }
 0x225   : > { %v556_v48 = vadd.f32 %v1383_v44, %v555_v47  ;;  %828 = vrot.lane.b32.xlu0 %v630_v45, %s1619_s15  ;;  %v1456_v49 = vpop.f32.mrb[1].mxu0  ;;  %v721_v50 = vsel %vm716_vm2, %v630_v45, 0 }
 0x226   : > { %v558_v51 = vpop.f32.mrb[2].mxu0  ;;  %1475 = vmatpush3.bf16.xpose.msra.mxu1 %v721_v50 }
 0x227   : > { %v561_v52 = vpack.c.bf16 %v556_v48, %v556_v48  ;;  %v1457_v53 = vpop.f32.mrb[3].mxu0  ;;  %1486 = vmatprep.subr.bf16.mxu1 %v1617_v15 }
 0x229   : > { %1053 = vrot.lane.b32.xlu0 %v630_v45, %s1620_s16  ;;  %825 = vrot.lane.b32.xlu1 %v561_v52, %s1619_s15 }
 0x22c   : > { %v690_v55 = vpop.f32.mrb[4].mxu0 }
 0x22d   : > { %v691_v56 = vadd.f32 %v1401_v54, %v690_v55  ;;  %941 = vrot.lane.b32.xlu1 %v630_v45, %s1621_s24  ;;  %v1472_v57 = vpop.f32.mrb[5].mxu0  ;;  %1477 = vmatmul.mubr.msk.bf16.vlgmr.msra.gmra.mrb[4].mxu1 %vm716_vm2, %v561_v52 }
 0x22e   : > { %v693_v58 = vpop.f32.mrb[6].mxu0  ;;  %1488 = vmatprep.mubr.msk.bf16.mxu1 %vm1618_vm1, %v1617_v15 }
 0x22f   : > { %v1788_v59 = vpack.c.bf16 %v691_v56, %v691_v56  ;;  %v1473_v60 = vpop.f32.mrb[7].mxu0 }
 0x231   : > { %939 = vrot.lane.b32.xlu1 %v561_v52, %s1621_s24  ;;  %v782_v61 = vsel %vm780_vm3, %v1788_v59, 0 }
 0x232   : > { %1481 = vmatpush3.bf16.msra.mxu0 %v782_v61 }
 0x233   : > { %1492 = vmatprep.subr.bf16.mxu0 %v1617_v15 }
 0x235   : > { %1051 = vrot.lane.b32.xlu1 %v561_v52, %s1620_s16 }
 0x297   : > { %v829_v62 = vpop.permute.xlu0 %828 }
 0x298   : > { %v834_v63 = vsel %vm716_vm2, %v829_v62, 0 }
 0x299   : > { %1487 = vmatpush3.bf16.xpose.msra.mxu1 %v834_v63 }
 0x29a   : > { %1498 = vmatprep.subr.bf16.mxu1 %v1617_v15 }
 0x29b   : > { %v826_v0 = vpop.permute.xlu1 %825  ;;  %v1054_v3 = vpop.permute.xlu0 %1053 }
 0x29c   : > { %v1059_v5 = vsel %vm716_vm2, %v1054_v3, 0 }
 0x29f   : > { %v942_v1 = vpop.permute.xlu1 %941 }
 0x2a0   : > { %v947_v2 = vsel %vm716_vm2, %v942_v1, 0  ;;  %1489 = vmatmul.mubr.msk.bf16.vlgmr.msra.gmra.mrb[8].mxu1 %vm716_vm2, %v826_v0 }
 0x2a1   : > { %1499 = vmatpush3.bf16.xpose.msra.mxu1 %v947_v2  ;;  %1500 = vmatprep.mubr.msk.bf16.mxu1 %vm1618_vm1, %v1617_v15 }
 0x2a2   : > { %1510 = vmatprep.subr.bf16.mxu1 %v1617_v15 }
 0x2a3   : > { %v940_v4 = vpop.permute.xlu1 %939 }
 0x2a7   : > { %v1052_v6 = vpop.permute.xlu1 %1051 }
 0x2a8   : > { %1501 = vmatmul.mubr.msk.bf16.vlgmr.msra.gmra.mrb[12].mxu1 %vm716_vm2, %v940_v4 }
 0x2a9   : > { %1511 = vmatpush3.bf16.xpose.msra.mxu1 %v1059_v5  ;;  %1512 = vmatprep.mubr.msk.bf16.mxu1 %vm1618_vm1, %v1617_v15 }
 0x2aa   : > { %1522 = vmatprep.subr.bf16.mxu1 %v1617_v15 }
 0x2b0   : > { %1513 = vmatmul.mubr.msk.bf16.vlgmr.msra.gmra.mrb[16].mxu1 %vm716_vm2, %v1052_v6 }
 0x2b1   : > { %1526 = vmatprep.mubr.msk.bf16.mxu1 %vm1618_vm1, %v1617_v15 }
 0x300   : > { %v757_v19 = vpop.f32.mrb[4].mxu1 }
 0x301   : > { %v763_v20 = vmul.f32 0.35355338, %v757_v19  ;;  %v1478_v21 = vpop.f32.mrb[5].mxu1 }
 0x302   : > { %v760_v22 = vpop.f32.mrb[6].mxu1 }
 0x303   : > { %v1479_v23 = vpop.f32.mrb[7].mxu1  ;;  %v764_v24 = vadd.f32 %v763_v20, %v715_v18 }
 0x305   : > { %v765_v25 = vsel %vm716_vm2, %v764_v24, -inf }
 0x306   : > { %766 = vmax.xlane.f32.xlu0 %v765_v25 }
 0x373   : > { %v870_v26 = vpop.f32.mrb[8].mxu1 }
 0x374   : > { %v876_v27 = vmul.f32 0.35355338, %v870_v26  ;;  %v1490_v28 = vpop.f32.mrb[9].mxu1 }
 0x375   : > { %v873_v29 = vpop.f32.mrb[10].mxu1 }
 0x376   : > { %v1491_v30 = vpop.f32.mrb[11].mxu1  ;;  %v877_v31 = vadd.f32 %v876_v27, %v715_v18 }
 0x378   : > { %v878_v32 = vsel %vm716_vm2, %v877_v31, -inf }
 0x379   : > { %879 = vmax.xlane.f32.xlu1 %v878_v32 }
 0x37b   : > { %v983_v33 = vpop.f32.mrb[12].mxu1 }
 0x37c   : > { %v989_v34 = vmul.f32 0.35355338, %v983_v33  ;;  %v1502_v36 = vpop.f32.mrb[13].mxu1 }
 0x37d   : > { %v986_v37 = vpop.f32.mrb[14].mxu1 }
 0x37e   : > { %v1503_v38 = vpop.f32.mrb[15].mxu1  ;;  %v990_v39 = vadd.f32 %v989_v34, %v715_v18 }
 0x380   : > { %v991_v40 = vsel %vm716_vm2, %v990_v39, -inf }
 0x381   : > { %992 = vmax.xlane.f32.xlu0 %v991_v40 }
 0x383   : > { %v1095_v41 = vpop.f32.mrb[16].mxu1 }
 0x384   : > { %v1101_v42 = vmul.f32 0.35355338, %v1095_v41  ;;  %v1514_v43 = vpop.f32.mrb[17].mxu1  ;;  %v1570_v41 = vld [vmem:[%s1883_s5 + $0x8] sm:$0xff]  }
 0x385   : > { %v1098_v44 = vpop.f32.mrb[18].mxu1 }
 0x386   : > { %v1515_v45 = vpop.f32.mrb[19].mxu1  ;;  %v1102_v46 = vadd.f32 %v1101_v42, %v715_v18 }
 0x388   : > { %v1103_v47 = vsel %vm716_vm2, %v1102_v46, -inf }
 0x389   : > { %1104 = vmax.xlane.f32.xlu0 %v1103_v47 }
 0x393   : > { %v767_v48 = vpop.xlane.xlu0 %766 }
 0x394   : > { %v768_v49 = vsub.f32 %v764_v24, %v767_v48 }
 0x396   : > { %v769_v50 = vmul.f32 1.442695, %v768_v49 }
 0x398   : > { %1575 = vpow2.f32 %v769_v50 }
 0x3a2   : > { %v1576_v51 = vpop.eup %1575 }
 0x3a3   : > { %v771_v52 = vsel %vm716_vm2, %v1576_v51, 0.0 }
 0x3a4   : > { %772 = vadd.xlane.f32.xlu0 %v771_v52  ;;  %v1414_v52 = vld [vmem:[%s1884_s6] ss:$0 sm:$0xff] }
 0x406   : > { %v880_v53 = vpop.xlane.xlu1 %879 }
 0x407   : > { %v881_v54 = vsub.f32 %v877_v31, %v880_v53  ;;  %v1569_v31 = vld [vmem:[%s1883_s5] sm:$0xff]  }
 0x408   : > { %1523 = vmatpush3.bf16.msra.mxu1 %v1569_v31 }
 0x409   : > { %v882_v55 = vmul.f32 1.442695, %v881_v54  ;;  %1524 = vmatprep.subr.bf16.mxu1 %v1617_v15 }
 0x40b   : > { %1577 = vpow2.f32 %v882_v55 }
 0x40c   : > { %1525 = vmatpush3.bf16.msra.mxu1 %v1570_v41 }
 0x40e   : > { %v993_v56 = vpop.xlane.xlu0 %992 }
 0x40f   : > { %v994_v57 = vsub.f32 %v990_v39, %v993_v56 }
 0x411   : > { %v995_v58 = vmul.f32 1.442695, %v994_v57 }
 0x413   : > { %1579 = vpow2.f32 %v995_v58 }
 0x415   : > { %v1578_v60 = vpop.eup %1577 }
 0x416   : > { %v884_v61 = vsel %vm716_vm2, %v1578_v60, 0.0  ;;  %v1105_v0 = vpop.xlane.xlu0 %1104 }
 0x417   : > { %885 = vadd.xlane.f32.xlu1 %v884_v61  ;;  %v1106_v2 = vsub.f32 %v1102_v46, %v1105_v0 }
 0x419   : > { %v1107_v3 = vmul.f32 1.442695, %v1106_v2 }
 0x41d   : > { %v1580_v62 = vpop.eup %1579 }
 0x41e   : > { %v997_v63 = vsel %vm716_vm2, %v1580_v62, 0.0 }
 0x41f   : > { %998 = vadd.xlane.f32.xlu0 %v997_v63 }
 0x428   : > { %1003 = vrot.lane.b32.xlu1 %v1788_v59, %s1621_s24 }
 0x431   : > { %v773_v1 = vpop.xlane.xlu0 %772 }
 0x432   : > { %1581 = vrcp.f32 %v773_v1 }
 0x433   : > { %1583 = vpow2.f32 %v1107_v3 }
 0x435   : > { %891 = vrot.lane.b32.xlu0 %v1788_v59, %s1619_s15 }
 0x43c   : > { %v1582_v4 = vpop.eup %1581 }
 0x43d   : > { %v775_v5 = vmul.f32 %v1582_v4, %v1576_v51  ;;  %v1584_v7 = vpop.eup %1583 }
 0x43e   : > { %v1109_v8 = vsel %vm716_vm2, %v1584_v7, 0.0 }
 0x43f   : > { %v776_v6 = vpack.c.bf16 %v775_v5, %v775_v5 }
 0x441   : > { %1483 = vmatmul.mubr.msk.bf16.vlgmr.msra.gmra.mrb[8].mxu0 %vm716_vm2, %v776_v6 }
 0x442   : > { %1494 = vmatprep.mubr.msk.bf16.mxu0 %vm1618_vm1, %v1617_v15 }
 0x44c   : > { %1110 = vadd.xlane.f32.xlu1 %v1109_v8 }
 0x45d   : > { %1115 = vrot.lane.b32.xlu1 %v1788_v59, %s1620_s16 }
 0x4a4   : > { %v886_v9 = vpop.xlane.xlu1 %885 }
 0x4a5   : > { %1585 = vrcp.f32 %v886_v9 }
 0x4a8   : > { %v1004_v16 = vpop.permute.xlu1 %1003 }
 0x4a9   : > { %v1009_v18 = vsel %vm780_vm3, %v1004_v16, 0 }
 0x4ac   : > { %v999_v10 = vpop.xlane.xlu0 %998 }
 0x4ad   : > { %1587 = vrcp.f32 %v999_v10 }
 0x4af   : > { %v1586_v11 = vpop.eup %1585 }
 0x4b0   : > { %v888_v12 = vmul.f32 %v1586_v11, %v1578_v60  ;;  %v892_v13 = vpop.permute.xlu0 %891 }
 0x4b1   : > { %v897_v14 = vsel %vm780_vm3, %v892_v13, 0 }
 0x4b2   : > { %1493 = vmatpush3.bf16.msra.mxu0 %v897_v14  ;;  %v889_v17 = vpack.c.bf16 %v888_v12, %v888_v12 }
 0x4b3   : > { %1504 = vmatprep.subr.bf16.mxu0 %v1617_v15 }
 0x4b5   : > { %1495 = vmatmul.mubr.msk.bf16.vlgmr.msra.gmra.mrb[12].mxu0 %vm716_vm2, %v889_v17 }
 0x4b6   : > { %1505 = vmatpush3.bf16.msra.mxu0 %v1009_v18  ;;  %1506 = vmatprep.mubr.msk.bf16.mxu0 %vm1618_vm1, %v1617_v15 }
 0x4b7   : > { %v1588_v59 = vpop.eup %1587  ;;  %1516 = vmatprep.subr.bf16.mxu0 %v1617_v15 }
 0x4b8   : > { %v1001_v19 = vmul.f32 %v1588_v59, %v1580_v62 }
 0x4ba   : > { %v1002_v20 = vpack.c.bf16 %v1001_v19, %v1001_v19 }
 0x4bd   : > { %1507 = vmatmul.mubr.msk.bf16.vlgmr.msra.gmra.mrb[16].mxu0 %vm716_vm2, %v1002_v20 }
 0x4be   : > { %1518 = vmatprep.mubr.msk.bf16.mxu0 %vm1618_vm1, %v1617_v15 }
 0x4d9   : > { %v1111_v21 = vpop.xlane.xlu1 %1110 }
 0x4da   : > { %1589 = vrcp.f32 %v1111_v21 }
 0x4dd   : > { %v1116_v22 = vpop.permute.xlu1 %1115 }
 0x4de   : > { %v1121_v23 = vsel %vm780_vm3, %v1116_v22, 0 }
 0x4df   : > { %1517 = vmatpush3.bf16.msra.mxu0 %v1121_v23 }
 0x4e4   : > { %v1590_v24 = vpop.eup %1589 }
 0x4e5   : > { %v1113_v25 = vmul.f32 %v1590_v24, %v1584_v7  ;;  %v1419_v7 = vld [vmem:[%s1888_s10] ss:$0 sm:$0xff] }
 0x4e7   : > { %v1114_v26 = vpack.c.bf16 %v1113_v25, %v1113_v25 }
 0x4e9   : > { %1519 = vmatmul.mubr.msk.bf16.vlgmr.msra.gmra.mrb[20].mxu0 %vm716_vm2, %v1114_v26 }
 0x514   : > { %v818_v27 = vpop.f32.mrb[8].mxu0 }
 0x515   : > { %v1484_v28 = vpop.f32.mrb[9].mxu0 }
 0x516   : > { %v821_v29 = vpop.f32.mrb[10].mxu0 }
 0x517   : > { %v1485_v30 = vpop.f32.mrb[11].mxu0 }
 0x588   : > { %v933_v32 = vpop.f32.mrb[12].mxu0 }
 0x589   : > { %1164 = vrot.lane.b32.xlu1 %v933_v32, %s1623_s29  ;;  %v1496_v33 = vpop.f32.mrb[13].mxu0 }
 0x58a   : > { %v936_v34 = vpop.f32.mrb[14].mxu0 }
 0x58b   : > { %v1497_v36 = vpop.f32.mrb[15].mxu0 }
 0x590   : > { %v1045_v37 = vpop.f32.mrb[16].mxu0 }
 0x591   : > { %1168 = vrot.lane.b32.xlu0 %v1045_v37, %s1624_s30  ;;  %v1508_v38 = vpop.f32.mrb[17].mxu0 }
 0x592   : > { %v1048_v39 = vpop.f32.mrb[18].mxu0 }
 0x593   : > { %v1509_v40 = vpop.f32.mrb[19].mxu0 }
 0x5bc   : > { %v1157_v42 = vpop.f32.mrb[20].mxu0 }
 0x5bd   : > { %1172 = vrot.lane.b32.xlu1 %v1157_v42, %s1625_s14  ;;  %v1520_v15 = vpop.f32.mrb[21].mxu0 }
 0x5be   : > { %v1160_v43 = vpop.f32.mrb[22].mxu0 }
 0x5bf   : > { %v1521_v44 = vpop.f32.mrb[23].mxu0 }
 0x5fb   : > { %v1165_v45 = vpop.permute.xlu1 %1164 }
 0x5fc   : > { %v1175_v47 = vsel %vm716_vm2, %v818_v27, %v1165_v45 }
 0x603   : > { %v1169_v46 = vpop.permute.xlu0 %1168 }
 0x604   : > { %v1177_v48 = vsel %vm1176_vm5, %v1175_v47, %v1169_v46 }
 0x62f   : > { %v1173_v49 = vpop.permute.xlu1 %1172 }
 0x630   : > { %v1179_v50 = vsel %vm1178_vm6, %v1177_v48, %v1173_v49 }
 0x631   : > { %v1184_v51 = vpack.c.bf16 %v1179_v50, %v1179_v50 }
 0x633   : > { %1527 = vmatmul.mubr.msk.bf16.vlgmr.msra.gmra.mrb[20].mxu1 %vm448_vm0, %v1184_v51 }
 0x706   : > { %v1241_v53 = vpop.f32.mrb[20].mxu1 }
 0x707   : > { %v1242_v54 = vadd.f32 %v1414_v52, %v1241_v53  ;;  %v1528_v55 = vpop.f32.mrb[21].mxu1 }
 0x708   : > { %v1244_v56 = vpop.f32.mrb[22].mxu1 }
 0x709   : > { %v1529_v57 = vpop.f32.mrb[23].mxu1  ;;  %v1247_v58 = vadd.f32 %v1242_v54, %v1750_v35  ;;  %v1418_v35 = vld [vmem:[%s1887_s9] ss:$0 sm:$0xff] }
 0x70b   : > { %v1250_v60 = vsel %vm448_vm0, %v1247_v58, 0.0 }
 0x70c   : > { %1251 = vadd.xlane.f32.xlu0 %v1250_v60 }
 0x799   : > { %v1252_v61 = vpop.xlane.xlu0 %1251 }
 0x79a   : > { %v1253_v62 = vmul.f32 0.03125, %v1252_v61 }
 0x79c   : > { %v1254_v63 = vsub.f32 %v1247_v58, %v1253_v62 }
 0x79e   : > { %v1255_v0 = vmul.f32 %v1254_v63, %v1254_v63 }
 0x7a0   : > { %v1256_v1 = vsel %vm448_vm0, %v1255_v0, 0.0 }
 0x7a1   : > { %1257 = vadd.xlane.f32.xlu1 %v1256_v1 }
 0x82e   : > { %v1258_v2 = vpop.xlane.xlu1 %1257 }
 0x82f   : > { %v1259_v3 = vmul.f32 0.03125, %v1258_v2 }
 0x831   : > { %v1260_v4 = vadd.f32 1e-12, %v1259_v3 }
 0x833   : > { %1591 = vrsqrt.f32 %v1260_v4 }
 0x83d   : > { %v1592_v5 = vpop.eup %1591 }
 0x83e   : > { %v1262_v6 = vmul.f32 %v1592_v5, %v1254_v63 }
 0x840   : > { %v1269_v8 = vmul.f32 %v1418_v35, %v1262_v6 }
 0x842   : > { %v1276_v9 = vadd.f32 %v1419_v7, %v1269_v8 }
 0x844   : > { %1277 = vst.msk [vmem:[%s443_s17] sm:$0xff] %vm448_vm0, %v1276_v9 }
 0x845 PF: > { %s21_s19 = sadd.s32 1, %s1615_s19   ;;  %s1890_s17 = smov %s1611_s18 }
 0x846   : > { %p18_p5 = scmp.ge.s32.totalorder %s21_s19, 4   ;;  %s1891_s18 = smov %s1893_s20 }
 0x848   :  { %20 = sbr.rel (!%p18_p5) target bundleno = 2 (0x2), region = 104 }

// kernel: forward.11
= control target key start
LH: loop header
LB: loop body
LE: loop exit
PB: predicated region body
PF: predicated region fallthrough
CT: control target
= control target key end

     0   :  { %v252_v0 = vmov 0.0   ;;  %vm253_vm0 = vmmov 0   ;;  %vm58_vm1 = vcmask 261120   ;;  %v254_v6 = vmov 0   ;;  %s354_s2 = inlined_call_operand.vmem [shape: bf16[32,64], index: 2, kind: input, shape index: {}]   ;;  %s355_s0 = inlined_call_operand.vmem [shape: f32[16,32], index: 0, kind: input, shape index: {}]   ;;  %s356_s3 = inlined_call_operand.vmem [shape: f32[1,64], index: 3, kind: input, shape index: {}]   ;;  %s357_s6 = inlined_call_operand.vmem [shape: f32[16,64], index: 6, kind: output, shape index: {2}]   ;;  %s358_s1 = inlined_call_operand.vmem [shape: s32[16,1], index: 1, kind: input, shape index: {}]   ;;  %s359_s5 = inlined_call_operand.vmem [shape: f32[16,1], index: 5, kind: output, shape index: {1}]   ;;  %s360_s4 = inlined_call_operand.vmem [shape: f32[16,1], index: 4, kind: output, shape index: {0}]  }
   0x1   :  { %224 = vmatprep.subr.bf16.mxu0 %v252_v0  ;;  %v238_v1 = vld [vmem:[%s354_s2] sm:$0xff]   ;;  %228 = vmatprep.mubr.msk.bf16.mxu0 %vm253_vm0, %v252_v0  ;;  %v239_v2 = vld [vmem:[%s354_s2 + $0x8] sm:$0xff]   ;;  %vm25_vm2 = vcmask 7168   ;;  %v255_v7 = vmov -inf   ;;  %vm108_vm3 = vcmask 523264   ;;  %v103_v25 = vlaneseq }
   0x2   :  { %225 = vmatpush3.bf16.msra.mxu0 %v238_v1  ;;  %v32_v3 = vld [vmem:[%s355_s0] sm:$0xff]  ;;  %v33_v4 = vld [vmem:[%s355_s0 + $0x8] sm:$0xff]  ;;  %237 = vset.pattern.permute.xlu0 %v254_v6  ;;  %26 = vst.msk [vmem:[#allocation2] sm:$0xff] %vm25_vm2, %v255_v7  ;;  %27 = vst.msk [vmem:[#allocation2 + $0x8] sm:$0xff] %vm25_vm2, %v255_v7 }
   0x3   :  { %226 = vmatprep.subr.bf16.mxu0 %v252_v0  ;;  %v38_v5 = vpack.c.bf16 %v33_v4, %v32_v3  ;;  %236 = vset.pattern.permute.xlu1 %v254_v6  ;;  %28 = vst.msk [vmem:[#allocation3] sm:$0xff] %vm25_vm2, %v252_v0  ;;  %29 = vst.msk [vmem:[#allocation3 + $0x8] sm:$0xff] %vm25_vm2, %v252_v0  ;;  %v217_v8 = vld [vmem:[%s356_s3] ss:$0 sm:$0xff]  ;;  %v161_v27 = vld [vmem:[%s358_s1 + $0x8] sm:$0xff]  ;;  %v104_v28 = vand.u32 127, %v103_v25 }
   0x4   :  { %30 = vst.msk [vmem:[#allocation4] sm:$0xff] %vm25_vm2, %v252_v0  ;;  %31 = vst.msk [vmem:[#allocation4 + $0x8] sm:$0xff] %vm25_vm2, %v252_v0  ;;  %v160_v17 = vld [vmem:[%s358_s1] sm:$0xff] }
   0x6   :  { %227 = vmatpush3.bf16.msra.mxu0 %v239_v2 }
   0x9   :  { %229 = vmatmul.mubr.msk.bf16.vlgmr.msra.gmra.mrb[0].mxu0 %vm58_vm1, %v38_v5  ;;  %v111_v18 = vld [vmem:[#allocation2] sm:$0xff]  ;;  %v112_v21 = vld [vmem:[#allocation2 + $0x8] sm:$0xff] }
   0xa   :  { %v121_v51 = vld [vmem:[#allocation3] sm:$0xff]  ;;  %v122_v55 = vld [vmem:[#allocation3 + $0x8] sm:$0xff] }
   0xb   :  { %v170_v45 = vld [vmem:[#allocation4] sm:$0xff]  ;;  %v171_v60 = vld [vmem:[#allocation4 + $0x8] sm:$0xff] }
  0xdc   :  { %v96_v9 = vpop.f32.mrb[0].mxu0 }
  0xdd   :  { %v97_v10 = vadd.f32 %v217_v8, %v96_v9  ;;  %v230_v11 = vpop.f32.mrb[1].mxu0 }
  0xde   :  { %v99_v12 = vpop.f32.mrb[2].mxu0 }
  0xdf   :  { %109 = vst.msk [vmem:[%s357_s6] sm:$0xff] %vm108_vm3, %v97_v10  ;;  %v100_v13 = vadd.f32 %v217_v8, %v99_v12  ;;  %v231_v14 = vpop.f32.mrb[3].mxu0  ;;  %v113_v15 = vsel %vm108_vm3, %v97_v10, -inf }
  0xe0   :  { %114 = vmax.xlane.f32.xlu0 %v113_v15 }
  0xe1   :  { %110 = vst.msk [vmem:[%s357_s6 + $0x8] sm:$0xff] %vm108_vm3, %v100_v13  ;;  %v116_v16 = vsel %vm108_vm3, %v100_v13, -inf }
  0xe4   :  { %117 = vmax.xlane.f32.xlu0 %v116_v16 }
  0xfa   :  { %163 = vperm.xlu0 %237, %v160_v17  }
 0x16d   :  { %v115_v19 = vpop.xlane.xlu0 %114 }
 0x16e   :  { %v119_v20 = vmax.f32 %v111_v18, %v115_v19 }
 0x170   :  { %v123_v22 = vsub.f32 %v111_v18, %v119_v20  ;;  %158 = vst.msk [vmem:[#allocation2] sm:$0xff] %vm25_vm2, %v119_v20  ;;  %133 = vperm.xlu1 %236, %v119_v20  }
 0x171   :  { %v118_v23 = vpop.xlane.xlu0 %117 }
 0x172   :  { %v120_v24 = vmax.f32 %v112_v21, %v118_v23  ;;  %v125_v48 = vmul.f32 1.442695, %v123_v22 }
 0x174   :  { %v124_v26 = vsub.f32 %v112_v21, %v120_v24  ;;  %159 = vst.msk [vmem:[#allocation2 + $0x8] sm:$0xff] %vm25_vm2, %v120_v24  ;;  %138 = vperm.xlu1 %236, %v120_v24  }
 0x176   :  { %v127_v49 = vmul.f32 1.442695, %v124_v26 }
 0x177   :  { %v187_v3 = vld [vmem:[#allocation2] sm:$0xff] }
 0x178   :  { %166 = vperm.xlu1 %236, %v161_v27  }
 0x179   :  { %v164_v29 = vpop.permute.xlu0 %163 }
 0x17a   :  { %vm168_vm4 = vcmp.eq.s32.totalorder %v104_v28, %v164_v29 }
 0x17b   :  { %v172_v30 = vsel %vm168_vm4, %v97_v10, 0.0  ;;  %v188_v9 = vld [vmem:[#allocation2 + $0x8] sm:$0xff] }
 0x17c   :  { %v174_v31 = vsel %vm108_vm3, %v172_v30, 0.0 }
 0x17d   :  { %175 = vadd.xlane.f32.xlu0 %v174_v31 }
 0x1ef   :  { %v134_v32 = vpop.permute.xlu1 %133 }
 0x1f0   :  { %v141_v33 = vsub.f32 %v97_v10, %v134_v32 }
 0x1f2   :  { %v143_v34 = vmul.f32 1.442695, %v141_v33 }
 0x1f3   :  { %v139_v35 = vpop.permute.xlu1 %138 }
 0x1f4   :  { %240 = vpow2.f32 %v143_v34  ;;  %v142_v36 = vsub.f32 %v100_v13, %v139_v35 }
 0x1f6   :  { %v145_v37 = vmul.f32 1.442695, %v142_v36 }
 0x1f7   :  { %v167_v39 = vpop.permute.xlu1 %166 }
 0x1f8   :  { %242 = vpow2.f32 %v145_v37  ;;  %vm169_vm5 = vcmp.eq.s32.totalorder %v104_v28, %v167_v39 }
 0x1f9   :  { %v173_v43 = vsel %vm169_vm5, %v100_v13, 0.0  ;;  %244 = vpow2.f32 %v125_v48 }
 0x1fa   :  { %v177_v44 = vsel %vm108_vm3, %v173_v43, 0.0  ;;  %246 = vpow2.f32 %v127_v49 }
 0x1fe   :  { %v241_v38 = vpop.eup %240 }
 0x1ff   :  { %v147_v40 = vsel %vm108_vm3, %v241_v38, 0.0 }
 0x200   :  { %148 = vadd.xlane.f32.xlu1 %v147_v40 }
 0x202   :  { %v243_v41 = vpop.eup %242 }
 0x203   :  { %v150_v42 = vsel %vm108_vm3, %v243_v41, 0.0  ;;  %v245_v50 = vpop.eup %244 }
 0x204   :  { %151 = vadd.xlane.f32.xlu1 %v150_v42  ;;  %v129_v52 = vmul.f32 %v245_v50, %v121_v51  ;;  %v247_v53 = vpop.eup %246 }
 0x205   :  { %v130_v57 = vmul.f32 %v247_v53, %v122_v55 }
 0x208   :  { %178 = vadd.xlane.f32.xlu1 %v177_v44 }
 0x20a   :  { %v176_v46 = vpop.xlane.xlu0 %175 }
 0x20b   :  { %v180_v47 = vadd.f32 %v176_v46, %v170_v45 }
 0x20d   :  { %182 = vst.msk [vmem:[#allocation4] sm:$0xff] %vm25_vm2, %v180_v47 }
 0x214   :  { %v199_v6 = vld [vmem:[#allocation4] sm:$0xff] }
 0x28d   :  { %v149_v54 = vpop.xlane.xlu1 %148 }
 0x28e   :  { %v153_v56 = vadd.f32 %v149_v54, %v129_v52 }
 0x290   :  { %156 = vst.msk [vmem:[#allocation3] sm:$0xff] %vm25_vm2, %v153_v56 }
 0x291   :  { %v152_v58 = vpop.xlane.xlu1 %151 }
 0x292   :  { %v154_v59 = vadd.f32 %v152_v58, %v130_v57 }
 0x294   :  { %157 = vst.msk [vmem:[#allocation3 + $0x8] sm:$0xff] %vm25_vm2, %v154_v59 }
 0x295   :  { %v179_v61 = vpop.xlane.xlu1 %178 }
 0x296   :  { %v181_v62 = vadd.f32 %v179_v61, %v171_v60 }
 0x297   :  { %v189_v63 = vld [vmem:[#allocation3] sm:$0xff] }
 0x298   :  { %248 = vlog2.f32 %v189_v63  ;;  %183 = vst.msk [vmem:[#allocation4 + $0x8] sm:$0xff] %vm25_vm2, %v181_v62 }
 0x29b   :  { %v190_v0 = vld [vmem:[#allocation3 + $0x8] sm:$0xff] }
 0x29c   :  { %250 = vlog2.f32 %v190_v0 }
 0x29f   :  { %v200_v11 = vld [vmem:[#allocation4 + $0x8] sm:$0xff] }
 0x2a2   :  { %v249_v1 = vpop.eup %248 }
 0x2a3   :  { %v192_v2 = vmul.f32 0.6931472, %v249_v1 }
 0x2a5   :  { %v195_v4 = vadd.f32 %v192_v2, %v187_v3 }
 0x2a6   :  { %v251_v5 = vpop.eup %250 }
 0x2a7   :  { %v201_v7 = vsub.f32 %v195_v4, %v199_v6  ;;  %197 = vst.msk [vmem:[%s359_s5] sm:$0xff] %vm25_vm2, %v195_v4  ;;  %v194_v8 = vmul.f32 0.6931472, %v251_v5 }
 0x2a9   :  { %v196_v10 = vadd.f32 %v194_v8, %v188_v9  ;;  %203 = vst.msk [vmem:[%s360_s4] sm:$0xff] %vm25_vm2, %v201_v7 }
 0x2ab   :  { %198 = vst.msk [vmem:[%s359_s5 + $0x8] sm:$0xff] %vm25_vm2, %v196_v10  ;;  %v202_v12 = vsub.f32 %v196_v10, %v200_v11 }
 0x2ad   :  { %204 = vst.msk [vmem:[%s360_s4 + $0x8] sm:$0xff] %vm25_vm2, %v202_v12 }

</bundles_post_ra>
